<compile_context>
chip_gen: v7x
topology: tpu7x:2x2x1
jax: 0.10.0
libtpu: 0.0.40
codegen_flags: <defaults>
</compile_context>

<pallas_src>
import functools

import jax
import jax.numpy as jnp
from jax import lax
from jax.experimental import pallas as pl
from jax.experimental.pallas import tpu as pltpu

L_IN = 6000
C1, C2 = 64, 128
KS = 5
L1_CONV = (L_IN - KS) // 2 + 1            # 2998
L1_POOL = (L1_CONV + 2 - 3) // 2 + 1      # 1499
L2_CONV = (L1_POOL - KS) // 2 + 1         # 748
L2_POOL = (L2_CONV + 2 - 3) // 2 + 1      # 374
NR = 375                                  # conv1 positions grouped 8 per row: 8*375 = 3000 >= 2998
KP = 32                                   # stage-1 im2col lane width (19 real taps, padded)
# Column-block order of the stage-1 block-Toeplitz weight: even conv positions first,
# then odd, so the stage-1 pool operands are contiguous 256-lane slices.
POS_ORDER = (0, 2, 4, 6, 1, 3, 5, 7)


def _cnn_fused_kernel(xpc_ref, w8_ref, b8_ref, w2s_ref, b2_ref, out_ref, *, bb):
    w8 = w8_ref[...]            # (32, 512)  bf16 block-Toeplitz conv1 weights
    wA = w2s_ref[0]             # (256, 256) bf16 conv2 weights, LHS row = YQ[m]
    wB = w2s_ref[1]             # (256, 256) bf16 conv2 weights, LHS row = YQ[m+1]
    b8 = b8_ref[...]            # (1, 512)   f32
    b2 = b2_ref[...]            # (1, 256)   f32

    # Static unroll over the samples of this batch block; every intermediate is a value
    # (no scratch round trips) and dies at the end of its iteration.
    for i in range(bb):
        # ---- stage 1: Conv1d(1->64, k=5, s=2) + ReLU  (one bf16 MXU matmul) ----------
        # xpc_ref[i]: (375, 32), row m = x[16m : 16m+32] (zero padded past the signal).
        # hq lanes [64p, 64p+64) = relu(conv1)[8m + POS_ORDER[p]]  -> even positions in
        # lanes [0,256), odd positions in lanes [256,512).
        hq = jnp.dot(xpc_ref[i], w8, preferred_element_type=jnp.float32)
        hq = jnp.maximum(hq + b8, 0.0)                      # (375, 512) f32

        # ---- stage 1: MaxPool1d(3, 2, pad=1), packed 4 pooled taps per row -----------
        # yq[m] = [y1[4m] | y1[4m+1] | y1[4m+2] | y1[4m+3]] with
        #   y1[4m+k] = max(h1[8m+2k-1], h1[8m+2k], h1[8m+2k+1]).
        # Pad rows use 0 instead of -inf: valid only because ReLU precedes the pool.
        op_b = hq[:, 0:4 * C1]                              # [h1[8m]   | h1[8m+2] | h1[8m+4] | h1[8m+6]]
        op_c = hq[:, 4 * C1:8 * C1]                         # [h1[8m+1] | h1[8m+3] | h1[8m+5] | h1[8m+7]]
        last_odd = op_c[:, 3 * C1:4 * C1]                   # h1[8m+7]
        prev7 = jnp.concatenate(                            # h1[8m-1] (row 0 -> 0 pad)
            [jnp.zeros((1, C1), jnp.float32), last_odd[:NR - 1]], axis=0)
        op_a = jnp.concatenate([prev7, op_c[:, 0:3 * C1]], axis=1)
        yq = jnp.maximum(jnp.maximum(op_a, op_b), op_c)     # (375, 256) f32

        # ---- stage 2: Conv1d(64->128, k=5, s=2) + ReLU  (two K=256/N=256 matmuls) ----
        # g[m] = [conv2[2m] | conv2[2m+1]] = YQ[m] @ wA + YQ[m+1] @ wB.
        # yq row 374 lanes [192,256) hold garbage y1[1499]; it only ever multiplies the
        # all-zero rows [192,256) of wB, so it never reaches the output (keep the zeros).
        lhs0 = yq[0:L2_POOL].astype(jnp.bfloat16)           # (374, 256) rows m
        lhs1 = yq[1:NR].astype(jnp.bfloat16)                # (374, 256) rows m+1
        g = (jnp.dot(lhs0, wA, preferred_element_type=jnp.float32)
             + jnp.dot(lhs1, wB, preferred_element_type=jnp.float32))
        g = jnp.maximum(g + b2, 0.0)                        # (374, 256) f32

        # ---- stage 2: MaxPool1d(3, 2, pad=1) falls out of the N=256 packing ----------
        # out[m] = max(conv2[2m-1], conv2[2m], conv2[2m+1]); conv2[2m-1] is the previous
        # row's high half (0 pad for m=0, again safe because of the preceding ReLU).
        g_lo = g[:, 0:C2]
        g_hi = g[:, C2:2 * C2]
        g_hi_prev = jnp.concatenate(
            [jnp.zeros((1, C2), jnp.float32), g_hi[:L2_POOL - 1]], axis=0)
        out_ref[i] = jnp.maximum(jnp.maximum(g_hi_prev, g_lo), g_hi)   # (374, 128) lane-dense


def _pick_block_batch(B):
    """Largest samples-per-step in (4, 2) dividing B while keeping >= 2 grid steps
    (so the 'parallel' batch axis can shard across both v7x TensorCores)."""
    for bb in (4, 2):
        if B % bb == 0 and B // bb >= 2:
            return bb
    return 1


def cnn_forward(x, w1, b1, w2, b2):
    """x: reshapeable to (-1, 6000). Returns (B, 374, 128) f32 (== torch out.permute(0,2,1))."""
    x = x.reshape(-1, L_IN).astype(jnp.float32)
    B = x.shape[0]
    bb = _pick_block_batch(B)

    # -- stage-1 im2col (pad + reshape + concat, no gather): row m = x[16m : 16m+32] --
    xr = jnp.pad(x, ((0, 0), (0, 16 * (NR + 1) - L_IN))).reshape(B, NR + 1, 16)
    xpc = jnp.concatenate([xr[:, :NR], xr[:, 1:NR + 1]], axis=-1)     # (B, 375, 32)
    xpc = xpc.astype(jnp.bfloat16)

    # -- stage-1 weights: (32, 512) block-Toeplitz, column block p computes position
    #    POS_ORDER[p] within the row's group of 8 conv positions --
    w1m = jnp.transpose(w1[:, 0, :], (1, 0)).astype(jnp.float32)      # (5, 64): w1m[s, co]
    w8 = jnp.zeros((KP, 8 * C1), jnp.float32)
    for p, j in enumerate(POS_ORDER):
        w8 = w8.at[2 * j:2 * j + KS, C1 * p:C1 * (p + 1)].set(w1m)
    w8 = w8.astype(jnp.bfloat16)
    b8 = jnp.tile(b1.astype(jnp.float32).reshape(1, C1), (1, 8))      # (1, 512)

    # -- stage-2 weights: K=256 (4 pooled taps) x N=256 (two conv2 output positions) --
    #    conv2[2m]   = y1[4m..4m+3] @ wA[:, :128] + y1[4m+4..4m+7] @ wB[:, :128]
    #    conv2[2m+1] = y1[4m..4m+3] @ wA[:, 128:] + y1[4m+4..4m+7] @ wB[:, 128:]
    wt = jnp.transpose(w2, (2, 1, 0)).astype(jnp.float32)             # (5, 64, 128): wt[t, ci, co]
    z = jnp.zeros((C1, C2), jnp.float32)
    wA = jnp.concatenate([
        jnp.concatenate([wt[0], z], axis=1),
        jnp.concatenate([wt[1], z], axis=1),
        jnp.concatenate([wt[2], wt[0]], axis=1),
        jnp.concatenate([wt[3], wt[1]], axis=1)], axis=0)             # (256, 256)
    wB = jnp.concatenate([
        jnp.concatenate([wt[4], wt[2]], axis=1),
        jnp.concatenate([z, wt[3]], axis=1),
        jnp.concatenate([z, wt[4]], axis=1),
        jnp.concatenate([z, z], axis=1)], axis=0)                     # (256, 256); last 64 rows
                                                                      # MUST stay zero (garbage guard)
    w2s = jnp.stack([wA, wB]).astype(jnp.bfloat16)                    # (2, 256, 256)
    b2q = jnp.tile(b2.astype(jnp.float32).reshape(1, C2), (1, 2))     # (1, 256)

    kernel = functools.partial(_cnn_fused_kernel, bb=bb)
    return pl.pallas_call(
        kernel,
        out_shape=jax.ShapeDtypeStruct((B, L2_POOL, C2), jnp.float32),
        grid=(B // bb,),
        in_specs=[
            pl.BlockSpec((bb, NR, KP), lambda b: (b, 0, 0)),          # xpc (bf16)
            pl.BlockSpec((KP, 8 * C1), lambda b: (0, 0)),             # w8  (bf16)
            pl.BlockSpec((1, 8 * C1), lambda b: (0, 0)),              # b8  (f32)
            pl.BlockSpec((2, 2 * C2, 2 * C2), lambda b: (0, 0, 0)),   # w2s (bf16)
            pl.BlockSpec((1, 2 * C2), lambda b: (0, 0)),              # b2  (f32)
        ],
        out_specs=pl.BlockSpec((bb, L2_POOL, C2), lambda b: (b, 0, 0)),
        compiler_params=pltpu.CompilerParams(
            dimension_semantics=("parallel",)),
    )(xpc, w8, b8, w2s, b2q)


def _reference(x, w1, b1, w2, b2, operand_dtype=jnp.float32):
    """Pure-JAX (XLA) reference matching the PyTorch module.

    operand_dtype=f32      -> exact f32 reference of the torch module.
    operand_dtype=bfloat16 -> same bf16-operand / f32-accumulation contract as the kernel.
    """
    xb = x.reshape(-1, 1, L_IN)
    prec = (lax.Precision.HIGHEST if operand_dtype == jnp.float32
            else lax.Precision.DEFAULT)

    def conv1d(inp, w, b, stride):
        out = lax.conv_general_dilated(
            inp.astype(operand_dtype), w.astype(operand_dtype),
            window_strides=(stride,), padding="VALID",
            dimension_numbers=("NCH", "OIH", "NCH"),
            preferred_element_type=jnp.float32, precision=prec)
        return out + b.astype(jnp.float32)[None, :, None]

    def maxpool(inp):  # MaxPool1d(3, 2, padding=1): -inf padding
        return lax.reduce_window(
            inp, -jnp.inf, lax.max,
            window_dimensions=(1, 1, 3), window_strides=(1, 1, 2),
            padding=((0, 0), (0, 0), (1, 1)))

    h = maxpool(jnp.maximum(conv1d(xb, w1, b1, 2), 0.0))
    h = maxpool(jnp.maximum(conv1d(h, w2, b2, 2), 0.0))
    return jnp.transpose(h, (0, 2, 1))


if __name__ == "__main__":
    key = jax.random.PRNGKey(0)
    kx, k1, k2, k3, k4 = jax.random.split(key, 5)
    B = 2  # small batch; seq length 6000 is fixed by the module's reshape
    x = jax.random.normal(kx, (B, L_IN), jnp.float32)
    w1 = jax.random.normal(k1, (C1, 1, KS), jnp.float32) * 0.2    # conv1.weight
    b1 = jax.random.normal(k2, (C1,), jnp.float32) * 0.1          # conv1.bias
    w2 = jax.random.normal(k3, (C2, C1, KS), jnp.float32) * 0.05  # conv2.weight
    b2 = jax.random.normal(k4, (C2,), jnp.float32) * 0.1          # conv2.bias

    out = jax.block_until_ready(jax.jit(cnn_forward)(x, w1, b1, w2, b2))
    assert out.shape == (B, L2_POOL, C2), out.shape

    # Structural check: reference run under the kernel's bf16-operand / f32-accum contract.
    ref_bf16 = _reference(x, w1, b1, w2, b2, operand_dtype=jnp.bfloat16)
    if not bool(jnp.allclose(out, ref_bf16, atol=3e-3, rtol=3e-3)):
        raise AssertionError(
            f"mismatch vs bf16-matched reference, max abs err = "
            f"{float(jnp.max(jnp.abs(out - ref_bf16)))}")

    # End-to-end check vs the full-f32 PyTorch-equivalent reference (bf16 operand noise only).
    ref_f32 = _reference(x, w1, b1, w2, b2, operand_dtype=jnp.float32)
    if not bool(jnp.allclose(out, ref_f32, atol=3e-2, rtol=3e-2)):
        raise AssertionError(
            f"mismatch vs f32 reference, max abs err = "
            f"{float(jnp.max(jnp.abs(out - ref_f32)))}")

    print("KERNEL_OK")
</pallas_src>

<mosaic_0001>
module attributes {stable_mosaic.version = 11 : i64} {
  func.func @_cnn_fused_kernel(%arg0: i32, %arg1: memref<1x375x32xbf16, #tpu.memory_space<vmem>>, %arg2: memref<32x512xbf16, #tpu.memory_space<vmem>>, %arg3: memref<1x512xf32, #tpu.memory_space<vmem>>, %arg4: memref<2x256x256xbf16, #tpu.memory_space<vmem>>, %arg5: memref<1x256xf32, #tpu.memory_space<vmem>>, %arg6: memref<1x374x128xf32, #tpu.memory_space<vmem>>) attributes {dimension_semantics = [#tpu.dimension_semantics<parallel>], iteration_bounds = array<i64: 2>, scalar_prefetch = 0 : i64, scratch_operands = 0 : i64, tpu.core_type = #tpu.core_type<tc>, window_params = [{transform_indices = @transform_0, window_bounds = array<i64: 1, 375, 32>}, {pipeline_mode = #tpu.pipeline_mode<synchronous>, transform_indices = @transform_1, window_bounds = array<i64: 32, 512>}, {pipeline_mode = #tpu.pipeline_mode<synchronous>, transform_indices = @transform_2, window_bounds = array<i64: 1, 512>}, {pipeline_mode = #tpu.pipeline_mode<synchronous>, transform_indices = @transform_3, window_bounds = array<i64: 2, 256, 256>}, {pipeline_mode = #tpu.pipeline_mode<synchronous>, transform_indices = @transform_4, window_bounds = array<i64: 1, 256>}, {transform_indices = @transform_5, window_bounds = array<i64: 1, 374, 128>}]} {
    %c0 = arith.constant 0 : index
    %c0_0 = arith.constant 0 : index
    %0 = vector.load %arg2[%c0, %c0_0] : memref<32x512xbf16, #tpu.memory_space<vmem>>, vector<32x512xbf16>
    %c0_1 = arith.constant 0 : index
    %c0_2 = arith.constant 0 : index
    %c0_3 = arith.constant 0 : index
    %1 = vector.load %arg4[%c0_1, %c0_2, %c0_3] : memref<2x256x256xbf16, #tpu.memory_space<vmem>>, vector<1x256x256xbf16>
    %2 = vector.shape_cast %1 : vector<1x256x256xbf16> to vector<256x256xbf16>
    %c1 = arith.constant 1 : index
    %c0_4 = arith.constant 0 : index
    %c0_5 = arith.constant 0 : index
    %3 = vector.load %arg4[%c1, %c0_4, %c0_5] : memref<2x256x256xbf16, #tpu.memory_space<vmem>>, vector<1x256x256xbf16>
    %4 = vector.shape_cast %3 : vector<1x256x256xbf16> to vector<256x256xbf16>
    %c0_6 = arith.constant 0 : index
    %c0_7 = arith.constant 0 : index
    %5 = vector.load %arg3[%c0_6, %c0_7] : memref<1x512xf32, #tpu.memory_space<vmem>>, vector<1x512xf32>
    %c0_8 = arith.constant 0 : index
    %c0_9 = arith.constant 0 : index
    %6 = vector.load %arg5[%c0_8, %c0_9] : memref<1x256xf32, #tpu.memory_space<vmem>>, vector<1x256xf32>
    %c0_10 = arith.constant 0 : index
    %c0_11 = arith.constant 0 : index
    %c0_12 = arith.constant 0 : index
    %7 = vector.load %arg1[%c0_10, %c0_11, %c0_12] : memref<1x375x32xbf16, #tpu.memory_space<vmem>>, vector<1x375x32xbf16>
    %8 = vector.shape_cast %7 : vector<1x375x32xbf16> to vector<375x32xbf16>
    %cst = arith.constant dense<0.000000e+00> : vector<375x512xf32>
    %9 = tpu.matmul %8, %0, %cst {dimension_numbers = #tpu.dot_dimension_numbers<[1], [0], [0], [1], [0, 0, 1, 1], [], []>} : vector<375x32xbf16>, vector<32x512xbf16>, vector<375x512xf32> -> vector<375x512xf32>
    %10 = vector.broadcast %5 : vector<1x512xf32> to vector<375x512xf32>
    %11 = arith.addf %9, %10 : vector<375x512xf32>
    %cst_13 = arith.constant 0.000000e+00 : f32
    %12 = vector.broadcast %cst_13 : f32 to vector<375x512xf32>
    %13 = arith.maximumf %11, %12 : vector<375x512xf32>
    %14 = vector.extract_strided_slice %13 {offsets = [0, 0], sizes = [375, 256], strides = [1, 1]} : vector<375x512xf32> to vector<375x256xf32>
    %15 = vector.extract_strided_slice %13 {offsets = [0, 256], sizes = [375, 256], strides = [1, 1]} : vector<375x512xf32> to vector<375x256xf32>
    %16 = vector.extract_strided_slice %15 {offsets = [0, 192], sizes = [375, 64], strides = [1, 1]} : vector<375x256xf32> to vector<375x64xf32>
    %cst_14 = arith.constant 0.000000e+00 : f32
    %17 = vector.broadcast %cst_14 : f32 to vector<1x64xf32>
    %18 = vector.extract_strided_slice %16 {offsets = [0, 0], sizes = [374, 64], strides = [1, 1]} : vector<375x64xf32> to vector<374x64xf32>
    %19 = tpu.concatenate %17, %18 in 0 : vector<1x64xf32>, vector<374x64xf32> -> vector<375x64xf32>
    %20 = vector.extract_strided_slice %15 {offsets = [0, 0], sizes = [375, 192], strides = [1, 1]} : vector<375x256xf32> to vector<375x192xf32>
    %21 = tpu.concatenate %19, %20 in 1 : vector<375x64xf32>, vector<375x192xf32> -> vector<375x256xf32>
    %22 = arith.maximumf %21, %14 : vector<375x256xf32>
    %23 = arith.maximumf %22, %15 : vector<375x256xf32>
    %24 = vector.extract_strided_slice %23 {offsets = [0, 0], sizes = [374, 256], strides = [1, 1]} : vector<375x256xf32> to vector<374x256xf32>
    %25 = arith.truncf %24 : vector<374x256xf32> to vector<374x256xbf16>
    %26 = vector.extract_strided_slice %23 {offsets = [1, 0], sizes = [374, 256], strides = [1, 1]} : vector<375x256xf32> to vector<374x256xf32>
    %27 = arith.truncf %26 : vector<374x256xf32> to vector<374x256xbf16>
    %cst_15 = arith.constant dense<0.000000e+00> : vector<374x256xf32>
    %28 = tpu.matmul %25, %2, %cst_15 {dimension_numbers = #tpu.dot_dimension_numbers<[1], [0], [0], [1], [0, 0, 1, 1], [], []>} : vector<374x256xbf16>, vector<256x256xbf16>, vector<374x256xf32> -> vector<374x256xf32>
    %cst_16 = arith.constant dense<0.000000e+00> : vector<374x256xf32>
    %29 = tpu.matmul %27, %4, %cst_16 {dimension_numbers = #tpu.dot_dimension_numbers<[1], [0], [0], [1], [0, 0, 1, 1], [], []>} : vector<374x256xbf16>, vector<256x256xbf16>, vector<374x256xf32> -> vector<374x256xf32>
    %30 = arith.addf %28, %29 : vector<374x256xf32>
    %31 = vector.broadcast %6 : vector<1x256xf32> to vector<374x256xf32>
    %32 = arith.addf %30, %31 : vector<374x256xf32>
    %cst_17 = arith.constant 0.000000e+00 : f32
    %33 = vector.broadcast %cst_17 : f32 to vector<374x256xf32>
    %34 = arith.maximumf %32, %33 : vector<374x256xf32>
    %35 = vector.extract_strided_slice %34 {offsets = [0, 0], sizes = [374, 128], strides = [1, 1]} : vector<374x256xf32> to vector<374x128xf32>
    %36 = vector.extract_strided_slice %34 {offsets = [0, 128], sizes = [374, 128], strides = [1, 1]} : vector<374x256xf32> to vector<374x128xf32>
    %cst_18 = arith.constant 0.000000e+00 : f32
    %37 = vector.broadcast %cst_18 : f32 to vector<1x128xf32>
    %38 = vector.extract_strided_slice %36 {offsets = [0, 0], sizes = [373, 128], strides = [1, 1]} : vector<374x128xf32> to vector<373x128xf32>
    %39 = tpu.concatenate %37, %38 in 0 : vector<1x128xf32>, vector<373x128xf32> -> vector<374x128xf32>
    %40 = arith.maximumf %39, %35 : vector<374x128xf32>
    %41 = arith.maximumf %40, %36 : vector<374x128xf32>
    %c0_19 = arith.constant 0 : index
    %c0_20 = arith.constant 0 : index
    %c0_21 = arith.constant 0 : index
    %42 = vector.load %arg6[%c0_19, %c0_20, %c0_21] : memref<1x374x128xf32, #tpu.memory_space<vmem>>, vector<1x374x128xf32>
    %43 = vector.shape_cast %42 : vector<1x374x128xf32> to vector<374x128xf32>
    %44 = vector.shape_cast %41 : vector<374x128xf32> to vector<1x374x128xf32>
    tpu.vector_store %arg6[%c0_19, %c0_20, %c0_21], %44 {strides = array<i32>} : memref<1x374x128xf32, #tpu.memory_space<vmem>>, vector<1x374x128xf32>,
    return
  }
  func.func @transform_0(%arg0: i32) -> (i32, i32, i32) {
    %c0_i32 = arith.constant 0 : i32
    %c0_i32_0 = arith.constant 0 : i32
    %c0_i32_1 = arith.constant 0 : i32
    return %arg0, %c0_i32, %c0_i32_0 : i32, i32, i32
  }
  func.func @transform_1(%arg0: i32) -> (i32, i32) {
    %c0_i32 = arith.constant 0 : i32
    %c0_i32_0 = arith.constant 0 : i32
    %c0_i32_1 = arith.constant 0 : i32
    return %c0_i32, %c0_i32_0 : i32, i32
  }
  func.func @transform_2(%arg0: i32) -> (i32, i32) {
    %c0_i32 = arith.constant 0 : i32
    %c0_i32_0 = arith.constant 0 : i32
    %c0_i32_1 = arith.constant 0 : i32
    return %c0_i32, %c0_i32_0 : i32, i32
  }
  func.func @transform_3(%arg0: i32) -> (i32, i32, i32) {
    %c0_i32 = arith.constant 0 : i32
    %c0_i32_0 = arith.constant 0 : i32
    %c0_i32_1 = arith.constant 0 : i32
    %c0_i32_2 = arith.constant 0 : i32
    return %c0_i32, %c0_i32_0, %c0_i32_1 : i32, i32, i32
  }
  func.func @transform_4(%arg0: i32) -> (i32, i32) {
    %c0_i32 = arith.constant 0 : i32
    %c0_i32_0 = arith.constant 0 : i32
    %c0_i32_1 = arith.constant 0 : i32
    return %c0_i32, %c0_i32_0 : i32, i32
  }
  func.func @transform_5(%arg0: i32) -> (i32, i32, i32) {
    %c0_i32 = arith.constant 0 : i32
    %c0_i32_0 = arith.constant 0 : i32
    %c0_i32_1 = arith.constant 0 : i32
    return %arg0, %c0_i32, %c0_i32_0 : i32, i32, i32
  }
}

</mosaic_0001>

<bundles_post_ra>
// kernel: cnn_forward.1
= control target key start
LH: loop header
LB: loop body
LE: loop exit
PB: predicated region body
PF: predicated region fallthrough
CT: control target
= control target key end

     0   :  { %s4960_s18 = smov 0   ;;  %s7446_s0 = inlined_call_operand.vmem [shape: bf16[2,375,32], index: 0, kind: input, shape index: {}]   ;;  %s7447_s1 = inlined_call_operand.vmem [shape: bf16[32,512], index: 1, kind: input, shape index: {}]   ;;  %s7448_s2 = inlined_call_operand.vmem [shape: f32[1,512], index: 2, kind: input, shape index: {}]   ;;  %s7449_s3 = inlined_call_operand.vmem [shape: bf16[2,256,256], index: 3, kind: input, shape index: {}]   ;;  %s7450_s4 = inlined_call_operand.vmem [shape: f32[1,256], index: 4, kind: input, shape index: {}]   ;;  %s7451_s5 = inlined_call_operand.vmem [shape: f32[2,374,128], index: 5, kind: output, shape index: {}]  }
   0x1 LB: > { %s4149_s19 = sadd.s32 4294967295, %s4926_s18   ;;  %p4153_p0 = scmp.ge.s32.totalorder %s4926_s18, 1  ;;  %s4926_s18 = sphi %s4960_s18, %s15_s18  }
   0x2   : > { %p187_p1 = scmp.lt.s32.totalorder %s4926_s18, 3 }
   0x4   : > { %p188_p2 = pnand %p4153_p0, %p187_p1 }
   0x6   : > { %191 = sbr.rel (%p188_p2) target bundleno = 864 (0x360), region = 40 }
   0xd   : > { %v4788_v0 = vld [vmem:[%s7447_s1 + $0xc] ss:$16 sps:$4 sm:$0xff]   ;;  %p215_p3 = scmp.lt.s32.totalorder %s4149_s19, 1  ;;  %v4790_v1 = vld [vmem:[%s7447_s1 + $0x8] ss:$16 sps:$4 sm:$0xff]   ;;  %v4928_v2 = vmov 0  }
   0xe   : > { %903 = vmatprep.mubr.bf16.mxu1 %v4928_v2  ;;  %632 = vmatprep.mubr.bf16.mxu0 %v4928_v2  ;;  %v4791_v3 = vld [vmem:[%s7447_s1 + $0x2c] ss:$16 sps:$4 sm:$0xff]   ;;  %v4793_v4 = vld [vmem:[%s7447_s1 + $0x28] ss:$16 sps:$4 sm:$0xff]   ;;  %v4808_v5 = vld [vmem:[%s7447_s1 + $0x4] ss:$16 sps:$4 sm:$0xff]  }
   0xf   : > { %871 = vmatprep.subr.bf16.mxu1 %v4788_v0  ;;  %s8012_s19 = smov (!%p215_p3, %s4149_s19), 1  ;;  %v4810_v6 = vld [vmem:[%s7447_s1] ss:$16 sps:$4 sm:$0xff]   ;;  %v4812_v7 = vld [vmem:[%s7447_s1 + $0x24] ss:$16 sps:$4 sm:$0xff]   ;;  %600 = vmatprep.subr.bf16.mxu0 %v4808_v5  ;;  %vm527_vm0 = vcmask 261120  }
  0x10   : > { %872 = vmatpush1.bf16.msra.mxu1 %v4790_v1  ;;  %s4426_s7 = smul.u32 188, %s8012_s19  ;;  %v4814_v8 = vld [vmem:[%s7447_s1 + $0x20] ss:$16 sps:$4 sm:$0xff]   ;;  %601 = vmatpush1.bf16.msra.mxu0 %v4810_v6  ;;  %v4824_v16 = vld [vmem:[%s7449_s3 + $0x104] ss:$8 sps:$4 sm:$0xff]   ;;  %vm1377_vm1 = vcmask 1040384  }
  0x11   : > { %873 = vmatprep.subr.bf16.mxu1 %v4791_v3  ;;  %602 = vmatprep.subr.bf16.mxu0 %v4812_v7  ;;  %v4822_v15 = vld [vmem:[%s7449_s3 + $0x100] ss:$8 sps:$4 sm:$0xff]   ;;  %v4827_v18 = vld [vmem:[%s7449_s3 + $0x4] ss:$8 sps:$4 sm:$0xff]   ;;  %v4829_v20 = vld [vmem:[%s7449_s3 + $0x110] ss:$8 sps:$4 sm:$0xff]  }
  0x12   : > { %s5000_s14 = scalar_lea.vmem %s7446_s0, %s4426_s7  ;;  %v4825_v17 = vld [vmem:[%s7449_s3] ss:$8 sps:$4 sm:$0xff]   ;;  %v4831_v21 = vld [vmem:[%s7449_s3 + $0x114] ss:$8 sps:$4 sm:$0xff]   ;;  %v4832_v22 = vld [vmem:[%s7449_s3 + $0x10] ss:$8 sps:$4 sm:$0xff]  }
  0x13   : > { %v4794_v9 = vld [vmem:[%s5000_s14] sm:$0xff]   ;;  %v4795_v10 = vld [vmem:[%s5000_s14 + $0x8] sm:$0xff]   ;;  %v4796_v11 = vld [vmem:[%s5000_s14 + $0x10] sm:$0xff]   ;;  %s4929_s28 = smov 64   ;;  %vm1848_vm2 = vcmask 523264   ;;  %s4427_s13 = smul.u32 376, %s8012_s19 }
  0x14   : > { %874 = vmatpush1.bf16.msra.mxu1 %v4793_v4  ;;  %603 = vmatpush1.bf16.msra.mxu0 %v4814_v8  ;;  %v4797_v12 = vld [vmem:[%s5000_s14 + $0x18] sm:$0xff]   ;;  %v4798_v13 = vld [vmem:[%s5000_s14 + $0x20] sm:$0xff]   ;;  %v4799_v14 = vld [vmem:[%s5000_s14 + $0x28] sm:$0xff]   ;;  %vm2273_vm3 = vsmask.f32 7424 }
  0x15   : > { %2864 = vmatprep.subr.bf16.mxu1 %v4824_v16  ;;  %3295 = vmatprep.subr.bf16.mxu0 %v4827_v18  ;;  %v4800_v19 = vld [vmem:[%s5000_s14 + $0x30] sm:$0xff]   ;;  %v4801_v24 = vld [vmem:[%s5000_s14 + $0x38] sm:$0xff]   ;;  %v4836_v25 = vld [vmem:[%s7449_s3 + $0x120] ss:$8 sps:$4 sm:$0xff]   ;;  %s7258_s17 = scalar_lea.vmem %s7451_s5, %s4427_s13 }
  0x16   : > { %v4834_v23 = vld [vmem:[%s7449_s3 + $0x14] ss:$8 sps:$4 sm:$0xff]   ;;  %v4838_v26 = vld [vmem:[%s7449_s3 + $0x124] ss:$8 sps:$4 sm:$0xff]   ;;  %v4839_v27 = vld [vmem:[%s7449_s3 + $0x20] ss:$8 sps:$4 sm:$0xff]  }
  0x17   : > { %4244 = vmatmul.mubr.msk.bf16.vlgmr.msra.gmra.mrb[0].mxu1 %vm527_vm0, %v4794_v9  ;;  %4220 = vmatmul.mubr.msk.bf16.vlgmr.msra.gmra.mrb[0].mxu0 %vm527_vm0, %v4794_v9  ;;  %v4841_v28 = vld [vmem:[%s7449_s3 + $0x24] ss:$8 sps:$4 sm:$0xff]   ;;  %v4844_v29 = vld [vmem:[%s7449_s3 + $0x134] ss:$8 sps:$4 sm:$0xff]   ;;  %v4842_v32 = vld [vmem:[%s7449_s3 + $0x130] ss:$8 sps:$4 sm:$0xff]  }
  0x18   : > { %913 = vmatprep.mubr.bf16.mxu1 %v4928_v2  ;;  %642 = vmatprep.mubr.bf16.mxu0 %v4928_v2  ;;  %v4847_v30 = vld [vmem:[%s7449_s3 + $0x34] ss:$8 sps:$4 sm:$0xff]   ;;  %v4802_v31 = vld [vmem:[%s5000_s14 + $0x40] sm:$0xff]   ;;  %v4845_v33 = vld [vmem:[%s7449_s3 + $0x30] ss:$8 sps:$4 sm:$0xff]  }
  0x19   : > { %2865 = vmatpush1.bf16.msra.mxu1 %v4822_v15  ;;  %3296 = vmatpush1.bf16.msra.mxu0 %v4825_v17  ;;  %v4803_v34 = vld [vmem:[%s5000_s14 + $0x48] sm:$0xff]   ;;  %v4804_v35 = vld [vmem:[%s5000_s14 + $0x50] sm:$0xff]   ;;  %v4805_v36 = vld [vmem:[%s5000_s14 + $0x58] sm:$0xff]  }
  0x1a   : > { %2866 = vmatprep.subr.bf16.mxu1 %v4831_v21  ;;  %3297 = vmatprep.subr.bf16.mxu0 %v4834_v23  ;;  %v4848_v37 = vld [vmem:[%s7449_s3 + $0x140] ss:$8 sps:$4 sm:$0xff]   ;;  %v4850_v38 = vld [vmem:[%s7449_s3 + $0x144] ss:$8 sps:$4 sm:$0xff]   ;;  %v4854_v43 = vld [vmem:[%s7449_s3 + $0x150] ss:$8 sps:$4 sm:$0xff]   ;;  %v349_v21 = vlaneseq }
  0x1b   : > { %v4851_v39 = vld [vmem:[%s7449_s3 + $0x40] ss:$8 sps:$4 sm:$0xff]   ;;  %v4853_v41 = vld [vmem:[%s7449_s3 + $0x44] ss:$8 sps:$4 sm:$0xff]   ;;  %v4856_v44 = vld [vmem:[%s7449_s3 + $0x154] ss:$8 sps:$4 sm:$0xff]  }
  0x1c   : > { %v4806_v40 = vld [vmem:[%s5000_s14 + $0x60] sm:$0xff]   ;;  %v4807_v42 = vld [vmem:[%s5000_s14 + $0x68] sm:$0xff]   ;;  %v4857_v45 = vld [vmem:[%s7449_s3 + $0x50] ss:$8 sps:$4 sm:$0xff]  }
  0x1d   : > { %2867 = vmatpush1.bf16.msra.mxu1 %v4829_v20  ;;  %3298 = vmatpush1.bf16.msra.mxu0 %v4832_v22  ;;  %v4859_v46 = vld [vmem:[%s7449_s3 + $0x54] ss:$8 sps:$4 sm:$0xff]   ;;  %v4860_v48 = vld [vmem:[%s7449_s3 + $0x160] ss:$8 sps:$4 sm:$0xff]   ;;  %v4862_v49 = vld [vmem:[%s7449_s3 + $0x164] ss:$8 sps:$4 sm:$0xff]  }
  0x1e   : > { %2868 = vmatprep.subr.bf16.mxu1 %v4838_v26  ;;  %3299 = vmatprep.subr.bf16.mxu0 %v4841_v28  ;;  %v4811_v47 = vld [vmem:[%s5000_s14 + $0x70] sm:$0xff]   ;;  %v4863_v50 = vld [vmem:[%s7449_s3 + $0x60] ss:$8 sps:$4 sm:$0xff]   ;;  %v4815_v51 = vld [vmem:[%s5000_s14 + $0x78] sm:$0xff]   ;;  %v5276_v22 = vshrl.u32 %v349_v21, 7 }
  0x1f   : > { %4245 = vmatmul.mubr.msk.bf16.gmra.mrb[4].mxu1 %vm527_vm0, %v4795_v10  ;;  %4221 = vmatmul.mubr.msk.bf16.gmra.mrb[4].mxu0 %vm527_vm0, %v4795_v10  ;;  %v4865_v52 = vld [vmem:[%s7449_s3 + $0x64] ss:$8 sps:$4 sm:$0xff]   ;;  %v4866_v54 = vld [vmem:[%s7449_s3 + $0x170] ss:$8 sps:$4 sm:$0xff]   ;;  %v4868_v55 = vld [vmem:[%s7449_s3 + $0x174] ss:$8 sps:$4 sm:$0xff]  }
  0x20   : > { %923 = vmatprep.mubr.bf16.mxu1 %v4928_v2  ;;  %652 = vmatprep.mubr.bf16.mxu0 %v4928_v2  ;;  %v4816_v53 = vld [vmem:[%s5000_s14 + $0x80] sm:$0xff]   ;;  %v4869_v56 = vld [vmem:[%s7449_s3 + $0x70] ss:$8 sps:$4 sm:$0xff]   ;;  %v4871_v57 = vld [vmem:[%s7449_s3 + $0x74] ss:$8 sps:$4 sm:$0xff]   ;;  %7588 = vst [vmem:[#allocation2_spill] sm:$0xff] %v5276_v22 }
  0x21   : > { %2869 = vmatpush1.bf16.msra.mxu1 %v4836_v25  ;;  %3300 = vmatpush1.bf16.msra.mxu0 %v4839_v27  ;;  %v4817_v58 = vld [vmem:[%s5000_s14 + $0x88] sm:$0xff]   ;;  %v4818_v62 = vld [vmem:[%s5000_s14 + $0x90] sm:$0xff]   ;;  %v4819_v0 = vld [vmem:[%s5000_s14 + $0x98] sm:$0xff]   ;;  %v363_v27 = vsub.s32 3, %v5276_v22 }
  0x22   : > { %2870 = vmatprep.subr.bf16.mxu1 %v4844_v29  ;;  %3301 = vmatprep.subr.bf16.mxu0 %v4847_v30  ;;  %v4872_v59 = vld [vmem:[%s7449_s3 + $0x180] ss:$8 sps:$4 sm:$0xff]   ;;  %v4874_v60 = vld [vmem:[%s7449_s3 + $0x184] ss:$8 sps:$4 sm:$0xff]   ;;  %v4878_v1 = vld [vmem:[%s7449_s3 + $0x190] ss:$8 sps:$4 sm:$0xff]  }
  0x23   : > { %v4875_v61 = vld [vmem:[%s7449_s3 + $0x80] ss:$8 sps:$4 sm:$0xff]   ;;  %v4877_v63 = vld [vmem:[%s7449_s3 + $0x84] ss:$8 sps:$4 sm:$0xff]   ;;  %v4880_v3 = vld [vmem:[%s7449_s3 + $0x194] ss:$8 sps:$4 sm:$0xff]  }
  0x24   : > { %v4881_v4 = vld [vmem:[%s7449_s3 + $0x90] ss:$8 sps:$4 sm:$0xff]   ;;  %v4883_v5 = vld [vmem:[%s7449_s3 + $0x94] ss:$8 sps:$4 sm:$0xff]   ;;  %v4820_v6 = vld [vmem:[%s5000_s14 + $0xa0] sm:$0xff]   ;;  %v359_v29 = vsub.s32 2, %v5276_v22 }
  0x25   : > { %2871 = vmatpush1.bf16.msra.mxu1 %v4842_v32  ;;  %3302 = vmatpush1.bf16.msra.mxu0 %v4845_v33  ;;  %v4884_v7 = vld [vmem:[%s7449_s3 + $0x1a0] ss:$8 sps:$4 sm:$0xff]   ;;  %v4886_v8 = vld [vmem:[%s7449_s3 + $0x1a4] ss:$8 sps:$4 sm:$0xff]   ;;  %v4893_v15 = vld [vmem:[%s7449_s3 + $0xb0] ss:$8 sps:$4 sm:$0xff]  }
  0x26   : > { %2872 = vmatprep.subr.bf16.mxu1 %v4850_v38  ;;  %3303 = vmatprep.subr.bf16.mxu0 %v4853_v41  ;;  %v4887_v9 = vld [vmem:[%s7449_s3 + $0xa0] ss:$8 sps:$4 sm:$0xff]   ;;  %v4895_v16 = vld [vmem:[%s7449_s3 + $0xb4] ss:$8 sps:$4 sm:$0xff]   ;;  %v4835_v17 = vld [vmem:[%s5000_s14 + $0xb8] ss:$0 sps:$4 sm:$0xff]  }
  0x27   : > { %4246 = vmatmul.mubr.msk.bf16.gmra.mrb[8].mxu1 %vm527_vm0, %v4796_v11  ;;  %4222 = vmatmul.mubr.msk.bf16.gmra.mrb[8].mxu0 %vm527_vm0, %v4796_v11  ;;  %v4821_v10 = vld [vmem:[%s5000_s14 + $0xa8] sm:$0xff]   ;;  %v4902_v23 = vld [vmem:[%s7449_s3 + $0x1d0] ss:$8 sps:$4 sm:$0xff]   ;;  %v4907_v26 = vld [vmem:[%s7449_s3 + $0xd4] ss:$8 sps:$4 sm:$0xff]  }
  0x28   : > { %933 = vmatprep.mubr.bf16.mxu1 %v4928_v2  ;;  %662 = vmatprep.mubr.bf16.mxu0 %v4928_v2  ;;  %v4889_v11 = vld [vmem:[%s7449_s3 + $0xa4] ss:$8 sps:$4 sm:$0xff]   ;;  %v4896_v18 = vld [vmem:[%s7449_s3 + $0x1c0] ss:$8 sps:$4 sm:$0xff]   ;;  %v4905_v25 = vld [vmem:[%s7449_s3 + $0xd0] ss:$8 sps:$4 sm:$0xff]  }
  0x29   : > { %2873 = vmatpush1.bf16.msra.mxu1 %v4848_v37  ;;  %3304 = vmatpush1.bf16.msra.mxu0 %v4851_v39  ;;  %v4899_v20 = vld [vmem:[%s7449_s3 + $0xc0] ss:$8 sps:$4 sm:$0xff]   ;;  %v4910_v33 = vld [vmem:[%s7449_s3 + $0x1e4] ss:$8 sps:$4 sm:$0xff]  }
  0x2a   : > { %2874 = vmatprep.subr.bf16.mxu1 %v4856_v44  ;;  %3305 = vmatprep.subr.bf16.mxu0 %v4859_v46  ;;  %v5294_v28 = vld [vmem:[%s7448_s2] sm:$0xf]  ;;  %v4913_v37 = vld [vmem:[%s7449_s3 + $0xe4] ss:$8 sps:$4 sm:$0xff]  }
  0x2b   : > { %v5298_v30 = vrot.slane %v5294_v28, %v363_v27  ;;  %v4908_v32 = vld [vmem:[%s7449_s3 + $0x1e0] ss:$8 sps:$4 sm:$0xff]  }
  0x2d   : > { %2875 = vmatpush1.bf16.msra.mxu1 %v4854_v43  ;;  %3306 = vmatpush1.bf16.msra.mxu0 %v4857_v45 }
  0x2e   : > { %2876 = vmatprep.subr.bf16.mxu1 %v4862_v49  ;;  %3307 = vmatprep.subr.bf16.mxu0 %v4865_v52 }
  0x2f   : > { %4247 = vmatmul.mubr.msk.bf16.gmra.mrb[12].mxu1 %vm527_vm0, %v4797_v12  ;;  %4223 = vmatmul.mubr.msk.bf16.gmra.mrb[12].mxu0 %vm527_vm0, %v4797_v12  ;;  %v4828_v12 = vld [vmem:[%s5000_s14 + $0xb0] sm:$0xff]  }
  0x30   : > { %943 = vmatprep.mubr.bf16.mxu1 %v4928_v2  ;;  %672 = vmatprep.mubr.bf16.mxu0 %v4928_v2 }
  0x31   : > { %2877 = vmatpush1.bf16.msra.mxu1 %v4860_v48  ;;  %3308 = vmatpush1.bf16.msra.mxu0 %v4863_v50 }
  0x32   : > { %2878 = vmatprep.subr.bf16.mxu1 %v4868_v55  ;;  %3309 = vmatprep.subr.bf16.mxu0 %v4871_v57 }
  0x35   : > { %2879 = vmatpush1.bf16.msra.mxu1 %v4866_v54  ;;  %3310 = vmatpush1.bf16.msra.mxu0 %v4869_v56 }
  0x36   : > { %2880 = vmatprep.subr.bf16.mxu1 %v4874_v60  ;;  %3311 = vmatprep.subr.bf16.mxu0 %v4877_v63 }
  0x37   : > { %4248 = vmatmul.mubr.msk.bf16.gmra.mrb[16].mxu1 %vm527_vm0, %v4798_v13  ;;  %4224 = vmatmul.mubr.msk.bf16.gmra.mrb[16].mxu0 %vm527_vm0, %v4798_v13  ;;  %v4890_v13 = vld [vmem:[%s7449_s3 + $0x1b0] ss:$8 sps:$4 sm:$0xff]  }
  0x38   : > { %953 = vmatprep.mubr.bf16.mxu1 %v4928_v2  ;;  %682 = vmatprep.mubr.bf16.mxu0 %v4928_v2 }
  0x39   : > { %2881 = vmatpush1.bf16.msra.mxu1 %v4872_v59  ;;  %3312 = vmatpush1.bf16.msra.mxu0 %v4875_v61 }
  0x3a   : > { %2882 = vmatprep.subr.bf16.mxu1 %v4880_v3  ;;  %3313 = vmatprep.subr.bf16.mxu0 %v4883_v5 }
  0x3d   : > { %2883 = vmatpush1.bf16.msra.mxu1 %v4878_v1  ;;  %3314 = vmatpush1.bf16.msra.mxu0 %v4881_v4 }
  0x3e   : > { %2884 = vmatprep.subr.bf16.mxu1 %v4886_v8  ;;  %3315 = vmatprep.subr.bf16.mxu0 %v4889_v11 }
  0x3f   : > { %4249 = vmatmul.mubr.msk.bf16.gmra.mrb[20].mxu1 %vm527_vm0, %v4799_v14  ;;  %4225 = vmatmul.mubr.msk.bf16.gmra.mrb[20].mxu0 %vm527_vm0, %v4799_v14  ;;  %v4892_v14 = vld [vmem:[%s7449_s3 + $0x1b4] ss:$8 sps:$4 sm:$0xff]  }
  0x40   : > { %963 = vmatprep.mubr.bf16.mxu1 %v4928_v2  ;;  %692 = vmatprep.mubr.bf16.mxu0 %v4928_v2 }
  0x41   : > { %2885 = vmatpush1.bf16.msra.mxu1 %v4884_v7  ;;  %3316 = vmatpush1.bf16.msra.mxu0 %v4887_v9 }
  0x42   : > { %2886 = vmatprep.subr.bf16.mxu1 %v4892_v14  ;;  %3317 = vmatprep.subr.bf16.mxu0 %v4895_v16  ;;  %v4919_v16 = vld [vmem:[%s7449_s3 + $0x1f4] ss:$8 sps:$4 sm:$0xff]  }
  0x45   : > { %2887 = vmatpush1.bf16.msra.mxu1 %v4890_v13  ;;  %3318 = vmatpush1.bf16.msra.mxu0 %v4893_v15  ;;  %v4917_v15 = vld [vmem:[%s7449_s3 + $0x1f0] ss:$8 sps:$4 sm:$0xff]  }
  0x47   : > { %4250 = vmatmul.mubr.msk.bf16.gmra.mrb[24].mxu1 %vm527_vm0, %v4800_v19  ;;  %4226 = vmatmul.mubr.msk.bf16.gmra.mrb[24].mxu0 %vm527_vm0, %v4800_v19  ;;  %v4898_v19 = vld [vmem:[%s7449_s3 + $0x1c4] ss:$8 sps:$4 sm:$0xff]  }
  0x48   : > { %973 = vmatprep.mubr.bf16.mxu1 %v4928_v2  ;;  %702 = vmatprep.mubr.bf16.mxu0 %v4928_v2 }
  0x49   : > { %2888 = vmatprep.subr.bf16.mxu1 %v4898_v19 }
  0x4a   : > { %2889 = vmatpush1.bf16.msra.mxu1 %v4896_v18 }
  0x4f   : > { %4251 = vmatmul.mubr.msk.bf16.gmra.mrb[28].mxu1 %vm527_vm0, %v4801_v24  ;;  %4227 = vmatmul.mubr.msk.bf16.gmra.mrb[28].mxu0 %vm527_vm0, %v4801_v24  ;;  %v4904_v24 = vld [vmem:[%s7449_s3 + $0x1d4] ss:$8 sps:$4 sm:$0xff]  }
  0x50   : > { %983 = vmatprep.mubr.bf16.mxu1 %v4928_v2  ;;  %712 = vmatprep.mubr.bf16.mxu0 %v4928_v2 }
  0x51   : > { %2890 = vmatprep.subr.bf16.mxu1 %v4904_v24 }
  0x52   : > { %2891 = vmatpush1.bf16.msra.mxu1 %v4902_v23 }
  0x53   : > { %2892 = vmatprep.subr.bf16.mxu1 %v4910_v33 }
  0x56   : > { %2893 = vmatpush1.bf16.msra.mxu1 %v4908_v32 }
  0x57   : > { %4252 = vmatmul.mubr.msk.bf16.gmra.mrb[32].mxu1 %vm527_vm0, %v4802_v31  ;;  %4228 = vmatmul.mubr.msk.bf16.gmra.mrb[32].mxu0 %vm527_vm0, %v4802_v31 }
  0x58   : > { %993 = vmatprep.mubr.bf16.mxu1 %v4928_v2  ;;  %722 = vmatprep.mubr.bf16.mxu0 %v4928_v2 }
  0x59   : > { %2894 = vmatprep.subr.bf16.mxu1 %v4919_v16 }
  0x5a   : > { %2895 = vmatpush1.bf16.msra.mxu1 %v4917_v15 }
  0x5f   : > { %4253 = vmatmul.mubr.msk.bf16.gmra.mrb[36].mxu1 %vm527_vm0, %v4803_v34  ;;  %4229 = vmatmul.mubr.msk.bf16.gmra.mrb[36].mxu0 %vm527_vm0, %v4803_v34  ;;  %v5307_v34 = vrot.slane %v5294_v28, %v359_v29 }
  0x60   : > { %1003 = vmatprep.mubr.bf16.mxu1 %v4928_v2  ;;  %732 = vmatprep.mubr.bf16.mxu0 %v4928_v2 }
  0x67   : > { %4254 = vmatmul.mubr.msk.bf16.gmra.mrb[40].mxu1 %vm527_vm0, %v4804_v35  ;;  %4230 = vmatmul.mubr.msk.bf16.gmra.mrb[40].mxu0 %vm527_vm0, %v4804_v35 }
  0x68   : > { %1013 = vmatprep.mubr.bf16.mxu1 %v4928_v2  ;;  %742 = vmatprep.mubr.bf16.mxu0 %v4928_v2 }
  0x6f   : > { %4255 = vmatmul.mubr.msk.bf16.gmra.mrb[44].mxu1 %vm527_vm0, %v4805_v36  ;;  %4231 = vmatmul.mubr.msk.bf16.gmra.mrb[44].mxu0 %vm527_vm0, %v4805_v36  ;;  %v4911_v36 = vld [vmem:[%s7449_s3 + $0xe0] ss:$8 sps:$4 sm:$0xff]  }
  0x70   : > { %1023 = vmatprep.mubr.bf16.mxu1 %v4928_v2  ;;  %752 = vmatprep.mubr.bf16.mxu0 %v4928_v2 }
  0x77   : > { %4256 = vmatmul.mubr.msk.bf16.gmra.mrb[48].mxu1 %vm527_vm0, %v4806_v40  ;;  %4232 = vmatmul.mubr.msk.bf16.gmra.mrb[48].mxu0 %vm527_vm0, %v4806_v40 }
  0x78   : > { %1033 = vmatprep.mubr.bf16.mxu1 %v4928_v2  ;;  %762 = vmatprep.mubr.bf16.mxu0 %v4928_v2 }
  0x7f   : > { %4257 = vmatmul.mubr.msk.bf16.gmra.mrb[52].mxu1 %vm527_vm0, %v4807_v42  ;;  %4233 = vmatmul.mubr.msk.bf16.gmra.mrb[52].mxu0 %vm527_vm0, %v4807_v42 }
  0x80   : > { %1043 = vmatprep.mubr.bf16.mxu1 %v4928_v2  ;;  %772 = vmatprep.mubr.bf16.mxu0 %v4928_v2 }
  0x87   : > { %4258 = vmatmul.mubr.msk.bf16.gmra.mrb[56].mxu1 %vm527_vm0, %v4811_v47  ;;  %4234 = vmatmul.mubr.msk.bf16.gmra.mrb[56].mxu0 %vm527_vm0, %v4811_v47 }
  0x88   : > { %1053 = vmatprep.mubr.bf16.mxu1 %v4928_v2  ;;  %782 = vmatprep.mubr.bf16.mxu0 %v4928_v2 }
  0x8f   : > { %4259 = vmatmul.mubr.msk.bf16.gmra.mrb[60].mxu1 %vm527_vm0, %v4815_v51  ;;  %4235 = vmatmul.mubr.msk.bf16.gmra.mrb[60].mxu0 %vm527_vm0, %v4815_v51 }
  0x90   : > { %1063 = vmatprep.mubr.bf16.mxu1 %v4928_v2  ;;  %792 = vmatprep.mubr.bf16.mxu0 %v4928_v2 }
  0x97   : > { %4260 = vmatmul.mubr.msk.bf16.gmra.mrb[64].mxu1 %vm527_vm0, %v4816_v53  ;;  %4236 = vmatmul.mubr.msk.bf16.gmra.mrb[64].mxu0 %vm527_vm0, %v4816_v53 }
  0x98   : > { %1073 = vmatprep.mubr.bf16.mxu1 %v4928_v2  ;;  %802 = vmatprep.mubr.bf16.mxu0 %v4928_v2 }
  0x9f   : > { %4261 = vmatmul.mubr.msk.bf16.gmra.mrb[68].mxu1 %vm527_vm0, %v4817_v58  ;;  %4237 = vmatmul.mubr.msk.bf16.gmra.mrb[68].mxu0 %vm527_vm0, %v4817_v58  ;;  %v4916_v58 = vld [vmem:[%s7449_s3 + $0xf4] ss:$8 sps:$4 sm:$0xff]  }
  0xa0   : > { %1083 = vmatprep.mubr.bf16.mxu1 %v4928_v2  ;;  %812 = vmatprep.mubr.bf16.mxu0 %v4928_v2 }
  0xa7   : > { %4262 = vmatmul.mubr.msk.bf16.gmra.mrb[72].mxu1 %vm527_vm0, %v4818_v62  ;;  %4238 = vmatmul.mubr.msk.bf16.gmra.mrb[72].mxu0 %vm527_vm0, %v4818_v62  ;;  %v4914_v62 = vld [vmem:[%s7449_s3 + $0xf0] ss:$8 sps:$4 sm:$0xff]  }
  0xa8   : > { %1093 = vmatprep.mubr.bf16.mxu1 %v4928_v2  ;;  %822 = vmatprep.mubr.bf16.mxu0 %v4928_v2 }
  0xaf   : > { %4263 = vmatmul.mubr.msk.bf16.gmra.mrb[76].mxu1 %vm527_vm0, %v4819_v0  ;;  %4239 = vmatmul.mubr.msk.bf16.gmra.mrb[76].mxu0 %vm527_vm0, %v4819_v0 }
  0xb0   : > { %1103 = vmatprep.mubr.bf16.mxu1 %v4928_v2  ;;  %832 = vmatprep.mubr.bf16.mxu0 %v4928_v2 }
  0xb7   : > { %4264 = vmatmul.mubr.msk.bf16.gmra.mrb[80].mxu1 %vm527_vm0, %v4820_v6  ;;  %4240 = vmatmul.mubr.msk.bf16.gmra.mrb[80].mxu0 %vm527_vm0, %v4820_v6 }
  0xb8   : > { %1113 = vmatprep.mubr.bf16.mxu1 %v4928_v2  ;;  %842 = vmatprep.mubr.bf16.mxu0 %v4928_v2 }
  0xbf   : > { %4265 = vmatmul.mubr.msk.bf16.gmra.mrb[84].mxu1 %vm527_vm0, %v4821_v10  ;;  %4241 = vmatmul.mubr.msk.bf16.gmra.mrb[84].mxu0 %vm527_vm0, %v4821_v10 }
  0xc0   : > { %1123 = vmatprep.mubr.bf16.mxu1 %v4928_v2  ;;  %852 = vmatprep.mubr.bf16.mxu0 %v4928_v2 }
  0xc7   : > { %4266 = vmatmul.mubr.msk.bf16.gmra.mrb[88].mxu1 %vm527_vm0, %v4828_v12  ;;  %4242 = vmatmul.mubr.msk.bf16.gmra.mrb[88].mxu0 %vm527_vm0, %v4828_v12 }
  0xc8   : > { %1133 = vmatprep.mubr.bf16.mxu1 %v4928_v2  ;;  %862 = vmatprep.mubr.bf16.mxu0 %v4928_v2  ;;  %v4901_v2 = vld [vmem:[%s7449_s3 + $0xc4] ss:$8 sps:$4 sm:$0xff]  }
  0xc9   : > { %3319 = vmatprep.subr.bf16.mxu0 %v4901_v2 }
  0xca   : > { %3320 = vmatpush1.bf16.msra.mxu0 %v4899_v20 }
  0xcb   : > { %3321 = vmatprep.subr.bf16.mxu0 %v4907_v26 }
  0xce   : > { %3322 = vmatpush1.bf16.msra.mxu0 %v4905_v25 }
  0xcf   : > { %4267 = vmatmul.mubr.msk.bf16.gmra.mrb[92].mxu1 %vm527_vm0, %v4835_v17  ;;  %4243 = vmatmul.mubr.msk.bf16.gmra.mrb[92].mxu0 %vm527_vm0, %v4835_v17 }
  0xd0   : > { %3323 = vmatprep.subr.bf16.mxu0 %v4913_v37 }
  0xd2   : > { %3324 = vmatpush1.bf16.msra.mxu0 %v4911_v36 }
  0xd3   : > { %3325 = vmatprep.subr.bf16.mxu0 %v4916_v58 }
  0xd6   : > { %3326 = vmatpush1.bf16.msra.mxu0 %v4914_v62 }
  0xea   : > { %v905_v31 = vpop.f32.mrb[0].mxu1  ;;  %v5319_v42 = vpop.f32.mrb[0].mxu0 }
  0xeb   : > { %v907_v35 = vpop.f32.mrb[1].mxu1  ;;  %v5324_v45 = vpop.f32.mrb[1].mxu0  ;;  %v5327_v46 = vadd.f32 %v905_v31, %v5307_v34 }
  0xec   : > { %v908_v38 = vadd.f32 %v907_v35, %v5298_v30  ;;  %v909_v39 = vpop.f32.mrb[2].mxu1  ;;  %v5330_v48 = vpop.f32.mrb[2].mxu0 }
  0xed   : > { %v5317_v40 = vadd.f32 %v909_v39, %v5307_v34  ;;  %v911_v41 = vpop.f32.mrb[3].mxu1  ;;  %v5334_v50 = vpop.f32.mrb[3].mxu0  ;;  %v7461_v55 = vmax.f32 %v5327_v46, 0.0 }
  0xee   : > { %v5321_v43 = vmax.f32 %v908_v38, 0.0  ;;  %v912_v44 = vadd.f32 %v911_v41, %v5298_v30 }
  0xef   : > { %v7462_v47 = vmax.f32 %v5317_v40, 0.0 }
  0xf0   : > { %v5332_v49 = vmax.f32 %v912_v44, 0.0  ;;  %v1378_v51 = vrot.slane %v5321_v43, 7 }
  0xf1   : > { %v4438_v52 = vpack.i.bf16 %v7462_v47, %v5321_v43 }
  0xf2   : > { %v1379_v53 = vrot.slane %v5332_v49, 7  ;;  %v915_v54 = vpop.f32.mrb[4].mxu1  ;;  %v4443_v4 = vpack.i.bf16 %v7461_v55, %v1378_v51  ;;  %v5361_v5 = vpop.f32.mrb[4].mxu0 }
  0xf3   : > { %v5343_v56 = vadd.f32 %v915_v54, %v5307_v34  ;;  %v917_v57 = vpop.f32.mrb[5].mxu1  ;;  %4439 = vrot.lane.b32.xlu0 %v4438_v52, %s4929_s28  ;;  %v5366_v8 = vpop.f32.mrb[5].mxu0 }
  0xf4   : > { %v918_v59 = vadd.f32 %v917_v57, %v5298_v30  ;;  %v919_v60 = vpop.f32.mrb[6].mxu1  ;;  %v1380_v61 = vsel %vm1377_vm1, %v1378_v51, %v1379_v53  ;;  %v5371_v10 = vpop.f32.mrb[6].mxu0 }
  0xf5   : > { %7589 = vst [vmem:[#allocation3_spill] sm:$0xff] %v5343_v56  ;;  %v7459_v63 = vmax.f32 %v5343_v56, 0.0  ;;  %v5356_v0 = vadd.f32 %v919_v60, %v5307_v34  ;;  %v921_v1 = vpop.f32.mrb[7].mxu1  ;;  %v4448_v3 = vpack.i.bf16 %v1380_v61, %v5332_v49  ;;  %v5379_v14 = vpop.f32.mrb[7].mxu0 }
  0xf6   : > { %v5363_v6 = vmax.f32 %v918_v59, 0.0  ;;  %v922_v7 = vadd.f32 %v921_v1, %v5298_v30 }
  0xf7   : > { %7590 = vst [vmem:[#allocation4_spill] sm:$0xff] %v5356_v0  ;;  %v7458_v9 = vmax.f32 %v5356_v0, 0.0  ;;  %4449 = vrot.lane.b32.xlu1 %v4448_v3, %s4929_s28  ;;  %4444 = vrot.lane.b32.xlu0 %v4443_v4, %s4929_s28 }
  0xf8   : > { %v1381_v11 = vrot.slane %v5363_v6, 7  ;;  %v5374_v12 = vmax.f32 %v922_v7, 0.0  ;;  %v4453_v13 = vpack.i.bf16 %v5363_v6, %v7459_v63 }
  0xfa   : > { %v1383_v17 = vrot.slane %v5374_v12, 7  ;;  %v925_v18 = vpop.f32.mrb[8].mxu1  ;;  %v4458_v19 = vpack.i.bf16 %v5374_v12, %v7458_v9  ;;  %v1382_v24 = vsel %vm1377_vm1, %v1379_v53, %v1381_v11  ;;  %v5403_v32 = vpop.f32.mrb[8].mxu0 }
  0xfb   : > { %v5392_v20 = vadd.f32 %v925_v18, %v5307_v34  ;;  %v927_v2 = vpop.f32.mrb[9].mxu1  ;;  %4454 = vrot.lane.b32.xlu1 %v4453_v13, %s4929_s28  ;;  %v5408_v36 = vpop.f32.mrb[9].mxu0 }
  0xfc   : > { %v928_v21 = vadd.f32 %v927_v2, %v5298_v30  ;;  %v929_v23 = vpop.f32.mrb[10].mxu1  ;;  %4459 = vrot.lane.b32.xlu0 %v4458_v19, %s4929_s28  ;;  %v1384_v25 = vsel %vm1377_vm1, %v1381_v11, %v1383_v17  ;;  %v5412_v38 = vpop.f32.mrb[10].mxu0 }
  0xfd   : > { %7591 = vst [vmem:[#allocation5_spill] sm:$0xff] %v5392_v20  ;;  %v7457_v26 = vmax.f32 %v5392_v20, 0.0  ;;  %v5401_v27 = vadd.f32 %v929_v23, %v5307_v34  ;;  %v931_v29 = vpop.f32.mrb[11].mxu1  ;;  %v4463_v31 = vpack.i.bf16 %v1384_v25, %v1382_v24  ;;  %v5420_v51 = vpop.f32.mrb[11].mxu0 }
  0xfe   : > { %v5405_v33 = vmax.f32 %v928_v21, 0.0  ;;  %v932_v35 = vadd.f32 %v931_v29, %v5298_v30 }
  0xff   : > { %7592 = vst [vmem:[#allocation6_spill] sm:$0xff] %v5401_v27  ;;  %v7455_v37 = vmax.f32 %v5401_v27, 0.0  ;;  %4464 = vrot.lane.b32.xlu1 %v4463_v31, %s4929_s28 }
 0x100   : > { %7593 = vst [vmem:[#allocation7_spill] sm:$0xff] %v5405_v33  ;;  %v1385_v39 = vrot.slane %v5405_v33, 7  ;;  %v5415_v41 = vmax.f32 %v932_v35, 0.0  ;;  %v4468_v44 = vpack.i.bf16 %v5405_v33, %v7457_v26 }
 0x102   : > { %7594 = vst [vmem:[#allocation8_spill] sm:$0xff] %v5415_v41  ;;  %v1387_v52 = vrot.slane %v5415_v41, 7  ;;  %v935_v53 = vpop.f32.mrb[12].mxu1  ;;  %4469 = vrot.lane.b32.xlu0 %v4468_v44, %s4929_s28  ;;  %v4473_v54 = vpack.i.bf16 %v5415_v41, %v7455_v37  ;;  %v1386_v61 = vsel %vm1377_vm1, %v1383_v17, %v1385_v39  ;;  %v5438_v11 = vpop.f32.mrb[12].mxu0 }
 0x103   : > { %v5428_v57 = vadd.f32 %v935_v53, %v5307_v34  ;;  %v937_v58 = vpop.f32.mrb[13].mxu1  ;;  %v5443_v16 = vpop.f32.mrb[13].mxu0 }
 0x104   : > { %v938_v59 = vadd.f32 %v937_v58, %v5298_v30  ;;  %v939_v60 = vpop.f32.mrb[14].mxu1  ;;  %4474 = vrot.lane.b32.xlu1 %v4473_v54, %s4929_s28  ;;  %v1388_v62 = vsel %vm1377_vm1, %v1385_v39, %v1387_v52  ;;  %v5447_v17 = vpop.f32.mrb[14].mxu0 }
 0x105   : > { %7595 = vst [vmem:[#allocation9_spill] sm:$0xff] %v5428_v57  ;;  %v7454_v1 = vmax.f32 %v5428_v57, 0.0  ;;  %v5436_v3 = vadd.f32 %v939_v60, %v5307_v34  ;;  %v941_v4 = vpop.f32.mrb[15].mxu1  ;;  %v4478_v7 = vpack.i.bf16 %v1388_v62, %v1386_v61  ;;  %v5455_v23 = vpop.f32.mrb[15].mxu0 }
 0x106   : > { %v5440_v13 = vmax.f32 %v938_v59, 0.0  ;;  %v942_v15 = vadd.f32 %v941_v4, %v5298_v30 }
 0x107   : > { %7596 = vst [vmem:[#allocation10_spill] sm:$0xff] %v5436_v3  ;;  %v7453_v18 = vmax.f32 %v5436_v3, 0.0  ;;  %4479 = vrot.lane.b32.xlu0 %v4478_v7, %s4929_s28 }
 0x108   : > { %7597 = vst [vmem:[#allocation11_spill] sm:$0xff] %v5440_v13  ;;  %v1389_v19 = vrot.slane %v5440_v13, 7  ;;  %v5450_v2 = vmax.f32 %v942_v15, 0.0  ;;  %v4483_v21 = vpack.i.bf16 %v5440_v13, %v7454_v1 }
 0x10a   : > { %7598 = vst [vmem:[#allocation12_spill] sm:$0xff] %v5450_v2  ;;  %v1391_v24 = vrot.slane %v5450_v2, 7  ;;  %v945_v25 = vpop.f32.mrb[16].mxu1  ;;  %4484 = vrot.lane.b32.xlu1 %v4483_v21, %s4929_s28  ;;  %v4488_v29 = vpack.i.bf16 %v5450_v2, %v7453_v18  ;;  %v1390_v53 = vsel %vm1377_vm1, %v1387_v52, %v1389_v19  ;;  %v5473_v62 = vpop.f32.mrb[16].mxu0 }
 0x10b   : > { %v5463_v31 = vadd.f32 %v945_v25, %v5307_v34  ;;  %v947_v35 = vpop.f32.mrb[17].mxu1  ;;  %v5478_v15 = vpop.f32.mrb[17].mxu0 }
 0x10c   : > { %v948_v39 = vadd.f32 %v947_v35, %v5298_v30  ;;  %v949_v44 = vpop.f32.mrb[18].mxu1  ;;  %4489 = vrot.lane.b32.xlu0 %v4488_v29, %s4929_s28  ;;  %v1392_v54 = vsel %vm1377_vm1, %v1389_v19, %v1391_v24  ;;  %v5482_v52 = vpop.f32.mrb[18].mxu0 }
 0x10d   : > { %7599 = vst [vmem:[#allocation13_spill] sm:$0xff] %v5463_v31  ;;  %v7452_v58 = vmax.f32 %v5463_v31, 0.0  ;;  %v5471_v59 = vadd.f32 %v949_v44, %v5307_v34  ;;  %v951_v60 = vpop.f32.mrb[19].mxu1  ;;  %v4493_v61 = vpack.i.bf16 %v1392_v54, %v1390_v53  ;;  %v5490_v35 = vpop.f32.mrb[19].mxu0 }
 0x10e   : > { %v5475_v4 = vmax.f32 %v948_v39, 0.0  ;;  %v952_v7 = vadd.f32 %v951_v60, %v5298_v30 }
 0x10f   : > { %7600 = vst [vmem:[#allocation14_spill] sm:$0xff] %v5471_v59  ;;  %v7456_v21 = vmax.f32 %v5471_v59, 0.0  ;;  %4494 = vrot.lane.b32.xlu1 %v4493_v61, %s4929_s28 }
 0x110   : > { %7601 = vst [vmem:[#allocation15_spill] sm:$0xff] %v5475_v4  ;;  %v1393_v19 = vrot.slane %v5475_v4, 7  ;;  %v5485_v25 = vmax.f32 %v952_v7, 0.0  ;;  %v4498_v29 = vpack.i.bf16 %v5475_v4, %v7452_v58 }
 0x112   : > { %7602 = vst [vmem:[#allocation16_spill] sm:$0xff] %v5485_v25  ;;  %v1395_v39 = vrot.slane %v5485_v25, 7  ;;  %v955_v44 = vpop.f32.mrb[20].mxu1  ;;  %4499 = vrot.lane.b32.xlu0 %v4498_v29, %s4929_s28  ;;  %v4503_v53 = vpack.i.bf16 %v5485_v25, %v7456_v21  ;;  %v1394_v58 = vsel %vm1377_vm1, %v1391_v24, %v1393_v19 }
 0x113   : > { %v5498_v54 = vadd.f32 %v955_v44, %v5307_v34  ;;  %v957_v60 = vpop.f32.mrb[21].mxu1 }
 0x114   : > { %v958_v61 = vadd.f32 %v957_v60, %v5298_v30  ;;  %v959_v7 = vpop.f32.mrb[22].mxu1  ;;  %4504 = vrot.lane.b32.xlu1 %v4503_v53, %s4929_s28  ;;  %v1396_v18 = vsel %vm1377_vm1, %v1393_v19, %v1395_v39  ;;  %v5513_v53 = vpop.f32.mrb[20].mxu0 }
 0x115   : > { %7603 = vst [vmem:[#allocation17_spill] sm:$0xff] %v5498_v54  ;;  %v7460_v1 = vmax.f32 %v5498_v54, 0.0  ;;  %v5506_v29 = vadd.f32 %v959_v7, %v5307_v34  ;;  %v961_v37 = vpop.f32.mrb[23].mxu1  ;;  %v4508_v21 = vpack.i.bf16 %v1396_v18, %v1394_v58  ;;  %v5521_v9 = vpop.f32.mrb[21].mxu0 }
 0x116   : > { %v5508_v26 = vmax.f32 %v958_v61, 0.0  ;;  %v962_v44 = vadd.f32 %v961_v37, %v5298_v30  ;;  %v5523_v18 = vpop.f32.mrb[22].mxu0 }
 0x117   : > { %7604 = vst [vmem:[#allocation18_spill] sm:$0xff] %v5506_v29  ;;  %v7465_v60 = vmax.f32 %v5506_v29, 0.0  ;;  %4509 = vrot.lane.b32.xlu0 %v4508_v21, %s4929_s28  ;;  %v5530_v61 = vpop.f32.mrb[23].mxu0 }
 0x118   : > { %7605 = vst [vmem:[#allocation19_spill] sm:$0xff] %v5508_v26  ;;  %v1397_v24 = vrot.slane %v5508_v26, 7  ;;  %v5516_v19 = vmax.f32 %v962_v44, 0.0  ;;  %v4513_v7 = vpack.i.bf16 %v5508_v26, %v7460_v1 }
 0x11a   : > { %7606 = vst [vmem:[#allocation20_spill] sm:$0xff] %v5516_v19  ;;  %v1399_v37 = vrot.slane %v5516_v19, 7  ;;  %v965_v58 = vpop.f32.mrb[24].mxu1  ;;  %4514 = vrot.lane.b32.xlu1 %v4513_v7, %s4929_s28  ;;  %v4518_v21 = vpack.i.bf16 %v5516_v19, %v7465_v60  ;;  %v1398_v47 = vsel %vm1377_vm1, %v1395_v39, %v1397_v24 }
 0x11b   : > { %v5533_v44 = vadd.f32 %v965_v58, %v5307_v34  ;;  %v967_v63 = vpop.f32.mrb[25].mxu1 }
 0x11c   : > { %v968_v1 = vadd.f32 %v967_v63, %v5298_v30  ;;  %v969_v55 = vpop.f32.mrb[26].mxu1  ;;  %4519 = vrot.lane.b32.xlu0 %v4518_v21, %s4929_s28  ;;  %v1400_v54 = vsel %vm1377_vm1, %v1397_v24, %v1399_v37 }
 0x11d   : > { %7607 = vst [vmem:[#allocation21_spill] sm:$0xff] %v5533_v44  ;;  %v7469_v7 = vmax.f32 %v5533_v44, 0.0  ;;  %v5541_v29 = vadd.f32 %v969_v55, %v5307_v34  ;;  %v971_v60 = vpop.f32.mrb[27].mxu1  ;;  %v4523_v19 = vpack.i.bf16 %v1400_v54, %v1398_v47 }
 0x11e   : > { %v5543_v26 = vmax.f32 %v968_v1, 0.0  ;;  %v972_v58 = vadd.f32 %v971_v60, %v5298_v30  ;;  %v5559_v1 = vpop.f32.mrb[24].mxu0 }
 0x11f   : > { %7608 = vst [vmem:[#allocation22_spill] sm:$0xff] %v5541_v29  ;;  %v7472_v63 = vmax.f32 %v5541_v29, 0.0  ;;  %4524 = vrot.lane.b32.xlu1 %v4523_v19, %s4929_s28  ;;  %v5564_v19 = vpop.f32.mrb[25].mxu0 }
 0x120   : > { %7609 = vst [vmem:[#allocation23_spill] sm:$0xff] %v5543_v26  ;;  %v1401_v21 = vrot.slane %v5543_v26, 7  ;;  %v5549_v39 = vmax.f32 %v972_v58, 0.0  ;;  %v4528_v24 = vpack.i.bf16 %v5543_v26, %v7469_v7  ;;  %v5570_v29 = vpop.f32.mrb[26].mxu0 }
 0x121   : > { %v5579_v25 = vpop.f32.mrb[27].mxu0 }
 0x122   : > { %7610 = vst [vmem:[#allocation24_spill] sm:$0xff] %v5549_v39  ;;  %v1403_v55 = vrot.slane %v5549_v39, 7  ;;  %v975_v59 = vpop.f32.mrb[28].mxu1  ;;  %4529 = vrot.lane.b32.xlu0 %v4528_v24, %s4929_s28  ;;  %v4533_v47 = vpack.i.bf16 %v5549_v39, %v7472_v63  ;;  %v1402_v44 = vsel %vm1377_vm1, %v1399_v37, %v1401_v21  ;;  %v5607_v3 = vpop.f32.mrb[28].mxu0 }
 0x123   : > { %v5562_v54 = vadd.f32 %v975_v59, %v5307_v34  ;;  %v977_v60 = vpop.f32.mrb[29].mxu1  ;;  %v5612_v4 = vpop.f32.mrb[29].mxu0 }
 0x124   : > { %v978_v58 = vadd.f32 %v977_v60, %v5298_v30  ;;  %v979_v7 = vpop.f32.mrb[30].mxu1  ;;  %4534 = vrot.lane.b32.xlu1 %v4533_v47, %s4929_s28  ;;  %v1404_v24 = vsel %vm1377_vm1, %v1401_v21, %v1403_v55 }
 0x125   : > { %7611 = vst [vmem:[#allocation25_spill] sm:$0xff] %v5562_v54  ;;  %v7479_v63 = vmax.f32 %v5562_v54, 0.0  ;;  %v5574_v39 = vadd.f32 %v979_v7, %v5307_v34  ;;  %v981_v59 = vpop.f32.mrb[31].mxu1  ;;  %v4538_v26 = vpack.i.bf16 %v1404_v24, %v1402_v44 }
 0x126   : > { %v5576_v31 = vmax.f32 %v978_v58, 0.0  ;;  %v982_v60 = vadd.f32 %v981_v59, %v5298_v30 }
 0x127   : > { %7612 = vst [vmem:[#allocation26_spill] sm:$0xff] %v5574_v39  ;;  %v7482_v47 = vmax.f32 %v5574_v39, 0.0  ;;  %4539 = vrot.lane.b32.xlu0 %v4538_v26, %s4929_s28 }
 0x128   : > { %7613 = vst [vmem:[#allocation27_spill] sm:$0xff] %v5576_v31  ;;  %v1405_v37 = vrot.slane %v5576_v31, 7  ;;  %v5584_v21 = vmax.f32 %v982_v60, 0.0  ;;  %v4543_v7 = vpack.i.bf16 %v5576_v31, %v7479_v63 }
 0x12a   : > { %7614 = vst [vmem:[#allocation28_spill] sm:$0xff] %v5584_v21  ;;  %v1407_v44 = vrot.slane %v5584_v21, 7  ;;  %v985_v58 = vpop.f32.mrb[32].mxu1  ;;  %4544 = vrot.lane.b32.xlu1 %v4543_v7, %s4929_s28  ;;  %v4548_v24 = vpack.i.bf16 %v5584_v21, %v7482_v47  ;;  %v1406_v31 = vsel %vm1377_vm1, %v1403_v55, %v1405_v37  ;;  %v7618_v55 = vsub.s32 0, %v5276_v22 }
 0x12b   : > { %v5595_v59 = vadd.f32 %v985_v58, %v5307_v34  ;;  %v987_v26 = vpop.f32.mrb[33].mxu1 }
 0x12c   : > { %v988_v54 = vadd.f32 %v987_v26, %v5298_v30  ;;  %v989_v63 = vpop.f32.mrb[34].mxu1  ;;  %4549 = vrot.lane.b32.xlu0 %v4548_v24, %s4929_s28  ;;  %v1408_v7 = vsel %vm1377_vm1, %v1405_v37, %v1407_v44  ;;  %v5619_v37 = vrot.slane %v5294_v28, %v7618_v55 }
 0x12d   : > { %7615 = vst [vmem:[#allocation29_spill] sm:$0xff] %v5595_v59  ;;  %v7489_v39 = vmax.f32 %v5595_v59, 0.0  ;;  %v5605_v47 = vadd.f32 %v989_v63, %v5307_v34  ;;  %v991_v58 = vpop.f32.mrb[35].mxu1  ;;  %v4553_v21 = vpack.i.bf16 %v1408_v7, %v1406_v31  ;;  %v7620_v63 = vsub.s32 1, %v5276_v22 }
 0x12e   : > { %v5609_v60 = vmax.f32 %v988_v54, 0.0  ;;  %v992_v26 = vadd.f32 %v991_v58, %v5298_v30  ;;  %7619 = vst [vmem:[#allocation32_spill] sm:$0xff] %v5619_v37  ;;  %v5626_v54 = vpop.f32.mrb[30].mxu0  ;;  %v5646_v59 = vadd.f32 %v5319_v42, %v5619_v37 }
 0x12f   : > { %7616 = vst [vmem:[#allocation30_spill] sm:$0xff] %v5605_v47  ;;  %4554 = vrot.lane.b32.xlu1 %v4553_v21, %s4929_s28  ;;  %v5624_v31 = vrot.slane %v5294_v28, %v7620_v63  ;;  %v5634_v24 = vpop.f32.mrb[31].mxu0  ;;  %v7623_v28 = vmax.f32 %v5605_v47, 0.0 }
 0x130   : > { %7617 = vst [vmem:[#allocation31_spill] sm:$0xff] %v5609_v60  ;;  %v1409_v7 = vrot.slane %v5609_v60, 7  ;;  %v5629_v58 = vmax.f32 %v992_v26, 0.0  ;;  %v4558_v21 = vpack.i.bf16 %v5609_v60, %v7489_v39  ;;  %v5654_v60 = vadd.f32 %v5330_v48, %v5619_v37 }
 0x131   : > { %7621 = vst [vmem:[#allocation33_spill] sm:$0xff] %v5624_v31  ;;  %v5650_v39 = vadd.f32 %v5324_v45, %v5624_v31  ;;  %v5662_v42 = vadd.f32 %v5334_v50, %v5624_v31  ;;  %v5692_v50 = vpop.f32.mrb[32].mxu0  ;;  %v5854_v56 = vadd.f32 %v5530_v61, %v5624_v31  ;;  %v5873_v61 = vadd.f32 %v5579_v25, %v5624_v31 }
 0x132   : > { %7622 = vst [vmem:[#allocation34_spill] sm:$0xff] %v5629_v58  ;;  %v1411_v55 = vrot.slane %v5629_v58, 7  ;;  %v995_v57 = vpop.f32.mrb[36].mxu1  ;;  %4559 = vrot.lane.b32.xlu0 %v4558_v21, %s4929_s28  ;;  %v4563_v63 = vpack.i.bf16 %v5629_v58, %v7623_v28 }
 0x133   : > { %v5642_v22 = vadd.f32 %v995_v57, %v5307_v34  ;;  %v997_v26 = vpop.f32.mrb[37].mxu1  ;;  %v1410_v57 = vsel %vm1377_vm1, %v1407_v44, %v1409_v7 }
 0x134   : > { %v998_v21 = vadd.f32 %v997_v26, %v5298_v30  ;;  %v999_v47 = vpop.f32.mrb[38].mxu1  ;;  %4564 = vrot.lane.b32.xlu1 %v4563_v63, %s4929_s28  ;;  %v1412_v28 = vsel %vm1377_vm1, %v1409_v7, %v1411_v55  ;;  %v5670_v26 = vadd.f32 %v5361_v5, %v5619_v37  ;;  %v5705_v7 = vadd.f32 %v5379_v14, %v5624_v31 }
 0x135   : > { %7624 = vst [vmem:[#allocation35_spill] sm:$0xff] %v5642_v22  ;;  %v5666_v58 = vadd.f32 %v999_v47, %v5307_v34  ;;  %v1001_v48 = vpop.f32.mrb[39].mxu1  ;;  %v4568_v2 = vpack.i.bf16 %v1412_v28, %v1410_v57  ;;  %v7628_v57 = vmax.f32 %v5642_v22, 0.0 }
 0x136   : > { %v5672_v63 = vmax.f32 %v998_v21, 0.0  ;;  %v1002_v44 = vadd.f32 %v1001_v48, %v5298_v30  ;;  %v5701_v48 = vadd.f32 %v5371_v10, %v5619_v37  ;;  %v5722_v10 = vadd.f32 %v5412_v38, %v5619_v37 }
 0x137   : > { %7625 = vst [vmem:[#allocation36_spill] sm:$0xff] %v5666_v58  ;;  %4569 = vrot.lane.b32.xlu0 %v4568_v2, %s4929_s28  ;;  %v5690_v2 = vadd.f32 %v5366_v8, %v5624_v31  ;;  %v5707_v8 = vpop.f32.mrb[33].mxu0 }
 0x138   : > { %7626 = vst [vmem:[#allocation37_spill] sm:$0xff] %v5672_v63  ;;  %v1413_v45 = vrot.slane %v5672_v63, 7  ;;  %v5679_v47 = vmax.f32 %v1002_v44, 0.0  ;;  %v4573_v28 = vpack.i.bf16 %v5672_v63, %v7628_v57  ;;  %v7629_v57 = vmax.f32 %v5666_v58, 0.0  ;;  %v5724_v14 = vpop.f32.mrb[34].mxu0 }
 0x139   : > { %v5732_v63 = vadd.f32 %v5420_v51, %v5624_v31 }
 0x13a   : > { %7627 = vst [vmem:[#allocation38_spill] sm:$0xff] %v5679_v47  ;;  %v1415_v44 = vrot.slane %v5679_v47, 7  ;;  %v1005_v13 = vpop.f32.mrb[40].mxu1  ;;  %4574 = vrot.lane.b32.xlu1 %v4573_v28, %s4929_s28  ;;  %v4578_v5 = vpack.i.bf16 %v5679_v47, %v7629_v57  ;;  %v5714_v28 = vadd.f32 %v5403_v32, %v5619_v37  ;;  %v5718_v57 = vadd.f32 %v5408_v36, %v5624_v31  ;;  %v5734_v36 = vpop.f32.mrb[35].mxu0 }
 0x13b   : > { %v5710_v21 = vadd.f32 %v1005_v13, %v5307_v34  ;;  %v1007_v22 = vpop.f32.mrb[41].mxu1  ;;  %v1414_v13 = vsel %vm1377_vm1, %v1411_v55, %v1413_v45  ;;  %v5784_v41 = vpop.f32.mrb[36].mxu0 }
 0x13c   : > { %v1008_v58 = vadd.f32 %v1007_v22, %v5298_v30  ;;  %v1009_v47 = vpop.f32.mrb[42].mxu1  ;;  %4579 = vrot.lane.b32.xlu0 %v4578_v5, %s4929_s28  ;;  %v1416_v32 = vsel %vm1377_vm1, %v1413_v45, %v1415_v44  ;;  %v5742_v5 = vadd.f32 %v5438_v11, %v5619_v37 }
 0x13d   : > { %7630 = vst [vmem:[#allocation39_spill] sm:$0xff] %v5710_v21  ;;  %v7503_v38 = vmax.f32 %v5710_v21, 0.0  ;;  %v5738_v27 = vadd.f32 %v1009_v47, %v5307_v34  ;;  %v1011_v20 = vpop.f32.mrb[43].mxu1  ;;  %v4583_v22 = vpack.i.bf16 %v1416_v32, %v1414_v13  ;;  %v5765_v47 = vadd.f32 %v5443_v16, %v5624_v31 }
 0x13e   : > { %7632 = vst [vmem:[#allocation41_spill] sm:$0xff] %v5742_v5  ;;  %v5744_v55 = vmax.f32 %v1008_v58, 0.0  ;;  %v1012_v45 = vadd.f32 %v1011_v20, %v5298_v30  ;;  %v5769_v13 = vadd.f32 %v5447_v17, %v5619_v37  ;;  %v5782_v16 = vadd.f32 %v5473_v62, %v5619_v37  ;;  %v5801_v62 = vpop.f32.mrb[37].mxu0 }
 0x13f   : > { %7631 = vst [vmem:[#allocation40_spill] sm:$0xff] %v5738_v27  ;;  %v7504_v33 = vmax.f32 %v5738_v27, 0.0  ;;  %4584 = vrot.lane.b32.xlu1 %v4583_v22, %s4929_s28  ;;  %v5778_v22 = vadd.f32 %v5455_v23, %v5624_v31  ;;  %v5799_v23 = vadd.f32 %v5490_v35, %v5624_v31  ;;  %v5865_v35 = vadd.f32 %v5564_v19, %v5624_v31 }
 0x140   : > { %7633 = vst [vmem:[#allocation42_spill] sm:$0xff] %v5744_v55  ;;  %v1417_v11 = vrot.slane %v5744_v55, 7  ;;  %v5755_v58 = vmax.f32 %v1012_v45, 0.0  ;;  %v4588_v20 = vpack.i.bf16 %v5744_v55, %v7503_v38  ;;  %7635 = vst [vmem:[#allocation44_spill] sm:$0xff] %v5782_v16 }
 0x142   : > { %7634 = vst [vmem:[#allocation43_spill] sm:$0xff] %v5755_v58  ;;  %v1419_v45 = vrot.slane %v5755_v58, 7  ;;  %v1015_v32 = vpop.f32.mrb[44].mxu1  ;;  %4589 = vrot.lane.b32.xlu0 %v4588_v20, %s4929_s28  ;;  %v4593_v38 = vpack.i.bf16 %v5755_v58, %v7504_v33  ;;  %v5791_v20 = vadd.f32 %v5478_v15, %v5624_v31  ;;  %v5795_v33 = vadd.f32 %v5482_v52, %v5619_v37  ;;  %v5811_v52 = vpop.f32.mrb[38].mxu0 }
 0x143   : > { %v5787_v17 = vadd.f32 %v1015_v32, %v5307_v34  ;;  %v1017_v51 = vpop.f32.mrb[45].mxu1  ;;  %v1418_v32 = vsel %vm1377_vm1, %v1415_v44, %v1417_v11  ;;  %v5809_v58 = vadd.f32 %v5513_v53, %v5619_v37  ;;  %v5821_v44 = vpop.f32.mrb[39].mxu0 }
 0x144   : > { %7637 = vst [vmem:[#allocation46_spill] sm:$0xff] %v5795_v33  ;;  %v1018_v27 = vadd.f32 %v1017_v51, %v5298_v30  ;;  %v1019_v21 = vpop.f32.mrb[46].mxu1  ;;  %4594 = vrot.lane.b32.xlu1 %v4593_v38, %s4929_s28  ;;  %v1420_v15 = vsel %vm1377_vm1, %v1417_v11, %v1419_v45  ;;  %v5819_v38 = vadd.f32 %v5521_v9, %v5624_v31 }
 0x145   : > { %7636 = vst [vmem:[#allocation45_spill] sm:$0xff] %v5787_v17  ;;  %7638 = vst [vmem:[#allocation47_spill] sm:$0xff] %v5809_v58  ;;  %v5815_v55 = vadd.f32 %v1019_v21, %v5307_v34  ;;  %v1021_v5 = vpop.f32.mrb[47].mxu1  ;;  %v4598_v51 = vpack.i.bf16 %v1420_v15, %v1418_v32  ;;  %v5845_v32 = vadd.f32 %v5523_v18, %v5619_v37 }
 0x146   : > { %7640 = vst [vmem:[#allocation49_spill] sm:$0xff] %v5819_v38  ;;  %v5823_v11 = vmax.f32 %v1018_v27, 0.0  ;;  %v1022_v53 = vadd.f32 %v1021_v5, %v5298_v30  ;;  %v7643_v5 = vmax.f32 %v5787_v17, 0.0 }
 0x147   : > { %7639 = vst [vmem:[#allocation48_spill] sm:$0xff] %v5815_v55  ;;  %4599 = vrot.lane.b32.xlu0 %v4598_v51, %s4929_s28  ;;  %v7644_v17 = vmax.f32 %v5815_v55, 0.0  ;;  %v5858_v51 = vadd.f32 %v5559_v1, %v5619_v37 }
 0x148   : > { %7641 = vst [vmem:[#allocation50_spill] sm:$0xff] %v5823_v11  ;;  %v1421_v15 = vrot.slane %v5823_v11, 7  ;;  %v5834_v27 = vmax.f32 %v1022_v53, 0.0  ;;  %v4603_v0 = vpack.i.bf16 %v5823_v11, %v7643_v5 }
 0x149   : > { %7645 = vst [vmem:[#allocation52_spill] sm:$0xff] %v5858_v51 }
 0x14a   : > { %7642 = vst [vmem:[#allocation51_spill] sm:$0xff] %v5834_v27  ;;  %v1423_v9 = vrot.slane %v5834_v27, 7  ;;  %v1025_v53 = vpop.f32.mrb[48].mxu1  ;;  %4604 = vrot.lane.b32.xlu1 %v4603_v0, %s4929_s28  ;;  %v4608_v5 = vpack.i.bf16 %v5834_v27, %v7644_v17  ;;  %v5869_v0 = vadd.f32 %v5570_v29, %v5619_v37  ;;  %v5875_v17 = vpop.f32.mrb[40].mxu0  ;;  %v5883_v27 = vadd.f32 %v5607_v3, %v5619_v37 }
 0x14b   : > { %v5861_v18 = vadd.f32 %v1025_v53, %v5307_v34  ;;  %v1027_v21 = vpop.f32.mrb[49].mxu1  ;;  %v1422_v53 = vsel %vm1377_vm1, %v1419_v45, %v1421_v15  ;;  %v5885_v29 = vpop.f32.mrb[41].mxu0 }
 0x14c   : > { %7647 = vst [vmem:[#allocation54_spill] sm:$0xff] %v5869_v0  ;;  %v1028_v1 = vadd.f32 %v1027_v21, %v5298_v30  ;;  %v1029_v55 = vpop.f32.mrb[50].mxu1  ;;  %4609 = vrot.lane.b32.xlu0 %v4608_v5, %s4929_s28  ;;  %v1424_v19 = vsel %vm1377_vm1, %v1421_v15, %v1423_v9  ;;  %7648 = vst [vmem:[#allocation55_spill] sm:$0xff] %v5883_v27  ;;  %v5893_v5 = vadd.f32 %v5612_v4, %v5624_v31  ;;  %v5895_v45 = vpop.f32.mrb[42].mxu0 }
 0x14d   : > { %7646 = vst [vmem:[#allocation53_spill] sm:$0xff] %v5861_v18  ;;  %v5889_v11 = vadd.f32 %v1029_v55, %v5307_v34  ;;  %v1031_v58 = vpop.f32.mrb[51].mxu1  ;;  %v4613_v21 = vpack.i.bf16 %v1424_v19, %v1422_v53  ;;  %v5902_v25 = vpop.f32.mrb[43].mxu0  ;;  %v5920_v53 = vadd.f32 %v5626_v54, %v5619_v37  ;;  %v5924_v19 = vadd.f32 %v5634_v24, %v5624_v31 }
 0x14e   : > { %7650 = vst [vmem:[#allocation57_spill] sm:$0xff] %v5893_v5  ;;  %v5897_v15 = vmax.f32 %v1028_v1, 0.0  ;;  %v1032_v3 = vadd.f32 %v1031_v58, %v5298_v30  ;;  %v7653_v58 = vmax.f32 %v5861_v18, 0.0  ;;  %v5933_v55 = vadd.f32 %v5692_v50, %v5619_v37 }
 0x14f   : > { %7649 = vst [vmem:[#allocation56_spill] sm:$0xff] %v5889_v11  ;;  %4614 = vrot.lane.b32.xlu1 %v4613_v21, %s4929_s28  ;;  %v5937_v54 = vadd.f32 %v5707_v8, %v5624_v31  ;;  %v5944_v18 = vadd.f32 %v5724_v14, %v5619_v37  ;;  %v5952_v50 = vadd.f32 %v5784_v41, %v5619_v37 }
 0x150   : > { %7651 = vst [vmem:[#allocation58_spill] sm:$0xff] %v5897_v15  ;;  %v1425_v1 = vrot.slane %v5897_v15, 7  ;;  %v5910_v16 = vmax.f32 %v1032_v3, 0.0  ;;  %v4618_v38 = vpack.i.bf16 %v5897_v15, %v7653_v58  ;;  %v7654_v58 = vmax.f32 %v5889_v11, 0.0  ;;  %7655 = vst [vmem:[#allocation60_spill] sm:$0xff] %v5933_v55 }
 0x151   : > { %7657 = vst [vmem:[#allocation62_spill] sm:$0xff] %v5952_v50  ;;  %v5960_v14 = vadd.f32 %v5801_v62, %v5624_v31  ;;  %v6001_v15 = vadd.f32 %v5875_v17, %v5619_v37  ;;  %v6012_v51 = vadd.f32 %v5895_v45, %v5619_v37 }
 0x152   : > { %7652 = vst [vmem:[#allocation59_spill] sm:$0xff] %v5910_v16  ;;  %v1427_v3 = vrot.slane %v5910_v16, 7  ;;  %v1035_v4 = vpop.f32.mrb[52].mxu1  ;;  %4619 = vrot.lane.b32.xlu0 %v4618_v38, %s4929_s28  ;;  %v4623_v33 = vpack.i.bf16 %v5910_v16, %v7654_v58  ;;  %v5948_v38 = vadd.f32 %v5734_v36, %v5624_v31  ;;  %v744_v58 = vpop.f32.mrb[44].mxu0 }
 0x153   : > { %v5940_v24 = vadd.f32 %v1035_v4, %v5307_v34  ;;  %v1037_v21 = vpop.f32.mrb[53].mxu1  ;;  %v1426_v4 = vsel %vm1377_vm1, %v1423_v9, %v1425_v1  ;;  %7658 = vst [vmem:[#allocation63_spill] sm:$0xff] %v5960_v14  ;;  %v746_v36 = vpop.f32.mrb[45].mxu0  ;;  %7665 = vst [vmem:[#allocation68_spill] sm:$0xff] %v6001_v15 }
 0x154   : > { %v1038_v8 = vadd.f32 %v1037_v21, %v5298_v30  ;;  %v1039_v11 = vpop.f32.mrb[54].mxu1  ;;  %4624 = vrot.lane.b32.xlu1 %v4623_v33, %s4929_s28  ;;  %v1428_v16 = vsel %vm1377_vm1, %v1425_v1, %v1427_v3  ;;  %v5968_v21 = vadd.f32 %v5811_v52, %v5619_v37  ;;  %v748_v33 = vpop.f32.mrb[46].mxu0  ;;  %v6026_v45 = vadd.f32 %v746_v36, %v5624_v31 }
 0x155   : > { %7656 = vst [vmem:[#allocation61_spill] sm:$0xff] %v5940_v24  ;;  %v5964_v41 = vadd.f32 %v1039_v11, %v5307_v34  ;;  %v1041_v27 = vpop.f32.mrb[55].mxu1  ;;  %v4628_v5 = vpack.i.bf16 %v1428_v16, %v1426_v4  ;;  %v750_v0 = vpop.f32.mrb[47].mxu0  ;;  %v5992_v11 = vadd.f32 %v5821_v44, %v5624_v31  ;;  %v6005_v16 = vadd.f32 %v5885_v29, %v5624_v31 }
 0x156   : > { %7660 = vst [vmem:[#allocation65_spill] sm:$0xff] %v5968_v21  ;;  %v5970_v9 = vmax.f32 %v1038_v8, 0.0  ;;  %v1042_v1 = vadd.f32 %v1041_v27, %v5298_v30  ;;  %v7663_v27 = vmax.f32 %v5940_v24, 0.0  ;;  %v754_v17 = vpop.f32.mrb[48].mxu0  ;;  %7668 = vst [vmem:[#allocation71_spill] sm:$0xff] %v6026_v45 }
 0x157   : > { %7659 = vst [vmem:[#allocation64_spill] sm:$0xff] %v5964_v41  ;;  %4629 = vrot.lane.b32.xlu0 %v4628_v5, %s4929_s28  ;;  %v7664_v24 = vmax.f32 %v5964_v41, 0.0 }
 0x158   : > { %7661 = vst [vmem:[#allocation66_spill] sm:$0xff] %v5970_v9  ;;  %v1429_v8 = vrot.slane %v5970_v9, 7  ;;  %v5981_v4 = vmax.f32 %v1042_v1, 0.0  ;;  %v4633_v62 = vpack.i.bf16 %v5970_v9, %v7663_v27  ;;  %v756_v9 = vpop.f32.mrb[49].mxu0 }
 0x159   : > { %v758_v14 = vpop.f32.mrb[50].mxu0 }
 0x15a   : > { %7662 = vst [vmem:[#allocation67_spill] sm:$0xff] %v5981_v4  ;;  %v1431_v52 = vrot.slane %v5981_v4, 7  ;;  %v1045_v1 = vpop.f32.mrb[56].mxu1  ;;  %4634 = vrot.lane.b32.xlu1 %v4633_v62, %s4929_s28  ;;  %v4638_v27 = vpack.i.bf16 %v5981_v4, %v7664_v24  ;;  %v6016_v62 = vadd.f32 %v5902_v25, %v5624_v31  ;;  %v6019_v24 = vadd.f32 %v744_v58, %v5619_v37  ;;  %v760_v55 = vpop.f32.mrb[51].mxu0 }
 0x15b   : > { %v6008_v44 = vadd.f32 %v1045_v1, %v5307_v34  ;;  %v1047_v5 = vpop.f32.mrb[57].mxu1  ;;  %v1430_v1 = vsel %vm1377_vm1, %v1427_v3, %v1429_v8 }
 0x15c   : > { %7667 = vst [vmem:[#allocation70_spill] sm:$0xff] %v6019_v24  ;;  %v1048_v41 = vadd.f32 %v1047_v5, %v5298_v30  ;;  %v1049_v29 = vpop.f32.mrb[58].mxu1  ;;  %4639 = vrot.lane.b32.xlu0 %v4638_v27, %s4929_s28  ;;  %v1432_v4 = vsel %vm1377_vm1, %v1429_v8, %v1431_v52  ;;  %v6033_v5 = vadd.f32 %v748_v33, %v5619_v37 }
 0x15d   : > { %7666 = vst [vmem:[#allocation69_spill] sm:$0xff] %v6008_v44  ;;  %v6030_v50 = vadd.f32 %v1049_v29, %v5307_v34  ;;  %v1051_v58 = vpop.f32.mrb[59].mxu1  ;;  %v4643_v21 = vpack.i.bf16 %v1432_v4, %v1430_v1  ;;  %v6044_v4 = vadd.f32 %v750_v0, %v5624_v31  ;;  %v6047_v33 = vadd.f32 %v754_v17, %v5619_v37 }
 0x15e   : > { %7670 = vst [vmem:[#allocation73_spill] sm:$0xff] %v6033_v5  ;;  %v6035_v27 = vmax.f32 %v1048_v41, 0.0  ;;  %v1052_v3 = vadd.f32 %v1051_v58, %v5298_v30  ;;  %v7675_v58 = vmax.f32 %v6008_v44, 0.0  ;;  %v6066_v8 = vadd.f32 %v756_v9, %v5624_v31 }
 0x15f   : > { %7669 = vst [vmem:[#allocation72_spill] sm:$0xff] %v6030_v50  ;;  %4644 = vrot.lane.b32.xlu1 %v4643_v21, %s4929_s28  ;;  %7672 = vst [vmem:[#allocation75_spill] sm:$0xff] %v6044_v4  ;;  %v6069_v21 = vadd.f32 %v758_v14, %v5619_v37 }
 0x160   : > { %7671 = vst [vmem:[#allocation74_spill] sm:$0xff] %v6035_v27  ;;  %7673 = vst [vmem:[#allocation76_spill] sm:$0xff] %v6047_v33  ;;  %v1433_v41 = vrot.slane %v6035_v27, 7  ;;  %v6050_v1 = vmax.f32 %v1052_v3, 0.0  ;;  %v4648_v36 = vpack.i.bf16 %v6035_v27, %v7675_v58  ;;  %v7676_v3 = vmax.f32 %v6030_v50, 0.0  ;;  %v764_v50 = vpop.f32.mrb[52].mxu0 }
 0x161   : > { %7677 = vst [vmem:[#allocation78_spill] sm:$0xff] %v6066_v8  ;;  %7678 = vst [vmem:[#allocation79_spill] sm:$0xff] %v6069_v21  ;;  %v766_v27 = vpop.f32.mrb[53].mxu0 }
 0x162   : > { %7674 = vst [vmem:[#allocation77_spill] sm:$0xff] %v6050_v1  ;;  %v1435_v25 = vrot.slane %v6050_v1, 7  ;;  %v1055_v15 = vpop.f32.mrb[60].mxu1  ;;  %4649 = vrot.lane.b32.xlu0 %v4648_v36, %s4929_s28  ;;  %v4653_v58 = vpack.i.bf16 %v6050_v1, %v7676_v3  ;;  %v6077_v36 = vadd.f32 %v760_v55, %v5624_v31  ;;  %v1434_v14 = vsel %vm1377_vm1, %v1431_v52, %v1433_v41  ;;  %v768_v5 = vpop.f32.mrb[54].mxu0 }
 0x163   : > { %v6072_v29 = vadd.f32 %v1055_v15, %v5307_v34  ;;  %v1057_v0 = vpop.f32.mrb[61].mxu1  ;;  %v6084_v15 = vadd.f32 %v764_v50, %v5619_v37 }
 0x164   : > { %7680 = vst [vmem:[#allocation81_spill] sm:$0xff] %v6077_v36  ;;  %v1058_v3 = vadd.f32 %v1057_v0, %v5298_v30  ;;  %v1059_v1 = vpop.f32.mrb[62].mxu1  ;;  %4654 = vrot.lane.b32.xlu1 %v4653_v58, %s4929_s28  ;;  %v1436_v9 = vsel %vm1377_vm1, %v1433_v41, %v1435_v25  ;;  %v6091_v0 = vadd.f32 %v766_v27, %v5624_v31  ;;  %v770_v27 = vpop.f32.mrb[55].mxu0 }
 0x165   : > { %7679 = vst [vmem:[#allocation80_spill] sm:$0xff] %v6072_v29  ;;  %7681 = vst [vmem:[#allocation82_spill] sm:$0xff] %v6084_v15  ;;  %v6088_v44 = vadd.f32 %v1059_v1, %v5307_v34  ;;  %v1061_v55 = vpop.f32.mrb[63].mxu1  ;;  %v4440_v33 = vpop.permute.xlu0 %4439  ;;  %v4658_v24 = vpack.i.bf16 %v1436_v9, %v1434_v14  ;;  %v6102_v14 = vadd.f32 %v768_v5, %v5619_v37  ;;  %v7687_v41 = vmax.f32 %v6072_v29, 0.0 }
 0x166   : > { %7683 = vst [vmem:[#allocation84_spill] sm:$0xff] %v6091_v0  ;;  %v6093_v58 = vmax.f32 %v1058_v3, 0.0  ;;  %v1062_v52 = vadd.f32 %v1061_v55, %v5298_v30  ;;  %v4442_v4 = vunpack.i.h.bf16 %v4440_v33  ;;  %v4441_v55 = vunpack.i.l.bf16 %v4440_v33 }
 0x167   : > { %7682 = vst [vmem:[#allocation83_spill] sm:$0xff] %v6088_v44  ;;  %4659 = vrot.lane.b32.xlu0 %v4658_v24, %s4929_s28  ;;  %7685 = vst [vmem:[#allocation86_spill] sm:$0xff] %v6102_v14  ;;  %v6114_v5 = vadd.f32 %v770_v27, %v5624_v31  ;;  %v7689_v24 = vmax.f32 %v6088_v44, 0.0  ;;  %v7692_v14 = vmax.f32 %v5654_v60, 0.0 }
 0x168   : > { %7684 = vst [vmem:[#allocation85_spill] sm:$0xff] %v6093_v58  ;;  %v1437_v3 = vrot.slane %v6093_v58, 7  ;;  %v6105_v9 = vmax.f32 %v1062_v52, 0.0  ;;  %v4663_v50 = vpack.i.bf16 %v6093_v58, %v7687_v41  ;;  %v6125_v58 = vpop.f32.mrb[56].mxu0 }
 0x169   : > { %v4450_v21 = vpop.permute.xlu1 %4449  ;;  %v4445_v17 = vpop.permute.xlu0 %4444  ;;  %7690 = vst [vmem:[#allocation89_spill] sm:$0xff] %v6125_v58 }
 0x16a   : > { %7686 = vst [vmem:[#allocation87_spill] sm:$0xff] %v6105_v9  ;;  %v4452_v52 = vunpack.i.h.bf16 %v4450_v21  ;;  %v4451_v36 = vunpack.i.l.bf16 %v4450_v21  ;;  %v4447_v33 = vunpack.i.h.bf16 %v4445_v17  ;;  %v1065_v45 = vpop.f32.mrb[64].mxu1  ;;  %4664 = vrot.lane.b32.xlu1 %v4663_v50, %s4929_s28  ;;  %v4446_v41 = vunpack.i.l.bf16 %v4445_v17 }
 0x16b   : > { %v6119_v29 = vadd.f32 %v1065_v45, %v5307_v34  ;;  %v1067_v8 = vpop.f32.mrb[65].mxu1  ;;  %v4668_v1 = vpack.i.bf16 %v6105_v9, %v7689_v24  ;;  %v1438_v27 = vsel %vm1377_vm1, %v1435_v25, %v1437_v3  ;;  %v6131_v45 = vpop.f32.mrb[57].mxu0  ;;  %v7693_v24 = vmax.f32 %v5662_v42, 0.0 }
 0x16c   : > { %v1991_v37 = vsel %vm1848_vm2, %v4452_v52, %v4442_v4  ;;  %v1850_v21 = vsel %vm1848_vm2, %v4442_v4, %v4451_v36  ;;  %v1849_v15 = vsel %vm1848_vm2, %v4447_v33, %v4441_v55  ;;  %v1068_v17 = vadd.f32 %v1067_v8, %v5298_v30  ;;  %v1069_v50 = vpop.f32.mrb[66].mxu1  ;;  %7691 = vst [vmem:[#allocation90_spill] sm:$0xff] %v6131_v45  ;;  %v6150_v42 = vpop.f32.mrb[58].mxu0 }
 0x16d   : > { %7688 = vst [vmem:[#allocation88_spill] sm:$0xff] %v6119_v29  ;;  %v2039_v44 = vmax.f32 %v1991_v37, %v7692_v14  ;;  %v6137_v31 = vmax.f32 %v1850_v21, %v7693_v24  ;;  %v1612_v25 = vsel %vm1377_vm1, 0.0, %v4446_v41  ;;  %v7694_v52 = vmax.f32 %v5650_v39, 0.0  ;;  %4669 = vrot.lane.b32.xlu0 %v4668_v1, %s4929_s28  ;;  %v1071_v4 = vpop.f32.mrb[67].mxu1  ;;  %v4455_v36 = vpop.permute.xlu1 %4454  ;;  %7697 = vst [vmem:[#allocation93_spill] sm:$0xff] %v6150_v42 }
 0x16e   : > { %v1990_v8 = vsel %vm1848_vm2, %v1612_v25, %v4447_v33  ;;  %v6145_v45 = vmax.f32 %v1068_v17, 0.0  ;;  %v6148_v60 = vadd.f32 %v1069_v50, %v5307_v34  ;;  %v4460_v37 = vpop.permute.xlu0 %4459  ;;  %v7698_v14 = vmax.f32 %v5317_v40, 0.0  ;;  %v6157_v33 = vpop.f32.mrb[59].mxu0 }
 0x16f   : > { %v2038_v58 = vmax.f32 %v1849_v15, %v7694_v52  ;;  %v7699_v15 = vmax.f32 %v5646_v59, 0.0  ;;  %v1072_v41 = vadd.f32 %v1071_v4, %v5298_v30  ;;  %v4457_v21 = vunpack.i.h.bf16 %v4455_v36  ;;  %7700 = vst [vmem:[#allocation94_spill] sm:$0xff] %v6157_v33 }
 0x170   : > { %7695 = vst [vmem:[#allocation91_spill] sm:$0xff] %v6145_v45  ;;  %7696 = vst [vmem:[#allocation92_spill] sm:$0xff] %v6148_v60  ;;  %v2133_v39 = vmax.f32 %v2039_v44, %v7698_v14  ;;  %v1441_v17 = vrot.slane %v6145_v45, 7  ;;  %v4456_v50 = vunpack.i.l.bf16 %v4455_v36  ;;  %v4462_v25 = vunpack.i.h.bf16 %v4460_v37 }
 0x171   : > { %v2037_v1 = vmax.f32 %v1990_v8, %v7699_v15  ;;  %v7701_v52 = vmax.f32 %v5327_v46, 0.0  ;;  %v6163_v42 = vmax.f32 %v1072_v41, 0.0  ;;  %v4461_v40 = vunpack.i.l.bf16 %v4460_v37  ;;  %v4465_v4 = vpop.permute.xlu1 %4464 }
 0x172   : > { %v7703_v59 = vrot.slane %v6105_v9, 7  ;;  %v1851_v8 = vsel %vm1848_vm2, %v4456_v50, %v4457_v21  ;;  %v4467_v15 = vunpack.i.h.bf16 %v4465_v4  ;;  %v4466_v33 = vunpack.i.l.bf16 %v4465_v4  ;;  %v1075_v0 = vpop.f32.mrb[68].mxu1 }
 0x173   : > { %v2131_v55 = vmax.f32 %v2037_v1, %v7701_v52  ;;  %7702 = vst [vmem:[#allocation95_spill] sm:$0xff] %v6163_v42  ;;  %v7560_v36 = vrot.slane %v6163_v42, 7  ;;  %v7704_v46 = vmax.f32 %v5690_v2, 0.0  ;;  %v1852_v37 = vsel %vm1848_vm2, %v4461_v40, %v4462_v25  ;;  %v1077_v41 = vpop.f32.mrb[69].mxu1  ;;  %v6175_v52 = vpop.f32.mrb[60].mxu0 }
 0x174   : > { %v1440_v44 = vsel %vm1377_vm1, %v1437_v3, %v7703_v59  ;;  %v7705_v3 = vmax.f32 %v5705_v7, 0.0  ;;  %v1079_v21 = vpop.f32.mrb[70].mxu1  ;;  %v4470_v2 = vpop.permute.xlu0 %4469  ;;  %v7708_v4 = vmax.f32 %v5701_v48, 0.0  ;;  %v7709_v7 = vmax.f32 %v6119_v29, 0.0 }
 0x175   : > { %v4673_v14 = vpack.i.bf16 %v1440_v44, %v1438_v27  ;;  %v6169_v24 = vpack.c.bf16 %v2133_v39, %v2131_v55  ;;  %v2042_v1 = vmax.f32 %v1851_v8, %v7704_v46  ;;  %v1992_v27 = vsel %vm1848_vm2, %v4466_v33, %v4456_v50  ;;  %v1081_v50 = vpop.f32.mrb[71].mxu1 }
 0x176   : > { %v2044_v59 = vmax.f32 %v1852_v37, %v7705_v3  ;;  %v1993_v55 = vsel %vm1848_vm2, %v4467_v15, %v4461_v40  ;;  %v6183_v39 = vadd.f32 %v1075_v0, %v5307_v34  ;;  %v7707_v44 = vmax.f32 %v5670_v26, 0.0  ;;  %v6197_v40 = vpop.f32.mrb[61].mxu0  ;;  %v4475_v46 = vpop.permute.xlu1 %4474 }
 0x177   : > { %4674 = vrot.lane.b32.xlu1 %v4673_v14, %s4929_s28  ;;  %v6191_v8 = vmax.f32 %v1993_v55, %v7708_v4  ;;  %v4678_v14 = vpack.i.bf16 %v6145_v45, %v7709_v7  ;;  %v1078_v33 = vadd.f32 %v1077_v41, %v5298_v30  ;;  %v2132_v15 = vmax.f32 %v2038_v58, %v5321_v43  ;;  %v6206_v37 = vpop.f32.mrb[62].mxu0 }
 0x178   : > { %7706 = vst [vmem:[#allocation96_spill] sm:$0xff] %v6183_v39  ;;  %v6187_v25 = vmax.f32 %v1992_v27, %v7707_v44  ;;  %v2134_v26 = vmax.f32 %v6137_v31, %v5332_v49  ;;  %v6204_v48 = vadd.f32 %v1079_v21, %v5307_v34  ;;  %v7712_v41 = vmax.f32 %v6148_v60, 0.0  ;;  %v6214_v43 = vpop.f32.mrb[63].mxu0 }
 0x179   : > { %4679 = vrot.lane.b32.xlu0 %v4678_v14, %s4929_s28  ;;  %v6209_v3 = vmax.f32 %v1078_v33, 0.0  ;;  %v4472_v55 = vunpack.i.h.bf16 %v4470_v2  ;;  %v4471_v44 = vunpack.i.l.bf16 %v4470_v2  ;;  %v1082_v31 = vadd.f32 %v1081_v50, %v5298_v30 }
 0x17a   : > { %7710 = vst [vmem:[#allocation97_spill] sm:$0xff] %v6204_v48  ;;  %v4683_v27 = vpack.i.bf16 %v6163_v42, %v7712_v41  ;;  %v6216_v58 = vpack.c.bf16 %v2134_v26, %v2132_v15  ;;  %v4477_v21 = vunpack.i.h.bf16 %v4475_v46  ;;  %v4476_v14 = vunpack.i.l.bf16 %v4475_v46  ;;  %v4480_v41 = vpop.permute.xlu0 %4479  ;;  %v1085_v46 = vpop.f32.mrb[72].mxu1 }
 0x17b   : > { %7711 = vst [vmem:[#allocation98_spill] sm:$0xff] %v6209_v3  ;;  %v1853_v7 = vsel %vm1848_vm2, %v4471_v44, %v4472_v55  ;;  %v7713_v33 = vrot.slane %v6105_v9, 7  ;;  %v7714_v26 = vmax.f32 %v5718_v57, 0.0  ;;  %v6232_v49 = vmax.f32 %v1082_v31, 0.0  ;;  %v1087_v60 = vpop.f32.mrb[73].mxu1 }
 0x17c   : > { %4684 = vrot.lane.b32.xlu1 %v4683_v27, %s4929_s28  ;;  %v2289_v15 = vshll.u32 %v6216_v58, 16  ;;  %3327 = vmatprep.mubr.bf16.mxu0 %v6216_v58  ;;  %v1444_v27 = vsel %vm1377_vm1, %v1441_v17, %v7560_v36  ;;  %v1854_v55 = vsel %vm1848_vm2, %v4476_v14, %v4477_v21  ;;  %v2136_v4 = vmax.f32 %v2042_v1, %v5363_v6  ;;  %v1089_v36 = vpop.f32.mrb[74].mxu1  ;;  %v6246_v29 = vpop.permute.xlu1 %4484 }
 0x17d   : > { %v1442_v2 = vsel %vm1377_vm1, %v7713_v33, %v1441_v17  ;;  %v6230_v50 = vmax.f32 %v1853_v7, %v7714_v26  ;;  %7715 = vst [vmem:[#allocation99_spill] sm:$0xff] %v6232_v49  ;;  %3328 = vmatmul.mubr.bf16.vlgmr.msra.gmra.mrb[96].mxu0 %v6169_v24  ;;  %v2138_v0 = vmax.f32 %v2044_v59, %v5374_v12  ;;  %v7716_v31 = vmax.f32 %v5732_v63, 0.0  ;;  %v1091_v59 = vpop.f32.mrb[75].mxu1 }
 0x17e   : > { %v4688_v33 = vpack.i.bf16 %v1444_v27, %v1442_v2  ;;  %v4482_v26 = vunpack.i.h.bf16 %v4480_v41  ;;  %v4481_v17 = vunpack.i.l.bf16 %v4480_v41  ;;  %v6252_v6 = vadd.f32 %v1085_v46, %v5307_v34  ;;  %v6258_v2 = vpop.f32.mrb[64].mxu0 }
 0x17f   : > { %v6244_v7 = vmax.f32 %v1854_v55, %v7716_v31  ;;  %v6249_v21 = vpack.c.bf16 %v2138_v0, %v2136_v4  ;;  %v7718_v12 = vmax.f32 %v6183_v39, 0.0  ;;  %v1088_v63 = vadd.f32 %v1087_v60, %v5298_v30  ;;  %v6266_v4 = vpop.f32.mrb[65].mxu0 }
 0x180   : > { %4689 = vrot.lane.b32.xlu0 %v4688_v33, %s4929_s28  ;;  %7717 = vst [vmem:[#allocation100_spill] sm:$0xff] %v6252_v6  ;;  %v1995_v41 = vsel %vm1848_vm2, %v4482_v26, %v4476_v14  ;;  %v1994_v27 = vsel %vm1848_vm2, %v4481_v17, %v4471_v44  ;;  %v6263_v55 = vadd.f32 %v1089_v36, %v5307_v34  ;;  %v4487_v0 = vunpack.i.h.bf16 %v6246_v29  ;;  %v4490_v44 = vpop.permute.xlu0 %4489  ;;  %v6281_v26 = vpop.f32.mrb[66].mxu0 }
 0x181   : > { %v4693_v1 = vpack.i.bf16 %v6209_v3, %v7718_v12  ;;  %3337 = vmatprep.mubr.bf16.mxu0 %v6249_v21  ;;  %v7720_v46 = vmax.f32 %v5714_v28, 0.0  ;;  %v7721_v60 = vmax.f32 %v5722_v10, 0.0  ;;  %v6279_v36 = vmax.f32 %v1088_v63, 0.0  ;;  %v7724_v10 = vld [vmem:[#allocation3_spill] sm:$0xff]  ;;  %v7726_v63 = vld [vmem:[#allocation4_spill] sm:$0xff] }
 0x182   : > { %7719 = vst [vmem:[#allocation101_spill] sm:$0xff] %v6263_v55  ;;  %v4486_v12 = vunpack.i.l.bf16 %v6246_v29  ;;  %v7723_v28 = vmax.f32 %v6204_v48, 0.0  ;;  %v7727_v14 = vmax.f32 %v7726_v63, 0.0  ;;  %v1092_v17 = vadd.f32 %v1091_v59, %v5298_v30 }
 0x183   : > { %v6271_v33 = vmax.f32 %v1994_v27, %v7720_v46  ;;  %v6275_v31 = vmax.f32 %v1995_v41, %v7721_v60  ;;  %4694 = vrot.lane.b32.xlu1 %v4693_v1, %s4929_s28  ;;  %7722 = vst [vmem:[#allocation102_spill] sm:$0xff] %v6279_v36  ;;  %v7725_v41 = vmax.f32 %v7724_v10, 0.0  ;;  %v6291_v60 = vpop.f32.mrb[67].mxu0  ;;  %v2287_v29 = vshrl.u32 %v6216_v58, 16 }
 0x184   : > { %v4698_v27 = vpack.i.bf16 %v6232_v49, %v7723_v28  ;;  %v2137_v57 = vmax.f32 %v6191_v8, %v7727_v14  ;;  %v1855_v48 = vsel %vm1848_vm2, %v4486_v12, %v4487_v0  ;;  %v2291_v28 = vrot.slane %v2289_v15, 1 }
 0x185   : > { %v2135_v46 = vmax.f32 %v6187_v25, %v7725_v41  ;;  %v2294_v10 = vshll.u32 %v6249_v21, 16  ;;  %v4492_v25 = vunpack.i.h.bf16 %v4490_v44  ;;  %v1095_v41 = vpop.f32.mrb[76].mxu1  ;;  %v7728_v39 = vmax.f32 %v5765_v47, 0.0 }
 0x186   : > { %4699 = vrot.lane.b32.xlu0 %v4698_v27, %s4929_s28  ;;  %v6308_v8 = vmax.f32 %v1092_v17, 0.0  ;;  %v4491_v59 = vunpack.i.l.bf16 %v4490_v44  ;;  %v1097_v14 = vpop.f32.mrb[77].mxu1  ;;  %v2292_v58 = vor.u32 %v2291_v28, %v2287_v29  ;;  %v7730_v0 = vrot.slane %v6209_v3, 7  ;;  %v6334_v3 = vpop.f32.mrb[68].mxu0 }
 0x187   : > { %v6304_v1 = vmax.f32 %v1855_v48, %v7728_v39  ;;  %v6306_v63 = vpack.c.bf16 %v2137_v57, %v2135_v46  ;;  %v6310_v45 = vrot.slane %v2294_v10, 1  ;;  %v7731_v15 = vrot.slane %v6163_v42, 7  ;;  %v4495_v48 = vpop.permute.xlu1 %4494  ;;  %v1099_v57 = vpop.f32.mrb[78].mxu1  ;;  %7735 = vst [vmem:[#allocation4_spill] sm:$0xff] %v6334_v3 }
 0x188   : > { %7729 = vst [vmem:[#allocation3_spill] sm:$0xff] %v6308_v8  ;;  %v7732_v9 = vrot.slane %v6232_v49, 7  ;;  %v7733_v47 = vmov %v7730_v0  ;;  %v1856_v46 = vsel %vm1848_vm2, %v4491_v59, %v4492_v25  ;;  %v1101_v28 = vpop.f32.mrb[79].mxu1  ;;  %v7736_v25 = vld [vmem:[#allocation7_spill] sm:$0xff]  ;;  %v4496_v17 = vunpack.i.l.bf16 %v4495_v48 }
 0x189   : > { %v1446_v27 = vsel %vm1377_vm1, %v7731_v15, %v7730_v0  ;;  %v2282_v44 = vshll.u32 %v6306_v63, 16  ;;  %3338 = vmatmul.mubr.bf16.gmra.mrb[100].mxu0 %v6306_v63  ;;  %v2297_v10 = vsel %vm2273_vm3, %v2292_v58, %v6310_v45  ;;  %v7734_v0 = vmax.f32 %v5778_v22, 0.0 }
 0x18a   : > { %v1448_v39 = vsel %vm1377_vm1, %v7733_v47, %v7732_v9  ;;  %v2275_v9 = vshrl.u32 %v6169_v24, 16  ;;  %v2277_v47 = vshll.u32 %v6169_v24, 16  ;;  %2896 = vmatprep.mubr.bf16.mxu1 %v2297_v10  ;;  %v4497_v22 = vunpack.i.h.bf16 %v4495_v48 }
 0x18b   : > { %v4703_v29 = vpack.i.bf16 %v1448_v39, %v1446_v27  ;;  %v6330_v15 = vmax.f32 %v1856_v46, %v7734_v0  ;;  %v6336_v42 = vrot.slane %v2282_v44, 1  ;;  %v2140_v27 = vmax.f32 %v6230_v50, %v7736_v25  ;;  %v7737_v39 = vld [vmem:[#allocation8_spill] sm:$0xff]  ;;  %v6343_v46 = vpop.f32.mrb[69].mxu0 }
 0x18c   : > { %v2142_v58 = vmax.f32 %v6244_v7, %v7737_v39  ;;  %7738 = vst [vmem:[#allocation7_spill] sm:$0xff] %v6343_v46  ;;  %v2279_v0 = vrot.slane %v2277_v47, 1  ;;  %v6346_v24 = vadd.f32 %v1095_v41, %v5307_v34  ;;  %v7740_v44 = vmax.f32 %v6252_v6, 0.0  ;;  %v6351_v3 = vpop.f32.mrb[70].mxu0  ;;  %v6360_v47 = vpop.permute.xlu0 %4499 }
 0x18d   : > { %4704 = vrot.lane.b32.xlu1 %v4703_v29, %s4929_s28  ;;  %7741 = vst [vmem:[#allocation103_spill] sm:$0xff] %v6351_v3  ;;  %v1997_v50 = vsel %vm1848_vm2, %v4497_v22, %v4491_v59  ;;  %v1098_v7 = vadd.f32 %v1097_v14, %v5298_v30  ;;  %v6358_v25 = vadd.f32 %v1099_v57, %v5307_v34  ;;  %v6362_v48 = vpop.f32.mrb[71].mxu0  ;;  %v1105_v59 = vpop.f32.mrb[80].mxu1  ;;  %v7745_v14 = vld [vmem:[#allocation41_spill] sm:$0xff] }
 0x18e   : > { %7739 = vst [vmem:[#allocation8_spill] sm:$0xff] %v6346_v24  ;;  %v4708_v10 = vpack.i.bf16 %v6279_v36, %v7740_v44  ;;  %v6353_v29 = vpack.c.bf16 %v2142_v58, %v2140_v27  ;;  %7743 = vst [vmem:[#allocation105_spill] sm:$0xff] %v6362_v48  ;;  %v2280_v41 = vor.u32 %v2279_v0, %v2275_v9  ;;  %v7744_v44 = vmax.f32 %v5769_v13, 0.0  ;;  %v1107_v0 = vpop.f32.mrb[81].mxu1 }
 0x18f   : > { %7742 = vst [vmem:[#allocation104_spill] sm:$0xff] %v6358_v25  ;;  %v1996_v39 = vsel %vm1848_vm2, %v4496_v17, %v4486_v12  ;;  %v7746_v57 = vmax.f32 %v7745_v14, 0.0  ;;  %v6376_v22 = vmax.f32 %v1098_v7, 0.0  ;;  %v7748_v12 = vmax.f32 %v6263_v55, 0.0  ;;  %v4505_v17 = vpop.permute.xlu1 %4504  ;;  %v7749_v14 = vld [vmem:[#allocation5_spill] sm:$0xff] }
 0x190   : > { %v6367_v6 = vmax.f32 %v1997_v50, %v7744_v44  ;;  %4709 = vrot.lane.b32.xlu0 %v4708_v10, %s4929_s28  ;;  %3347 = vmatprep.mubr.bf16.mxu0 %v6353_v29  ;;  %v2285_v10 = vsel %vm2273_vm3, %v2280_v41, %v6336_v42  ;;  %v4502_v50 = vunpack.i.h.bf16 %v6360_v47  ;;  %v4501_v44 = vunpack.i.l.bf16 %v6360_v47 }
 0x191   : > { %v6374_v58 = vmax.f32 %v1996_v39, %v7746_v57  ;;  %7747 = vst [vmem:[#allocation41_spill] sm:$0xff] %v6376_v22  ;;  %v4713_v13 = vpack.i.bf16 %v6308_v8, %v7748_v12  ;;  %v7750_v39 = vmax.f32 %v7749_v14, 0.0  ;;  %v1109_v57 = vpop.f32.mrb[82].mxu1  ;;  %2897 = vmatmul.mubr.bf16.vlgmr.msra.gmra.mrb[96].mxu1 %v2285_v10  ;;  %v7751_v12 = vld [vmem:[#allocation6_spill] sm:$0xff]  ;;  %v1102_v41 = vadd.f32 %v1101_v28, %v5298_v30  ;;  %v6407_v28 = vpop.f32.mrb[72].mxu0 }
 0x192   : > { %v7752_v27 = vmax.f32 %v7751_v12, 0.0  ;;  %v2306_v48 = vshrl.u32 %v6249_v21, 16  ;;  %v1111_v3 = vpop.f32.mrb[83].mxu1  ;;  %v1857_v47 = vsel %vm1848_vm2, %v4501_v44, %v4502_v50  ;;  %v2310_v14 = vshll.u32 %v6353_v29, 16  ;;  %7755 = vst [vmem:[#allocation6_spill] sm:$0xff] %v6407_v28 }
 0x193   : > { %v2139_v7 = vmax.f32 %v6271_v33, %v7750_v39  ;;  %4714 = vrot.lane.b32.xlu1 %v4713_v13, %s4929_s28  ;;  %v4507_v33 = vunpack.i.h.bf16 %v4505_v17  ;;  %v4506_v39 = vunpack.i.l.bf16 %v4505_v17  ;;  %v7753_v10 = vmax.f32 %v5791_v20, 0.0  ;;  %v6440_v28 = vpop.f32.mrb[84].mxu1 }
 0x194   : > { %v2141_v55 = vmax.f32 %v6275_v31, %v7752_v27  ;;  %v6404_v12 = vmax.f32 %v1102_v41, 0.0  ;;  %v2308_v31 = vor.u32 %v2306_v48, %v6310_v45  ;;  %v6409_v21 = vrot.slane %v2310_v14, 1  ;;  %v4510_v41 = vpop.permute.xlu0 %4509  ;;  %v6422_v45 = vpop.f32.mrb[73].mxu0 }
 0x195   : > { %v6400_v9 = vmax.f32 %v1857_v47, %v7753_v10  ;;  %v1858_v27 = vsel %vm1848_vm2, %v4506_v39, %v4507_v33  ;;  %v7756_v50 = vrot.slane %v6279_v36, 7  ;;  %v7757_v17 = vrot.slane %v6232_v49, 7  ;;  %7760 = vst [vmem:[#allocation106_spill] sm:$0xff] %v6422_v45  ;;  %v7764_v45 = vld [vmem:[#allocation12_spill] sm:$0xff] }
 0x196   : > { %v6402_v13 = vpack.c.bf16 %v2141_v55, %v2139_v7  ;;  %7754 = vst [vmem:[#allocation5_spill] sm:$0xff] %v6404_v12  ;;  %v7758_v47 = vrot.slane %v6308_v8, 7  ;;  %v7761_v14 = vmax.f32 %v5799_v23, 0.0  ;;  %v2313_v36 = vsel %vm2273_vm3, %v2308_v31, %v6409_v21 }
 0x197   : > { %v1450_v20 = vsel %vm1377_vm1, %v7757_v17, %v7756_v50  ;;  %v7759_v55 = vmov %v7756_v50  ;;  %v2298_v50 = vshrl.u32 %v6306_v63, 16  ;;  %v6431_v17 = vpop.f32.mrb[74].mxu0  ;;  %v2146_v48 = vmax.f32 %v6330_v15, %v7764_v45  ;;  %2906 = vmatprep.mubr.bf16.mxu1 %v2313_v36 }
 0x198   : > { %v1452_v7 = vsel %vm1377_vm1, %v7759_v55, %v7758_v47  ;;  %3348 = vmatmul.mubr.bf16.gmra.mrb[104].mxu0 %v6402_v13  ;;  %v6428_v33 = vmax.f32 %v1858_v27, %v7761_v14  ;;  %7762 = vst [vmem:[#allocation107_spill] sm:$0xff] %v6431_v17  ;;  %v2302_v47 = vshll.u32 %v6402_v13, 16  ;;  %v7763_v55 = vld [vmem:[#allocation11_spill] sm:$0xff]  ;;  %v6442_v23 = vpop.f32.mrb[75].mxu0  ;;  %v4512_v27 = vunpack.i.h.bf16 %v4510_v41 }
 0x199   : > { %v4718_v10 = vpack.i.bf16 %v1452_v7, %v1450_v20  ;;  %v2144_v49 = vmax.f32 %v6304_v1, %v7763_v55  ;;  %7765 = vst [vmem:[#allocation11_spill] sm:$0xff] %v6442_v23  ;;  %v2300_v63 = vor.u32 %v2298_v50, %v6336_v42  ;;  %v4511_v20 = vunpack.i.l.bf16 %v4510_v41  ;;  %v6449_v7 = vpop.permute.xlu1 %4514  ;;  %v6451_v1 = vpop.f32.mrb[85].mxu1 }
 0x19a   : > { %v6447_v31 = vadd.f32 %v1105_v59, %v5307_v34  ;;  %v2304_v14 = vrot.slane %v2302_v47, 1  ;;  %v7767_v45 = vmax.f32 %v6346_v24, 0.0  ;;  %v6459_v55 = vpop.f32.mrb[86].mxu1  ;;  %v1999_v42 = vsel %vm1848_vm2, %v4512_v27, %v4506_v39  ;;  %v7771_v24 = vld [vmem:[#allocation46_spill] sm:$0xff]  ;;  %v6500_v17 = vpop.f32.mrb[76].mxu0 }
 0x19b   : > { %4719 = vrot.lane.b32.xlu0 %v4718_v10, %s4929_s28  ;;  %v6453_v15 = vpack.c.bf16 %v2146_v48, %v2144_v49  ;;  %v1108_v10 = vadd.f32 %v1107_v0, %v5298_v30  ;;  %v1998_v59 = vsel %vm1848_vm2, %v4511_v20, %v4501_v44  ;;  %v6465_v50 = vadd.f32 %v1109_v57, %v5307_v34  ;;  %v6467_v47 = vpop.f32.mrb[87].mxu1  ;;  %v7769_v48 = vld [vmem:[#allocation44_spill] sm:$0xff]  ;;  %v4520_v57 = vpop.permute.xlu0 %4519 }
 0x19c   : > { %7766 = vst [vmem:[#allocation12_spill] sm:$0xff] %v6447_v31  ;;  %v4723_v36 = vpack.i.bf16 %v6376_v22, %v7767_v45  ;;  %v2305_v49 = vsel %vm2273_vm3, %v2300_v63, %v2304_v14  ;;  %v7770_v45 = vmax.f32 %v7769_v48, 0.0  ;;  %v7772_v23 = vmax.f32 %v7771_v24, 0.0  ;;  %7779 = vst [vmem:[#allocation46_spill] sm:$0xff] %v6500_v17 }
 0x19d   : > { %7768 = vst [vmem:[#allocation108_spill] sm:$0xff] %v6465_v50  ;;  %3357 = vmatprep.mubr.bf16.mxu0 %v6453_v15  ;;  %v6480_v44 = vmax.f32 %v1108_v10, 0.0  ;;  %2907 = vmatmul.mubr.bf16.gmra.mrb[100].mxu1 %v2305_v49  ;;  %v4517_v63 = vunpack.i.h.bf16 %v6449_v7  ;;  %v4516_v20 = vunpack.i.l.bf16 %v6449_v7  ;;  %v7774_v48 = vmax.f32 %v6358_v25, 0.0  ;;  %v7777_v10 = vld [vmem:[#allocation10_spill] sm:$0xff]  ;;  %v4525_v24 = vpop.permute.xlu1 %4524 }
 0x19e   : > { %v6473_v0 = vmax.f32 %v1998_v59, %v7770_v45  ;;  %v6477_v39 = vmax.f32 %v1999_v42, %v7772_v23  ;;  %4724 = vrot.lane.b32.xlu1 %v4723_v36, %s4929_s28  ;;  %v7775_v23 = vld [vmem:[#allocation9_spill] sm:$0xff]  ;;  %v7778_v45 = vmax.f32 %v7777_v10, 0.0  ;;  %v1112_v27 = vadd.f32 %v1111_v3, %v5298_v30 }
 0x19f   : > { %7773 = vst [vmem:[#allocation44_spill] sm:$0xff] %v6480_v44  ;;  %v4728_v59 = vpack.i.bf16 %v6404_v12, %v7774_v48  ;;  %v7776_v42 = vmax.f32 %v7775_v23, 0.0  ;;  %v1859_v41 = vsel %vm1848_vm2, %v4516_v20, %v4517_v63  ;;  %v2322_v7 = vshrl.u32 %v6353_v29, 16  ;;  %v7780_v23 = vld [vmem:[#allocation49_spill] sm:$0xff]  ;;  %v6510_v63 = vpop.f32.mrb[88].mxu1 }
 0x1a0   : > { %v2145_v49 = vmax.f32 %v6367_v6, %v7778_v45  ;;  %v2326_v48 = vshll.u32 %v6453_v15, 16  ;;  %v4522_v25 = vunpack.i.h.bf16 %v4520_v57  ;;  %v6508_v6 = vmax.f32 %v1112_v27, 0.0 }
 0x1a1   : > { %v2143_v36 = vmax.f32 %v6374_v58, %v7776_v42  ;;  %4729 = vrot.lane.b32.xlu0 %v4728_v59, %s4929_s28  ;;  %v7781_v58 = vmax.f32 %v7780_v23, 0.0  ;;  %v4521_v3 = vunpack.i.l.bf16 %v4520_v57  ;;  %v6512_v59 = vpop.f32.mrb[77].mxu0  ;;  %v2324_v29 = vor.u32 %v2322_v7, %v6409_v21 }
 0x1a2   : > { %v6515_v45 = vrot.slane %v2326_v48, 1  ;;  %v7782_v46 = vrot.slane %v6376_v22, 7  ;;  %v7783_v17 = vrot.slane %v6308_v8, 7  ;;  %v6529_v23 = vpop.f32.mrb[78].mxu0  ;;  %v7788_v8 = vld [vmem:[#allocation15_spill] sm:$0xff] }
 0x1a3   : > { %v6504_v42 = vmax.f32 %v1859_v41, %v7781_v58  ;;  %v6506_v10 = vpack.c.bf16 %v2145_v49, %v2143_v36  ;;  %v7784_v36 = vrot.slane %v6404_v12, 7  ;;  %v6527_v49 = vpop.f32.mrb[89].mxu1  ;;  %7786 = vst [vmem:[#allocation9_spill] sm:$0xff] %v6529_v23  ;;  %v1860_v7 = vsel %vm1848_vm2, %v4521_v3, %v4522_v25  ;;  %v6548_v25 = vpop.f32.mrb[79].mxu0 }
 0x1a4   : > { %v1454_v41 = vsel %vm1377_vm1, %v7783_v17, %v7782_v46  ;;  %v7785_v27 = vmov %v7782_v46  ;;  %v2314_v58 = vshrl.u32 %v6402_v13, 16  ;;  %v6535_v46 = vpop.f32.mrb[90].mxu1  ;;  %v2329_v17 = vsel %vm2273_vm3, %v2324_v29, %v6515_v45  ;;  %7789 = vst [vmem:[#allocation10_spill] sm:$0xff] %v6548_v25  ;;  %v6562_v25 = vpop.permute.xlu0 %4529 }
 0x1a5   : > { %v1456_v57 = vsel %vm1377_vm1, %v7785_v27, %v7784_v36  ;;  %3358 = vmatmul.mubr.bf16.gmra.mrb[108].mxu0 %v6506_v10  ;;  %v7787_v36 = vmax.f32 %v5854_v56, 0.0  ;;  %v2318_v22 = vshll.u32 %v6506_v10, 16  ;;  %v2148_v23 = vmax.f32 %v6400_v9, %v7788_v8  ;;  %v6546_v21 = vpop.f32.mrb[91].mxu1  ;;  %2916 = vmatprep.mubr.bf16.mxu1 %v2329_v17 }
 0x1a6   : > { %v4733_v48 = vpack.i.bf16 %v1456_v57, %v1454_v41  ;;  %v2316_v13 = vor.u32 %v2314_v58, %v2304_v14  ;;  %v7790_v41 = vld [vmem:[#allocation16_spill] sm:$0xff]  ;;  %v4527_v57 = vunpack.i.h.bf16 %v4525_v24  ;;  %v4526_v56 = vunpack.i.l.bf16 %v4525_v24 }
 0x1a7   : > { %v6541_v27 = vmax.f32 %v1860_v7, %v7787_v36  ;;  %v2150_v29 = vmax.f32 %v6428_v33, %v7790_v41  ;;  %v2320_v7 = vrot.slane %v2318_v22, 1  ;;  %v6555_v36 = vadd.f32 %v6440_v28, %v5307_v34 }
 0x1a8   : > { %4734 = vrot.lane.b32.xlu1 %v4733_v48, %s4929_s28  ;;  %v7792_v8 = vmax.f32 %v6447_v31, 0.0  ;;  %v1118_v17 = vadd.f32 %v6451_v1, %v5298_v30  ;;  %v2000_v33 = vsel %vm1848_vm2, %v4526_v56, %v4516_v20  ;;  %v2001_v24 = vsel %vm1848_vm2, %v4527_v57, %v4521_v3  ;;  %v7794_v48 = vld [vmem:[#allocation47_spill] sm:$0xff]  ;;  %v4535_v20 = vpop.permute.xlu1 %4534  ;;  %v6591_v57 = vpop.f32.mrb[92].mxu1 }
 0x1a9   : > { %7791 = vst [vmem:[#allocation49_spill] sm:$0xff] %v6555_v36  ;;  %v6564_v14 = vpack.c.bf16 %v2150_v29, %v2148_v23  ;;  %v6570_v22 = vadd.f32 %v6459_v55, %v5307_v34  ;;  %v2321_v28 = vsel %vm2273_vm3, %v2316_v13, %v2320_v7  ;;  %v7795_v58 = vmax.f32 %v7794_v48, 0.0  ;;  %v6593_v56 = vpop.f32.mrb[80].mxu0 }
 0x1aa   : > { %v4738_v9 = vpack.i.bf16 %v6480_v44, %v7792_v8  ;;  %v7796_v1 = vmax.f32 %v5845_v32, 0.0  ;;  %2917 = vmatmul.mubr.bf16.gmra.mrb[104].mxu1 %v2321_v28  ;;  %v6584_v55 = vmax.f32 %v1118_v17, 0.0  ;;  %v7798_v13 = vmax.f32 %v6465_v50, 0.0  ;;  %7799 = vst [vmem:[#allocation47_spill] sm:$0xff] %v6593_v56  ;;  %v7802_v17 = vld [vmem:[#allocation14_spill] sm:$0xff]  ;;  %v6606_v3 = vpop.f32.mrb[81].mxu0 }
 0x1ab   : > { %7793 = vst [vmem:[#allocation15_spill] sm:$0xff] %v6570_v22  ;;  %v6575_v41 = vmax.f32 %v2000_v33, %v7795_v58  ;;  %3367 = vmatprep.mubr.bf16.mxu0 %v6564_v14  ;;  %v4532_v32 = vunpack.i.h.bf16 %v6562_v25  ;;  %v7800_v33 = vld [vmem:[#allocation13_spill] sm:$0xff]  ;;  %v7803_v48 = vmax.f32 %v7802_v17, 0.0  ;;  %v6617_v31 = vpop.f32.mrb[82].mxu0  ;;  %v7805_v23 = vmax.f32 %v5865_v35, 0.0 }
 0x1ac   : > { %v6579_v8 = vmax.f32 %v2001_v24, %v7796_v1  ;;  %4739 = vrot.lane.b32.xlu0 %v4738_v9, %s4929_s28  ;;  %7797 = vst [vmem:[#allocation16_spill] sm:$0xff] %v6584_v55  ;;  %v4743_v29 = vpack.i.bf16 %v6508_v6, %v7798_v13  ;;  %v4531_v9 = vunpack.i.l.bf16 %v6562_v25  ;;  %v7801_v24 = vmax.f32 %v7800_v33, 0.0  ;;  %v6604_v13 = vpop.f32.mrb[93].mxu1  ;;  %7804 = vst [vmem:[#allocation13_spill] sm:$0xff] %v6606_v3 }
 0x1ad   : > { %v2149_v58 = vmax.f32 %v6477_v39, %v7803_v48  ;;  %v1122_v1 = vadd.f32 %v6467_v47, %v5298_v30  ;;  %v2338_v25 = vshrl.u32 %v6453_v15, 16  ;;  %v2342_v33 = vshll.u32 %v6564_v14, 16 }
 0x1ae   : > { %v2147_v28 = vmax.f32 %v6473_v0, %v7801_v24  ;;  %4744 = vrot.lane.b32.xlu1 %v4743_v29, %s4929_s28  ;;  %v4537_v0 = vunpack.i.h.bf16 %v4535_v20  ;;  %v1139_v24 = vpop.f32.mrb[94].mxu1  ;;  %v1861_v17 = vsel %vm1848_vm2, %v4531_v9, %v4532_v32  ;;  %v4536_v47 = vunpack.i.l.bf16 %v4535_v20 }
 0x1af   : > { %v6615_v48 = vmax.f32 %v1122_v1, 0.0  ;;  %v1140_v50 = vpop.f32.mrb[95].mxu1  ;;  %v6621_v3 = vmax.f32 %v1861_v17, %v7805_v23  ;;  %v2340_v15 = vor.u32 %v2338_v25, %v6515_v45  ;;  %v2344_v29 = vrot.slane %v2342_v33, 1 }
 0x1b0   : > { %v6613_v39 = vpack.c.bf16 %v2149_v58, %v2147_v28  ;;  %v7806_v56 = vrot.slane %v6480_v44, 7  ;;  %v7807_v24 = vrot.slane %v6404_v12, 7  ;;  %v4540_v28 = vpop.permute.xlu0 %4539  ;;  %v6629_v58 = vpop.f32.mrb[83].mxu0  ;;  %v1862_v35 = vsel %vm1848_vm2, %v4536_v47, %v4537_v0  ;;  %v7812_v0 = vld [vmem:[#allocation19_spill] sm:$0xff] }
 0x1b1   : > { %7808 = vst [vmem:[#allocation14_spill] sm:$0xff] %v6629_v58  ;;  %v7809_v23 = vrot.slane %v6508_v6, 7  ;;  %v2330_v1 = vshrl.u32 %v6506_v10, 16  ;;  %v2345_v25 = vsel %vm2273_vm3, %v2340_v15, %v2344_v29  ;;  %v2152_v12 = vmax.f32 %v6504_v42, %v7812_v0  ;;  %v7813_v58 = vld [vmem:[#allocation20_spill] sm:$0xff] }
 0x1b2   : > { %v1458_v32 = vsel %vm1377_vm1, %v7807_v24, %v7806_v56  ;;  %3368 = vmatmul.mubr.bf16.gmra.mrb[112].mxu0 %v6613_v39  ;;  %v7810_v45 = vmov %v7806_v56  ;;  %v7811_v56 = vmax.f32 %v5873_v61, 0.0  ;;  %v2334_v24 = vshll.u32 %v6613_v39, 16  ;;  %2926 = vmatprep.mubr.bf16.mxu1 %v2345_v25 }
 0x1b3   : > { %v1460_v20 = vsel %vm1377_vm1, %v7810_v45, %v7809_v23  ;;  %v2332_v50 = vor.u32 %v2330_v1, %v2320_v7  ;;  %v2154_v44 = vmax.f32 %v6541_v27, %v7813_v58  ;;  %v4542_v23 = vunpack.i.h.bf16 %v4540_v28  ;;  %v6658_v7 = vpop.permute.xlu1 %4544 }
 0x1b4   : > { %v6643_v33 = vmax.f32 %v1862_v35, %v7811_v56  ;;  %v4748_v17 = vpack.i.bf16 %v1460_v20, %v1458_v32  ;;  %v2336_v10 = vrot.slane %v2334_v24, 1  ;;  %v4541_v15 = vunpack.i.l.bf16 %v4540_v28  ;;  %v7817_v20 = vld [vmem:[#allocation54_spill] sm:$0xff] }
 0x1b5   : > { %v6653_v61 = vadd.f32 %v6510_v63, %v5307_v34  ;;  %v7815_v32 = vmax.f32 %v6555_v36, 0.0  ;;  %v6660_v45 = vpack.c.bf16 %v2154_v44, %v2152_v12  ;;  %v2003_v42 = vsel %vm1848_vm2, %v4542_v23, %v4536_v47  ;;  %v6677_v44 = vpop.f32.mrb[84].mxu0  ;;  %v7834_v36 = vld [vmem:[#allocation23_spill] sm:$0xff] }
 0x1b6   : > { %4749 = vrot.lane.b32.xlu0 %v4748_v17, %s4929_s28  ;;  %v1128_v27 = vadd.f32 %v6527_v49, %v5298_v30  ;;  %v6667_v28 = vadd.f32 %v6535_v46, %v5307_v34  ;;  %v2337_v63 = vsel %vm2273_vm3, %v2332_v50, %v2336_v10  ;;  %v2002_v58 = vsel %vm1848_vm2, %v4541_v15, %v4531_v9  ;;  %v7819_v49 = vld [vmem:[#allocation52_spill] sm:$0xff]  ;;  %v4550_v17 = vpop.permute.xlu0 %4549  ;;  %v6688_v24 = vpop.f32.mrb[85].mxu0 }
 0x1b7   : > { %7814 = vst [vmem:[#allocation19_spill] sm:$0xff] %v6653_v61  ;;  %v4753_v35 = vpack.i.bf16 %v6584_v55, %v7815_v32  ;;  %v7818_v1 = vmax.f32 %v7817_v20, 0.0  ;;  %2927 = vmatmul.mubr.bf16.gmra.mrb[108].mxu1 %v2337_v63  ;;  %3377 = vmatprep.mubr.bf16.mxu0 %v6660_v45  ;;  %v7820_v46 = vmax.f32 %v7819_v49, 0.0  ;;  %v4547_v56 = vunpack.i.h.bf16 %v6658_v7  ;;  %v7822_v32 = vld [vmem:[#allocation17_spill] sm:$0xff]  ;;  %v7824_v63 = vld [vmem:[#allocation18_spill] sm:$0xff]  ;;  %v6700_v20 = vpop.f32.mrb[86].mxu0 }
 0x1b8   : > { %7816 = vst [vmem:[#allocation20_spill] sm:$0xff] %v6667_v28  ;;  %v6684_v50 = vmax.f32 %v1128_v27, 0.0  ;;  %v4546_v0 = vunpack.i.l.bf16 %v6658_v7  ;;  %v7821_v23 = vmax.f32 %v6570_v22, 0.0  ;;  %v7825_v27 = vmax.f32 %v7824_v63, 0.0  ;;  %v4555_v63 = vpop.permute.xlu1 %4554 }
 0x1b9   : > { %v6673_v25 = vmax.f32 %v2003_v42, %v7818_v1  ;;  %4754 = vrot.lane.b32.xlu1 %v4753_v35, %s4929_s28  ;;  %v6682_v47 = vmax.f32 %v2002_v58, %v7820_v46  ;;  %v7823_v35 = vmax.f32 %v7822_v32, 0.0  ;;  %v1132_v49 = vadd.f32 %v6546_v21, %v5298_v30 }
 0x1ba   : > { %v4758_v15 = vpack.i.bf16 %v6615_v48, %v7821_v23  ;;  %v2153_v58 = vmax.f32 %v6579_v8, %v7825_v27  ;;  %v2354_v7 = vshrl.u32 %v6564_v14, 16  ;;  %v2358_v46 = vshll.u32 %v6660_v45, 16  ;;  %v6707_v23 = vpop.f32.mrb[87].mxu0  ;;  %v7826_v27 = vld [vmem:[#allocation57_spill] sm:$0xff] }
 0x1bb   : > { %v2151_v42 = vmax.f32 %v6575_v41, %v7823_v35  ;;  %v1863_v32 = vsel %vm1848_vm2, %v4546_v0, %v4547_v56  ;;  %v4552_v8 = vunpack.i.h.bf16 %v4550_v17  ;;  %v4551_v35 = vunpack.i.l.bf16 %v4550_v17 }
 0x1bc   : > { %4759 = vrot.lane.b32.xlu0 %v4758_v15, %s4929_s28  ;;  %v7827_v1 = vmax.f32 %v7826_v27, 0.0  ;;  %v6717_v21 = vmax.f32 %v1132_v49, 0.0  ;;  %v2356_v14 = vor.u32 %v2354_v7, %v2344_v29  ;;  %v2360_v12 = vrot.slane %v2358_v46, 1  ;;  %v6732_v29 = vpop.permute.xlu0 %4559 }
 0x1bd   : > { %v6711_v41 = vpack.c.bf16 %v2153_v58, %v2151_v42  ;;  %v1864_v22 = vsel %vm1848_vm2, %v4551_v35, %v4552_v8  ;;  %v7829_v56 = vrot.slane %v6584_v55, 7  ;;  %v7830_v15 = vrot.slane %v6508_v6, 7 }
 0x1be   : > { %v6715_v9 = vmax.f32 %v1863_v32, %v7827_v1  ;;  %7828 = vst [vmem:[#allocation54_spill] sm:$0xff] %v6717_v21  ;;  %v7831_v17 = vrot.slane %v6615_v48, 7  ;;  %v2346_v49 = vshrl.u32 %v6613_v39, 16  ;;  %v2361_v46 = vsel %vm2273_vm3, %v2356_v14, %v2360_v12  ;;  %v6753_v14 = vpop.f32.mrb[88].mxu0 }
 0x1bf   : > { %3378 = vmatmul.mubr.bf16.gmra.mrb[116].mxu0 %v6711_v41  ;;  %v1462_v42 = vsel %vm1377_vm1, %v7830_v15, %v7829_v56  ;;  %v7832_v58 = vmov %v7829_v56  ;;  %v7833_v32 = vmax.f32 %v5924_v19, 0.0  ;;  %2936 = vmatprep.mubr.bf16.mxu1 %v2361_v46  ;;  %v2350_v15 = vshll.u32 %v6711_v41, 16 }
 0x1c0   : > { %v1464_v1 = vsel %vm1377_vm1, %v7832_v58, %v7831_v17  ;;  %v2348_v56 = vor.u32 %v2346_v49, %v2336_v10  ;;  %v2156_v17 = vmax.f32 %v6621_v3, %v7834_v36  ;;  %v7835_v58 = vld [vmem:[#allocation24_spill] sm:$0xff]  ;;  %v4557_v7 = vunpack.i.h.bf16 %v4555_v63  ;;  %v6762_v49 = vpop.f32.mrb[89].mxu0 }
 0x1c1   : > { %v6738_v8 = vmax.f32 %v1864_v22, %v7833_v32  ;;  %v4763_v27 = vpack.i.bf16 %v1464_v1, %v1462_v42  ;;  %v2158_v39 = vmax.f32 %v6643_v33, %v7835_v58  ;;  %v4556_v55 = vunpack.i.l.bf16 %v4555_v63  ;;  %v4565_v63 = vpop.permute.xlu1 %4564 }
 0x1c2   : > { %v6748_v19 = vadd.f32 %v6591_v57, %v5307_v34  ;;  %v7837_v22 = vmax.f32 %v6653_v61, 0.0  ;;  %v2352_v42 = vrot.slane %v2350_v15, 1  ;;  %v1138_v36 = vadd.f32 %v6604_v13, %v5298_v30  ;;  %v7839_v13 = vld [vmem:[#allocation55_spill] sm:$0xff] }
 0x1c3   : > { %4764 = vrot.lane.b32.xlu1 %v4763_v27, %s4929_s28  ;;  %v6755_v1 = vpack.c.bf16 %v2158_v39, %v2156_v17  ;;  %v7838_v3 = vmax.f32 %v6667_v28, 0.0  ;;  %v2004_v34 = vsel %vm1848_vm2, %v4556_v55, %v4546_v0  ;;  %v2005_v57 = vsel %vm1848_vm2, %v4557_v7, %v4551_v35  ;;  %v6769_v27 = vpop.f32.mrb[90].mxu0  ;;  %v4570_v35 = vpop.permute.xlu0 %4569 }
 0x1c4   : > { %7836 = vst [vmem:[#allocation52_spill] sm:$0xff] %v6748_v19  ;;  %v4768_v10 = vpack.i.bf16 %v6684_v50, %v7837_v22  ;;  %v4562_v32 = vunpack.i.h.bf16 %v6732_v29  ;;  %v2353_v30 = vsel %vm2273_vm3, %v2348_v56, %v2352_v42  ;;  %v7840_v15 = vmax.f32 %v7839_v13, 0.0  ;;  %v6779_v7 = vpop.f32.mrb[91].mxu0  ;;  %v7843_v22 = vld [vmem:[#allocation21_spill] sm:$0xff] }
 0x1c5   : > { %v4773_v33 = vpack.i.bf16 %v6717_v21, %v7838_v3  ;;  %3387 = vmatprep.mubr.bf16.mxu0 %v6755_v1  ;;  %v7841_v58 = vmax.f32 %v5920_v53, 0.0  ;;  %v6777_v0 = vmax.f32 %v1138_v36, 0.0  ;;  %2937 = vmatmul.mubr.bf16.gmra.mrb[112].mxu1 %v2353_v30  ;;  %v4561_v39 = vunpack.i.l.bf16 %v6732_v29  ;;  %v7845_v3 = vld [vmem:[#allocation22_spill] sm:$0xff] }
 0x1c6   : > { %4769 = vrot.lane.b32.xlu0 %v4768_v10, %s4929_s28  ;;  %v2065_v17 = vmax.f32 %v2004_v34, %v7840_v15  ;;  %v7844_v56 = vmax.f32 %v7843_v22, 0.0  ;;  %v7846_v13 = vmax.f32 %v7845_v3, 0.0  ;;  %v2370_v53 = vshrl.u32 %v6660_v45, 16 }
 0x1c7   : > { %v2067_v55 = vmax.f32 %v2005_v57, %v7841_v58  ;;  %7842 = vst [vmem:[#allocation17_spill] sm:$0xff] %v6777_v0  ;;  %4774 = vrot.lane.b32.xlu1 %v4773_v33, %s4929_s28  ;;  %v1469_v36 = vrot.slane %v6777_v0, 7  ;;  %v2374_v57 = vshll.u32 %v6755_v1, 16  ;;  %v4567_v15 = vunpack.i.h.bf16 %v4565_v63  ;;  %v6792_v58 = vpop.permute.xlu1 %4574  ;;  %v4580_v61 = vpop.permute.xlu0 %4579 }
 0x1c8   : > { %v2155_v10 = vmax.f32 %v6682_v47, %v7844_v56  ;;  %v2157_v34 = vmax.f32 %v6673_v25, %v7846_v13  ;;  %v4566_v30 = vunpack.i.l.bf16 %v4565_v63  ;;  %v1865_v29 = vsel %vm1848_vm2, %v4561_v39, %v4562_v32 }
 0x1c9   : > { %v2372_v22 = vor.u32 %v2370_v53, %v2360_v12  ;;  %v7847_v47 = vrot.slane %v6684_v50, 7  ;;  %v7848_v56 = vrot.slane %v6615_v48, 7  ;;  %v7849_v45 = vmax.f32 %v5937_v54, 0.0 }
 0x1ca   : > { %v2237_v33 = vpack.c.bf16 %v2157_v34, %v2155_v10  ;;  %v2376_v13 = vrot.slane %v2374_v57, 1  ;;  %v1866_v46 = vsel %vm1848_vm2, %v4566_v30, %v4567_v15  ;;  %v7850_v63 = vrot.slane %v6717_v21, 7  ;;  %v7854_v15 = vld [vmem:[#allocation28_spill] sm:$0xff] }
 0x1cb   : > { %v1466_v25 = vsel %vm1377_vm1, %v7848_v56, %v7847_v47  ;;  %v2070_v3 = vmax.f32 %v1865_v29, %v7849_v45  ;;  %v7851_v28 = vmov %v7847_v47  ;;  %v7852_v12 = vmax.f32 %v5948_v38, 0.0  ;;  %v7853_v29 = vld [vmem:[#allocation27_spill] sm:$0xff] }
 0x1cc   : > { %v1468_v32 = vsel %vm1377_vm1, %v7851_v28, %v7850_v63  ;;  %3388 = vmatmul.mubr.bf16.gmra.mrb[120].mxu0 %v2237_v33  ;;  %v2362_v53 = vshrl.u32 %v6711_v41, 16  ;;  %v2366_v47 = vshll.u32 %v2237_v33, 16  ;;  %v2377_v54 = vsel %vm2273_vm3, %v2372_v22, %v2376_v13  ;;  %v6820_v63 = vpop.f32.mrb[92].mxu0 }
 0x1cd   : > { %v2072_v10 = vmax.f32 %v1866_v46, %v7852_v12  ;;  %v4778_v34 = vpack.i.bf16 %v1468_v32, %v1466_v25  ;;  %v2160_v57 = vmax.f32 %v6715_v9, %v7853_v29  ;;  %v2162_v56 = vmax.f32 %v6738_v8, %v7854_v15  ;;  %2946 = vmatprep.mubr.bf16.mxu1 %v2377_v54 }
 0x1ce   : > { %v4572_v45 = vunpack.i.h.bf16 %v4570_v35  ;;  %v2364_v28 = vor.u32 %v2362_v53, %v2352_v42  ;;  %v2368_v38 = vrot.slane %v2366_v47, 1  ;;  %v4571_v46 = vunpack.i.l.bf16 %v4570_v35  ;;  %v6829_v42 = vpop.f32.mrb[93].mxu0 }
 0x1cf   : > { %4779 = vrot.lane.b32.xlu0 %v4778_v34, %s4929_s28  ;;  %v7855_v25 = vmax.f32 %v6748_v19, 0.0  ;;  %v6822_v22 = vpack.c.bf16 %v2162_v56, %v2160_v57  ;;  %v7856_v8 = vrot.slane %v6717_v21, 7  ;;  %v4577_v12 = vunpack.i.h.bf16 %v6792_v58  ;;  %v4585_v34 = vpop.permute.xlu1 %4584  ;;  %v868_v29 = vpop.f32.mrb[94].mxu0  ;;  %v7860_v56 = vld [vmem:[#allocation25_spill] sm:$0xff] }
 0x1d0   : > { %v2007_v9 = vsel %vm1848_vm2, %v4572_v45, %v4566_v30  ;;  %v2369_v35 = vsel %vm2273_vm3, %v2364_v28, %v2368_v38  ;;  %v2006_v53 = vsel %vm1848_vm2, %v4571_v46, %v4561_v39  ;;  %v7857_v47 = vmax.f32 %v5944_v18, 0.0  ;;  %v7862_v28 = vld [vmem:[#allocation26_spill] sm:$0xff]  ;;  %v6845_v46 = vpop.permute.xlu0 %4589 }
 0x1d1   : > { %v4783_v41 = vpack.i.bf16 %v6777_v0, %v7855_v25  ;;  %v1470_v32 = vsel %vm1377_vm1, %v7856_v8, %v1469_v36  ;;  %v4576_v30 = vunpack.i.l.bf16 %v6792_v58  ;;  %2947 = vmatmul.mubr.bf16.gmra.mrb[116].mxu1 %v2369_v35  ;;  %3397 = vmatprep.mubr.bf16.mxu0 %v6822_v22  ;;  %v7858_v36 = vld [vmem:[#allocation60_spill] sm:$0xff]  ;;  %v7861_v45 = vmax.f32 %v7860_v56, 0.0 }
 0x1d2   : > { %v2071_v54 = vmax.f32 %v2007_v9, %v7857_v47  ;;  %v7859_v57 = vmax.f32 %v7858_v36, 0.0  ;;  %v7863_v8 = vmax.f32 %v7862_v28, 0.0  ;;  %v2386_v18 = vshrl.u32 %v6755_v1, 16 }
 0x1d3   : > { %4784 = vrot.lane.b32.xlu1 %v4783_v41, %s4929_s28  ;;  %v2159_v25 = vmax.f32 %v2065_v17, %v7861_v45  ;;  %v869_v41 = vpop.f32.mrb[95].mxu0  ;;  %1563 = vrot.lane.b32.xlu0 %v1470_v32, %s4929_s28  ;;  %v1867_v58 = vsel %vm1848_vm2, %v4576_v30, %v4577_v12  ;;  %v2390_v9 = vshll.u32 %v6822_v22, 16  ;;  %v4582_v35 = vunpack.i.h.bf16 %v4580_v61  ;;  %v7866_v45 = vld [vmem:[#allocation31_spill] sm:$0xff]  ;;  %v4595_v21 = vpop.permute.xlu1 %4594 }
 0x1d4   : > { %v2069_v15 = vmax.f32 %v2006_v53, %v7859_v57  ;;  %v2161_v39 = vmax.f32 %v2067_v55, %v7863_v8  ;;  %v4581_v47 = vunpack.i.l.bf16 %v4580_v61  ;;  %v7864_v53 = vld [vmem:[#allocation63_spill] sm:$0xff]  ;;  %v2388_v57 = vor.u32 %v2386_v18, %v2376_v13  ;;  %v7867_v8 = vld [vmem:[#allocation34_spill] sm:$0xff]  ;;  %v7869_v18 = vld [vmem:[#allocation29_spill] sm:$0xff] }
 0x1d5   : > { %v7865_v29 = vmax.f32 %v7864_v53, 0.0  ;;  %v2378_v56 = vshrl.u32 %v2237_v33, 16  ;;  %v2392_v55 = vrot.slane %v2390_v9, 1  ;;  %v2164_v28 = vmax.f32 %v2070_v3, %v7866_v45  ;;  %v7871_v53 = vld [vmem:[#allocation65_spill] sm:$0xff] }
 0x1d6   : > { %v2239_v17 = vpack.c.bf16 %v2161_v39, %v2159_v25  ;;  %v1868_v1 = vsel %vm1848_vm2, %v4581_v47, %v4582_v35  ;;  %v2166_v41 = vmax.f32 %v2072_v10, %v7867_v8  ;;  %v7868_v32 = vmax.f32 %v5992_v11, 0.0  ;;  %v4600_v35 = vpop.permute.xlu0 %4599 }
 0x1d7   : > { %v2074_v36 = vmax.f32 %v1867_v58, %v7865_v29  ;;  %v2380_v19 = vor.u32 %v2378_v56, %v2368_v38  ;;  %v4587_v61 = vunpack.i.h.bf16 %v4585_v34  ;;  %v2393_v58 = vsel %vm2273_vm3, %v2388_v57, %v2392_v55  ;;  %v7873_v56 = vld [vmem:[#allocation30_spill] sm:$0xff] }
 0x1d8   : > { %3398 = vmatmul.mubr.bf16.gmra.mrb[124].mxu0 %v2239_v17  ;;  %v2076_v12 = vmax.f32 %v1868_v1, %v7868_v32  ;;  %v2382_v0 = vshll.u32 %v2239_v17, 16  ;;  %v2242_v25 = vpack.c.bf16 %v2166_v41, %v2164_v28  ;;  %v4586_v13 = vunpack.i.l.bf16 %v4585_v34  ;;  %2956 = vmatprep.mubr.bf16.mxu1 %v2393_v58  ;;  %v6873_v41 = vpop.permute.xlu1 %4604 }
 0x1d9   : > { %v4592_v33 = vunpack.i.h.bf16 %v6845_v46  ;;  %v2009_v3 = vsel %vm1848_vm2, %v4587_v61, %v4581_v47  ;;  %v4591_v10 = vunpack.i.l.bf16 %v6845_v46  ;;  %v7870_v9 = vmax.f32 %v7869_v18, 0.0  ;;  %v7875_v47 = vld [vmem:[#allocation62_spill] sm:$0xff]  ;;  %v7878_v18 = vld [vmem:[#allocation37_spill] sm:$0xff] }
 0x1da   : > { %v2384_v39 = vrot.slane %v2382_v0, 1  ;;  %3407 = vmatprep.mubr.bf16.mxu0 %v2242_v25  ;;  %v2008_v38 = vsel %vm1848_vm2, %v4586_v13, %v4576_v30  ;;  %v7872_v29 = vmax.f32 %v7871_v53, 0.0  ;;  %v7874_v34 = vmax.f32 %v7873_v56, 0.0  ;;  %v7879_v53 = vld [vmem:[#allocation38_spill] sm:$0xff] }
 0x1db   : > { %v2163_v11 = vmax.f32 %v2069_v15, %v7870_v9  ;;  %v2402_v45 = vshrl.u32 %v6822_v22, 16  ;;  %v7876_v28 = vmax.f32 %v7875_v47, 0.0  ;;  %v1869_v8 = vsel %vm1848_vm2, %v4591_v10, %v4592_v33 }
 0x1dc   : > { %v2075_v57 = vmax.f32 %v2009_v3, %v7872_v29  ;;  %v2165_v1 = vmax.f32 %v2071_v54, %v7874_v34  ;;  %v2385_v0 = vsel %vm2273_vm3, %v2380_v19, %v2384_v39  ;;  %v2406_v15 = vshll.u32 %v2242_v25, 16 }
 0x1dd   : > { %v2073_v46 = vmax.f32 %v2008_v38, %v7876_v28  ;;  %2957 = vmatmul.mubr.bf16.gmra.mrb[120].mxu1 %v2385_v0  ;;  %v7877_v30 = vmax.f32 %v6005_v16, 0.0  ;;  %v2404_v58 = vor.u32 %v2402_v45, %v2392_v55  ;;  %v4597_v13 = vunpack.i.h.bf16 %v4595_v21  ;;  %v4610_v55 = vpop.permute.xlu0 %4609  ;;  %v7882_v28 = vld [vmem:[#allocation35_spill] sm:$0xff] }
 0x1de   : > { %v2241_v61 = vpack.c.bf16 %v2165_v1, %v2163_v11  ;;  %v2408_v54 = vrot.slane %v2406_v15, 1  ;;  %v4596_v3 = vunpack.i.l.bf16 %v4595_v21  ;;  %v2394_v22 = vshrl.u32 %v2239_v17, 16  ;;  %v4615_v15 = vpop.permute.xlu1 %4614 }
 0x1df   : > { %v2078_v32 = vmax.f32 %v1869_v8, %v7877_v30  ;;  %v2168_v19 = vmax.f32 %v2074_v36, %v7878_v18  ;;  %v2170_v38 = vmax.f32 %v2076_v12, %v7879_v53  ;;  %v4602_v29 = vunpack.i.h.bf16 %v4600_v35 }
 0x1e0   : > { %v2398_v9 = vshll.u32 %v2241_v61, 16  ;;  %v4601_v33 = vunpack.i.l.bf16 %v4600_v35  ;;  %3408 = vmatmul.mubr.bf16.gmra.mrb[128].mxu0 %v2241_v61  ;;  %v2409_v56 = vsel %vm2273_vm3, %v2404_v58, %v2408_v54  ;;  %v1870_v34 = vsel %vm1848_vm2, %v4596_v3, %v4597_v13 }
 0x1e1   : > { %v2396_v16 = vor.u32 %v2394_v22, %v2384_v39  ;;  %v4607_v11 = vunpack.i.h.bf16 %v6873_v41  ;;  %2966 = vmatprep.mubr.bf16.mxu1 %v2409_v56  ;;  %v7880_v21 = vmax.f32 %v6016_v62, 0.0  ;;  %v2244_v36 = vpack.c.bf16 %v2170_v38, %v2168_v19  ;;  %v7884_v62 = vld [vmem:[#allocation68_spill] sm:$0xff]  ;;  %v7888_v38 = vld [vmem:[#allocation71_spill] sm:$0xff] }
 0x1e2   : > { %v2400_v1 = vrot.slane %v2398_v9, 1  ;;  %v2011_v45 = vsel %vm1848_vm2, %v4602_v29, %v4596_v3  ;;  %v2010_v12 = vsel %vm1848_vm2, %v4601_v33, %v4591_v10  ;;  %v7881_v35 = vmax.f32 %v6012_v51, 0.0  ;;  %v7886_v22 = vld [vmem:[#allocation36_spill] sm:$0xff] }
 0x1e3   : > { %v2080_v17 = vmax.f32 %v1870_v34, %v7880_v21  ;;  %v4606_v47 = vunpack.i.l.bf16 %v6873_v41  ;;  %v7883_v39 = vmax.f32 %v7882_v28, 0.0  ;;  %3417 = vmatprep.mubr.bf16.mxu0 %v2244_v36  ;;  %v7885_v58 = vmax.f32 %v7884_v62, 0.0  ;;  %v4620_v41 = vpop.permute.xlu0 %4619 }
 0x1e4   : > { %v2079_v0 = vmax.f32 %v2011_v45, %v7881_v35  ;;  %v2401_v30 = vsel %vm2273_vm3, %v2396_v16, %v2400_v1  ;;  %v7887_v18 = vmax.f32 %v7886_v22, 0.0  ;;  %v2418_v19 = vshrl.u32 %v2242_v25, 16  ;;  %v7890_v45 = vld [vmem:[#allocation42_spill] sm:$0xff]  ;;  %v7892_v35 = vld [vmem:[#allocation75_spill] sm:$0xff] }
 0x1e5   : > { %v2167_v8 = vmax.f32 %v2073_v46, %v7883_v39  ;;  %v2077_v13 = vmax.f32 %v2010_v12, %v7885_v58  ;;  %v1871_v10 = vsel %vm1848_vm2, %v4606_v47, %v4607_v11  ;;  %v2422_v51 = vshll.u32 %v2244_v36, 16  ;;  %2967 = vmatmul.mubr.bf16.gmra.mrb[124].mxu1 %v2401_v30 }
 0x1e6   : > { %v2169_v3 = vmax.f32 %v2075_v57, %v7887_v18  ;;  %v4612_v9 = vunpack.i.h.bf16 %v4610_v55  ;;  %v4611_v53 = vunpack.i.l.bf16 %v4610_v55  ;;  %v7889_v46 = vmax.f32 %v7888_v38, 0.0  ;;  %v7891_v57 = vld [vmem:[#allocation43_spill] sm:$0xff]  ;;  %v7898_v38 = vld [vmem:[#allocation40_spill] sm:$0xff] }
 0x1e7   : > { %v2420_v56 = vor.u32 %v2418_v19, %v2408_v54  ;;  %v2410_v34 = vshrl.u32 %v2241_v61, 16  ;;  %v2424_v16 = vrot.slane %v2422_v51, 1  ;;  %v2172_v12 = vmax.f32 %v2078_v32, %v7890_v45  ;;  %v7900_v45 = vld [vmem:[#allocation70_spill] sm:$0xff] }
 0x1e8   : > { %v2082_v29 = vmax.f32 %v1871_v10, %v7889_v46  ;;  %v2243_v33 = vpack.c.bf16 %v2169_v3, %v2167_v8  ;;  %v1872_v21 = vsel %vm1848_vm2, %v4611_v53, %v4612_v9  ;;  %v2174_v25 = vmax.f32 %v2080_v17, %v7891_v57  ;;  %v4625_v8 = vpop.permute.xlu1 %4624  ;;  %v7894_v17 = vld [vmem:[#allocation39_spill] sm:$0xff]  ;;  %v7896_v10 = vld [vmem:[#allocation73_spill] sm:$0xff]  ;;  %v7902_v57 = vld [vmem:[#allocation78_spill] sm:$0xff] }
 0x1e9   : > { %v7893_v11 = vmax.f32 %v7892_v35, 0.0  ;;  %v2412_v39 = vor.u32 %v2410_v34, %v2400_v1  ;;  %v4617_v62 = vunpack.i.h.bf16 %v4615_v15  ;;  %v2425_v30 = vsel %vm2273_vm3, %v2420_v56, %v2424_v16  ;;  %v4630_v34 = vpop.permute.xlu0 %4629 }
 0x1ea   : > { %v2414_v55 = vshll.u32 %v2243_v33, 16  ;;  %3418 = vmatmul.mubr.bf16.gmra.mrb[132].mxu0 %v2243_v33  ;;  %v6905_v58 = vpack.c.bf16 %v2174_v25, %v2172_v12  ;;  %v4616_v54 = vunpack.i.l.bf16 %v4615_v15  ;;  %v4622_v61 = vunpack.i.h.bf16 %v4620_v41  ;;  %2976 = vmatprep.mubr.bf16.mxu1 %v2425_v30 }
 0x1eb   : > { %v2084_v28 = vmax.f32 %v1872_v21, %v7893_v11  ;;  %v2013_v32 = vsel %vm1848_vm2, %v4617_v62, %v4611_v53  ;;  %v4621_v18 = vunpack.i.l.bf16 %v4620_v41  ;;  %v7895_v3 = vmax.f32 %v7894_v17, 0.0  ;;  %v7905_v17 = vld [vmem:[#allocation51_spill] sm:$0xff] }
 0x1ec   : > { %v2416_v22 = vrot.slane %v2414_v55, 1  ;;  %3427 = vmatprep.mubr.bf16.mxu0 %v6905_v58  ;;  %v2012_v1 = vsel %vm1848_vm2, %v4616_v54, %v4606_v47  ;;  %v7897_v51 = vmax.f32 %v7896_v10, 0.0  ;;  %v7899_v46 = vmax.f32 %v7898_v38, 0.0  ;;  %v4635_v62 = vpop.permute.xlu1 %4634  ;;  %v7904_v54 = vld [vmem:[#allocation50_spill] sm:$0xff] }
 0x1ed   : > { %v2171_v19 = vmax.f32 %v2077_v13, %v7895_v3  ;;  %v2434_v56 = vshrl.u32 %v2244_v36, 16  ;;  %v7901_v53 = vmax.f32 %v7900_v45, 0.0  ;;  %v1873_v12 = vsel %vm1848_vm2, %v4621_v18, %v4622_v61 }
 0x1ee   : > { %v2083_v9 = vmax.f32 %v2013_v32, %v7897_v51  ;;  %v2173_v15 = vmax.f32 %v2079_v0, %v7899_v46  ;;  %v2417_v21 = vsel %vm2273_vm3, %v2412_v39, %v2416_v22  ;;  %v2438_v13 = vshll.u32 %v6905_v58, 16 }
 0x1ef   : > { %v2081_v41 = vmax.f32 %v2012_v1, %v7901_v53  ;;  %v7903_v25 = vmax.f32 %v7902_v57, 0.0  ;;  %v2436_v11 = vor.u32 %v2434_v56, %v2424_v16  ;;  %v4627_v55 = vunpack.i.h.bf16 %v4625_v8  ;;  %2977 = vmatmul.mubr.bf16.gmra.mrb[128].mxu1 %v2417_v21  ;;  %v7906_v16 = vld [vmem:[#allocation81_spill] sm:$0xff]  ;;  %v4640_v56 = vpop.permute.xlu0 %4639 }
 0x1f0   : > { %v2245_v35 = vpack.c.bf16 %v2173_v15, %v2171_v19  ;;  %v2440_v0 = vrot.slane %v2438_v13, 1  ;;  %v4626_v36 = vunpack.i.l.bf16 %v4625_v8  ;;  %v2426_v30 = vshrl.u32 %v2243_v33, 16  ;;  %v7910_v13 = vld [vmem:[#allocation76_spill] sm:$0xff] }
 0x1f1   : > { %v2086_v47 = vmax.f32 %v1873_v12, %v7903_v25  ;;  %v2176_v39 = vmax.f32 %v2082_v29, %v7904_v54  ;;  %v2178_v3 = vmax.f32 %v2084_v28, %v7905_v17  ;;  %v4632_v1 = vunpack.i.h.bf16 %v4630_v34  ;;  %v4645_v17 = vpop.permute.xlu1 %4644 }
 0x1f2   : > { %v2430_v32 = vshll.u32 %v2245_v35, 16  ;;  %v4631_v61 = vunpack.i.l.bf16 %v4630_v34  ;;  %v2441_v10 = vsel %vm2273_vm3, %v2436_v11, %v2440_v0  ;;  %v1874_v51 = vsel %vm1848_vm2, %v4626_v36, %v4627_v55  ;;  %3428 = vmatmul.mubr.bf16.gmra.mrb[136].mxu0 %v2245_v35  ;;  %v7908_v34 = vld [vmem:[#allocation79_spill] sm:$0xff]  ;;  %v7912_v11 = vld [vmem:[#allocation45_spill] sm:$0xff] }
 0x1f3   : > { %v2428_v38 = vor.u32 %v2426_v30, %v2416_v22  ;;  %v4637_v19 = vunpack.i.h.bf16 %v4635_v62  ;;  %2986 = vmatprep.mubr.bf16.mxu1 %v2441_v10  ;;  %v7907_v46 = vmax.f32 %v7906_v16, 0.0  ;;  %v6929_v33 = vpack.c.bf16 %v2178_v3, %v2176_v39  ;;  %v7916_v3 = vld [vmem:[#allocation84_spill] sm:$0xff] }
 0x1f4   : > { %v2432_v8 = vrot.slane %v2430_v32, 1  ;;  %v2015_v29 = vsel %vm1848_vm2, %v4632_v1, %v4626_v36  ;;  %v2014_v28 = vsel %vm1848_vm2, %v4631_v61, %v4621_v18  ;;  %v7909_v21 = vmax.f32 %v7908_v34, 0.0  ;;  %v7914_v36 = vld [vmem:[#allocation48_spill] sm:$0xff] }
 0x1f5   : > { %v2088_v15 = vmax.f32 %v1874_v51, %v7907_v46  ;;  %v4636_v53 = vunpack.i.l.bf16 %v4635_v62  ;;  %v1251_v22 = vmax.f32 %v6114_v5, 0.0  ;;  %3437 = vmatprep.mubr.bf16.mxu0 %v6929_v33  ;;  %v7911_v57 = vmax.f32 %v7910_v13, 0.0  ;;  %v7918_v46 = vld [vmem:[#allocation58_spill] sm:$0xff]  ;;  %v4650_v13 = vpop.permute.xlu0 %4649 }
 0x1f6   : > { %v2087_v45 = vmax.f32 %v2015_v29, %v7909_v21  ;;  %v2433_v12 = vsel %vm2273_vm3, %v2428_v38, %v2432_v8  ;;  %v7913_v55 = vmax.f32 %v7912_v11, 0.0  ;;  %v7915_v54 = vmax.f32 %v7914_v36, 0.0  ;;  %v7919_v29 = vld [vmem:[#allocation59_spill] sm:$0xff]  ;;  %v7923_v36 = vld [vmem:[#allocation90_spill] sm:$0xff] }
 0x1f7   : > { %v2085_v25 = vmax.f32 %v2014_v28, %v7911_v57  ;;  %v1875_v18 = vsel %vm1848_vm2, %v4636_v53, %v4637_v19  ;;  %v2450_v32 = vshrl.u32 %v6905_v58, 16  ;;  %v2454_v62 = vshll.u32 %v6929_v33, 16  ;;  %2987 = vmatmul.mubr.bf16.gmra.mrb[132].mxu1 %v2433_v12  ;;  %v7921_v12 = vld [vmem:[#allocation89_spill] sm:$0xff] }
 0x1f8   : > { %v2175_v30 = vmax.f32 %v2081_v41, %v7913_v55  ;;  %v2177_v39 = vmax.f32 %v2083_v9, %v7915_v54  ;;  %v4642_v5 = vunpack.i.h.bf16 %v4640_v56  ;;  %v7917_v1 = vmax.f32 %v7916_v3, 0.0 }
 0x1f9   : > { %v4641_v51 = vunpack.i.l.bf16 %v4640_v56  ;;  %v2442_v38 = vshrl.u32 %v2245_v35, 16  ;;  %v2452_v41 = vor.u32 %v2450_v32, %v2440_v0  ;;  %v2456_v16 = vrot.slane %v2454_v62, 1  ;;  %v7926_v32 = vld [vmem:[#allocation93_spill] sm:$0xff] }
 0x1fa   : > { %v6949_v61 = vmax.f32 %v1875_v18, %v7917_v1  ;;  %v2247_v10 = vpack.c.bf16 %v2177_v39, %v2175_v30  ;;  %v2180_v9 = vmax.f32 %v2086_v47, %v7918_v46  ;;  %v2182_v19 = vmax.f32 %v2088_v15, %v7919_v29  ;;  %v7920_v47 = vld [vmem:[#allocation32_spill] sm:$0xff]  ;;  %v7922_v30 = vld [vmem:[#allocation33_spill] sm:$0xff]  ;;  %v7924_v39 = vld [vmem:[#allocation86_spill] sm:$0xff] }
 0x1fb   : > { %v1876_v58 = vsel %vm1848_vm2, %v4641_v51, %v4642_v5  ;;  %v2444_v28 = vor.u32 %v2442_v38, %v2432_v8  ;;  %v4647_v21 = vunpack.i.h.bf16 %v4645_v17  ;;  %v2457_v57 = vsel %vm2273_vm3, %v2452_v41, %v2456_v16  ;;  %v7927_v1 = vld [vmem:[#allocation82_spill] sm:$0xff] }
 0x1fc   : > { %v2446_v34 = vshll.u32 %v2247_v10, 16  ;;  %v2092_v11 = vmax.f32 %v1876_v58, %v1251_v22  ;;  %v6955_v55 = vpack.c.bf16 %v2182_v19, %v2180_v9  ;;  %v4646_v56 = vunpack.i.l.bf16 %v4645_v17  ;;  %3438 = vmatmul.mubr.bf16.gmra.mrb[140].mxu0 %v2247_v10  ;;  %2996 = vmatprep.mubr.bf16.mxu1 %v2457_v57  ;;  %v4655_v17 = vpop.permute.xlu1 %4654  ;;  %v7929_v19 = vld [vmem:[#allocation94_spill] sm:$0xff]  ;;  %v7930_v58 = vld [vmem:[#allocation53_spill] sm:$0xff]  ;;  %v7932_v57 = vld [vmem:[#allocation56_spill] sm:$0xff] }
 0x1fd   : > { %v2017_v0 = vsel %vm1848_vm2, %v4647_v21, %v4641_v51  ;;  %v775_v15 = vadd.f32 %v7921_v12, %v7920_v47  ;;  %v777_v8 = vadd.f32 %v7923_v36, %v7922_v30  ;;  %v7925_v22 = vmax.f32 %v7924_v39, 0.0  ;;  %v4660_v39 = vpop.permute.xlu0 %4659 }
 0x1fe   : > { %v2448_v35 = vrot.slane %v2446_v34, 1  ;;  %3447 = vmatprep.mubr.bf16.mxu0 %v6955_v55  ;;  %v2016_v54 = vsel %vm1848_vm2, %v4646_v56, %v4636_v53  ;;  %v779_v62 = vadd.f32 %v7926_v32, %v7920_v47  ;;  %v4652_v5 = vunpack.i.h.bf16 %v4650_v13 }
 0x1ff   : > { %v2091_v18 = vmax.f32 %v2017_v0, %v7925_v22  ;;  %v7928_v51 = vmax.f32 %v7927_v1, 0.0  ;;  %v1254_v41 = vmax.f32 %v775_v15, 0.0  ;;  %v1255_v46 = vmax.f32 %v777_v8, 0.0 }
 0x200   : > { %v2449_v3 = vsel %vm2273_vm3, %v2444_v28, %v2448_v35  ;;  %v1258_v9 = vmax.f32 %v779_v62, 0.0  ;;  %v4651_v29 = vunpack.i.l.bf16 %v4650_v13  ;;  %v781_v53 = vadd.f32 %v7929_v19, %v7922_v30  ;;  %v7935_v19 = vld [vmem:[#allocation67_spill] sm:$0xff] }
 0x201   : > { %v2089_v38 = vmax.f32 %v2016_v54, %v7928_v51  ;;  %v7931_v34 = vmax.f32 %v7930_v58, 0.0  ;;  %v7933_v56 = vmax.f32 %v7932_v57, 0.0  ;;  %v2466_v12 = vshrl.u32 %v6929_v33, 16  ;;  %2997 = vmatmul.mubr.bf16.gmra.mrb[136].mxu1 %v2449_v3  ;;  %v7934_v51 = vld [vmem:[#allocation66_spill] sm:$0xff]  ;;  %v4665_v3 = vpop.permute.xlu1 %4664 }
 0x202   : > { %v2470_v28 = vshll.u32 %v6955_v55, 16  ;;  %v4657_v36 = vunpack.i.h.bf16 %v4655_v17  ;;  %v1877_v15 = vsel %vm1848_vm2, %v4651_v29, %v4652_v5  ;;  %v1259_v8 = vmax.f32 %v781_v53, 0.0 }
 0x203   : > { %v2179_v21 = vmax.f32 %v2085_v25, %v7931_v34  ;;  %v2181_v0 = vmax.f32 %v2087_v45, %v7933_v56  ;;  %v4656_v54 = vunpack.i.l.bf16 %v4655_v17  ;;  %v2458_v13 = vshrl.u32 %v2247_v10, 16 }
 0x204   : > { %v6980_v22 = vmax.f32 %v1877_v15, %v1255_v46  ;;  %v2468_v62 = vor.u32 %v2466_v12, %v2456_v16  ;;  %v2472_v25 = vrot.slane %v2470_v28, 1  ;;  %v2184_v33 = vmax.f32 %v6949_v61, %v7934_v51 }
 0x205   : > { %v2249_v32 = vpack.c.bf16 %v2181_v0, %v2179_v21  ;;  %v1878_v1 = vsel %vm1848_vm2, %v4656_v54, %v4657_v36  ;;  %v2460_v45 = vor.u32 %v2458_v13, %v2448_v35  ;;  %v2186_v58 = vmax.f32 %v2092_v11, %v7935_v19  ;;  %v4670_v36 = vpop.permute.xlu0 %4669  ;;  %v7936_v13 = vld [vmem:[#allocation61_spill] sm:$0xff]  ;;  %v4675_v19 = vpop.permute.xlu1 %4674 }
 0x206   : > { %v2473_v5 = vsel %vm2273_vm3, %v2468_v62, %v2472_v25  ;;  %v2096_v17 = vmax.f32 %v1878_v1, %v1259_v8  ;;  %v4662_v53 = vunpack.i.h.bf16 %v4660_v39  ;;  %v4661_v16 = vunpack.i.l.bf16 %v4660_v39  ;;  %v7938_v62 = vld [vmem:[#allocation64_spill] sm:$0xff] }
 0x207   : > { %3448 = vmatmul.mubr.bf16.gmra.mrb[144].mxu0 %v2249_v32  ;;  %v2462_v10 = vshll.u32 %v2249_v32, 16  ;;  %3006 = vmatprep.mubr.bf16.mxu1 %v2473_v5  ;;  %v6987_v46 = vpack.c.bf16 %v2186_v58, %v2184_v33  ;;  %v785_v34 = vadd.f32 %v6175_v52, %v7920_v47  ;;  %v787_v35 = vadd.f32 %v6197_v40, %v7922_v30 }
 0x208   : > { %v2019_v11 = vsel %vm1848_vm2, %v4662_v53, %v4656_v54  ;;  %v789_v21 = vadd.f32 %v6206_v37, %v7920_v47  ;;  %v4667_v57 = vunpack.i.h.bf16 %v4665_v3  ;;  %v2018_v56 = vsel %vm1848_vm2, %v4661_v16, %v4651_v29  ;;  %v7940_v16 = vld [vmem:[#allocation74_spill] sm:$0xff] }
 0x209   : > { %v2464_v61 = vrot.slane %v2462_v10, 1  ;;  %3457 = vmatprep.mubr.bf16.mxu0 %v6987_v46  ;;  %v2095_v0 = vmax.f32 %v2019_v11, %v1258_v9  ;;  %v1262_v12 = vmax.f32 %v785_v34, 0.0  ;;  %v1263_v28 = vmax.f32 %v787_v35, 0.0  ;;  %v7941_v35 = vld [vmem:[#allocation77_spill] sm:$0xff] }
 0x20a   : > { %v2093_v15 = vmax.f32 %v2018_v56, %v1254_v41  ;;  %v1266_v8 = vmax.f32 %v789_v21, 0.0  ;;  %v4666_v40 = vunpack.i.l.bf16 %v4665_v3  ;;  %v791_v54 = vadd.f32 %v6214_v43, %v7922_v30 }
 0x20b   : > { %v2465_v52 = vsel %vm2273_vm3, %v2460_v45, %v2464_v61  ;;  %v7937_v37 = vmax.f32 %v7936_v13, 0.0  ;;  %v7939_v1 = vmax.f32 %v7938_v62, 0.0  ;;  %v2482_v9 = vshrl.u32 %v6955_v55, 16 }
 0x20c   : > { %3007 = vmatmul.mubr.bf16.gmra.mrb[140].mxu1 %v2465_v52  ;;  %v1879_v29 = vsel %vm1848_vm2, %v4666_v40, %v4667_v57  ;;  %v2486_v33 = vshll.u32 %v6987_v46, 16  ;;  %v4672_v45 = vunpack.i.h.bf16 %v4670_v36  ;;  %v4671_v41 = vunpack.i.l.bf16 %v4670_v36  ;;  %v4680_v36 = vpop.permute.xlu0 %4679 }
 0x20d   : > { %v2183_v39 = vmax.f32 %v2089_v38, %v7937_v37  ;;  %v2185_v51 = vmax.f32 %v2091_v18, %v7939_v1  ;;  %v7008_v58 = vmax.f32 %v1879_v29, %v1263_v28  ;;  %v1267_v3 = vmax.f32 %v791_v54, 0.0 }
 0x20e   : > { %v2484_v43 = vor.u32 %v2482_v9, %v2472_v25  ;;  %v2488_v10 = vrot.slane %v2486_v33, 1  ;;  %v1880_v38 = vsel %vm1848_vm2, %v4671_v41, %v4672_v45  ;;  %v2474_v53 = vshrl.u32 %v2249_v32, 16  ;;  %v7944_v45 = vld [vmem:[#allocation72_spill] sm:$0xff] }
 0x20f   : > { %v2251_v5 = vpack.c.bf16 %v2185_v51, %v2183_v39  ;;  %v2188_v18 = vmax.f32 %v6980_v22, %v7940_v16  ;;  %v2100_v55 = vmax.f32 %v1880_v38, %v1267_v3  ;;  %v2190_v11 = vmax.f32 %v2096_v17, %v7941_v35  ;;  %v4685_v39 = vpop.permute.xlu1 %4684 }
 0x210   : > { %v4677_v21 = vunpack.i.h.bf16 %v4675_v19  ;;  %v2489_v57 = vsel %vm2273_vm3, %v2484_v43, %v2488_v10  ;;  %v2476_v56 = vor.u32 %v2474_v53, %v2464_v61  ;;  %v4676_v28 = vunpack.i.l.bf16 %v4675_v19 }
 0x211   : > { %3458 = vmatmul.mubr.bf16.gmra.mrb[148].mxu0 %v2251_v5  ;;  %v2478_v34 = vshll.u32 %v2251_v5, 16  ;;  %v795_v25 = vadd.f32 %v6258_v2, %v7920_v47  ;;  %3016 = vmatprep.mubr.bf16.mxu1 %v2489_v57  ;;  %v7017_v32 = vpack.c.bf16 %v2190_v11, %v2188_v18  ;;  %v797_v54 = vadd.f32 %v6266_v4, %v7922_v30  ;;  %v4690_v18 = vpop.permute.xlu0 %4689  ;;  %v7947_v57 = vld [vmem:[#allocation87_spill] sm:$0xff] }
 0x212   : > { %v2021_v22 = vsel %vm1848_vm2, %v4677_v21, %v4671_v41  ;;  %v2020_v17 = vsel %vm1848_vm2, %v4676_v28, %v4666_v40  ;;  %v799_v61 = vadd.f32 %v6281_v26, %v7920_v47  ;;  %v4682_v51 = vunpack.i.h.bf16 %v4680_v36  ;;  %v7942_v40 = vld [vmem:[#allocation69_spill] sm:$0xff] }
 0x213   : > { %v2480_v52 = vrot.slane %v2478_v34, 1  ;;  %v2099_v13 = vmax.f32 %v2021_v22, %v1266_v8  ;;  %v1270_v37 = vmax.f32 %v795_v25, 0.0  ;;  %3467 = vmatprep.mubr.bf16.mxu0 %v7017_v32  ;;  %v2097_v62 = vmax.f32 %v2020_v17, %v1262_v12  ;;  %v4695_v28 = vpop.permute.xlu1 %4694  ;;  %v7948_v17 = vld [vmem:[#allocation4_spill] sm:$0xff] }
 0x214   : > { %v1271_v1 = vmax.f32 %v797_v54, 0.0  ;;  %v1274_v9 = vmax.f32 %v799_v61, 0.0  ;;  %v4681_v29 = vunpack.i.l.bf16 %v4680_v36  ;;  %v801_v4 = vadd.f32 %v6291_v60, %v7922_v30 }
 0x215   : > { %v2481_v2 = vsel %vm2273_vm3, %v2476_v56, %v2480_v52  ;;  %v7943_v8 = vmax.f32 %v7942_v40, 0.0  ;;  %v7945_v41 = vmax.f32 %v7944_v45, 0.0  ;;  %v2498_v19 = vshrl.u32 %v6987_v46, 16  ;;  %v4700_v45 = vpop.permute.xlu0 %4699 }
 0x216   : > { %3017 = vmatmul.mubr.bf16.gmra.mrb[144].mxu1 %v2481_v2  ;;  %v2502_v3 = vshll.u32 %v7017_v32, 16  ;;  %v4687_v43 = vunpack.i.h.bf16 %v4685_v39  ;;  %v1881_v12 = vsel %vm1848_vm2, %v4681_v29, %v4682_v51  ;;  %v1275_v38 = vmax.f32 %v801_v4, 0.0  ;;  %v7950_v2 = vld [vmem:[#allocation103_spill] sm:$0xff] }
 0x217   : > { %v2187_v33 = vmax.f32 %v2093_v15, %v7943_v8  ;;  %v2189_v26 = vmax.f32 %v2095_v0, %v7945_v41  ;;  %v4686_v53 = vunpack.i.l.bf16 %v4685_v39  ;;  %v2490_v16 = vshrl.u32 %v2251_v5, 16  ;;  %v7946_v0 = vld [vmem:[#allocation85_spill] sm:$0xff] }
 0x218   : > { %v7036_v34 = vmax.f32 %v1881_v12, %v1271_v1  ;;  %v2500_v35 = vor.u32 %v2498_v19, %v2488_v10  ;;  %v2504_v11 = vrot.slane %v2502_v3, 1  ;;  %v2192_v46 = vmax.f32 %v7008_v58, %v7946_v0 }
 0x219   : > { %v2253_v60 = vpack.c.bf16 %v2189_v26, %v2187_v33  ;;  %v1882_v15 = vsel %vm1848_vm2, %v4686_v53, %v4687_v43  ;;  %v2492_v21 = vor.u32 %v2490_v16, %v2480_v52  ;;  %v2194_v56 = vmax.f32 %v2100_v55, %v7947_v57  ;;  %v7949_v52 = vld [vmem:[#allocation7_spill] sm:$0xff]  ;;  %v7951_v43 = vld [vmem:[#allocation105_spill] sm:$0xff] }
 0x21a   : > { %v2505_v25 = vsel %vm2273_vm3, %v2500_v35, %v2504_v11  ;;  %v2104_v36 = vmax.f32 %v1882_v15, %v1275_v38  ;;  %v4692_v22 = vunpack.i.h.bf16 %v4690_v18  ;;  %v4691_v10 = vunpack.i.l.bf16 %v4690_v18  ;;  %v7952_v38 = vld [vmem:[#allocation80_spill] sm:$0xff]  ;;  %v7954_v18 = vld [vmem:[#allocation83_spill] sm:$0xff] }
 0x21b   : > { %3468 = vmatmul.mubr.bf16.gmra.mrb[152].mxu0 %v2253_v60  ;;  %v2494_v5 = vshll.u32 %v2253_v60, 16  ;;  %3026 = vmatprep.mubr.bf16.mxu1 %v2505_v25  ;;  %v7043_v54 = vpack.c.bf16 %v2194_v56, %v2192_v46  ;;  %v805_v61 = vadd.f32 %v7948_v17, %v7920_v47  ;;  %v807_v39 = vadd.f32 %v7949_v52, %v7922_v30  ;;  %v4705_v46 = vpop.permute.xlu1 %4704 }
 0x21c   : > { %v2023_v55 = vsel %vm1848_vm2, %v4692_v22, %v4686_v53  ;;  %v809_v1 = vadd.f32 %v7950_v2, %v7920_v47  ;;  %v4697_v51 = vunpack.i.h.bf16 %v4695_v28  ;;  %v2022_v4 = vsel %vm1848_vm2, %v4691_v10, %v4681_v29  ;;  %v7956_v10 = vld [vmem:[#allocation91_spill] sm:$0xff] }
 0x21d   : > { %v2496_v58 = vrot.slane %v2494_v5, 1  ;;  %3477 = vmatprep.mubr.bf16.mxu0 %v7043_v54  ;;  %v2103_v40 = vmax.f32 %v2023_v55, %v1274_v9  ;;  %v1278_v8 = vmax.f32 %v805_v61, 0.0  ;;  %v1279_v33 = vmax.f32 %v807_v39, 0.0  ;;  %v7957_v61 = vld [vmem:[#allocation95_spill] sm:$0xff] }
 0x21e   : > { %v2101_v26 = vmax.f32 %v2022_v4, %v1270_v37  ;;  %v1282_v19 = vmax.f32 %v809_v1, 0.0  ;;  %v4696_v3 = vunpack.i.l.bf16 %v4695_v28  ;;  %v811_v12 = vadd.f32 %v7951_v43, %v7922_v30  ;;  %v4710_v4 = vpop.permute.xlu0 %4709 }
 0x21f   : > { %v2497_v41 = vsel %vm2273_vm3, %v2492_v21, %v2496_v58  ;;  %v7953_v53 = vmax.f32 %v7952_v38, 0.0  ;;  %v7955_v35 = vmax.f32 %v7954_v18, 0.0  ;;  %v2514_v9 = vshrl.u32 %v7017_v32, 16 }
 0x220   : > { %3027 = vmatmul.mubr.bf16.gmra.mrb[148].mxu1 %v2497_v41  ;;  %v1883_v29 = vsel %vm1848_vm2, %v4696_v3, %v4697_v51  ;;  %v2518_v0 = vshll.u32 %v7043_v54, 16  ;;  %v4702_v21 = vunpack.i.h.bf16 %v4700_v45  ;;  %v4701_v37 = vunpack.i.l.bf16 %v4700_v45  ;;  %v7958_v51 = vld [vmem:[#allocation6_spill] sm:$0xff] }
 0x221   : > { %v2191_v16 = vmax.f32 %v2097_v62, %v7953_v53  ;;  %v2193_v15 = vmax.f32 %v2099_v13, %v7955_v35  ;;  %v7064_v57 = vmax.f32 %v1883_v29, %v1279_v33  ;;  %v1283_v56 = vmax.f32 %v811_v12, 0.0  ;;  %v7959_v45 = vld [vmem:[#allocation106_spill] sm:$0xff]  ;;  %v4715_v53 = vpop.permute.xlu1 %4714 }
 0x222   : > { %v2516_v25 = vor.u32 %v2514_v9, %v2504_v11  ;;  %v2520_v5 = vrot.slane %v2518_v0, 1  ;;  %v1884_v62 = vsel %vm1848_vm2, %v4701_v37, %v4702_v21  ;;  %v2506_v22 = vshrl.u32 %v2253_v60, 16  ;;  %v7961_v0 = vld [vmem:[#allocation11_spill] sm:$0xff] }
 0x223   : > { %v2255_v28 = vpack.c.bf16 %v2193_v15, %v2191_v16  ;;  %v2196_v13 = vmax.f32 %v7036_v34, %v7956_v10  ;;  %v2108_v32 = vmax.f32 %v1884_v62, %v1283_v56  ;;  %v2198_v52 = vmax.f32 %v2104_v36, %v7957_v61 }
 0x224   : > { %v4707_v39 = vunpack.i.h.bf16 %v4705_v46  ;;  %v2521_v55 = vsel %vm2273_vm3, %v2516_v25, %v2520_v5  ;;  %v2508_v2 = vor.u32 %v2506_v22, %v2496_v58  ;;  %v4706_v1 = vunpack.i.l.bf16 %v4705_v46  ;;  %v7960_v58 = vld [vmem:[#allocation107_spill] sm:$0xff]  ;;  %v7964_v46 = vld [vmem:[#allocation92_spill] sm:$0xff] }
 0x225   : > { %3478 = vmatmul.mubr.bf16.gmra.mrb[156].mxu0 %v2255_v28  ;;  %v2510_v17 = vshll.u32 %v2255_v28, 16  ;;  %v815_v11 = vadd.f32 %v7958_v51, %v7920_v47  ;;  %3036 = vmatprep.mubr.bf16.mxu1 %v2521_v55  ;;  %v7073_v60 = vpack.c.bf16 %v2198_v52, %v2196_v13  ;;  %v817_v41 = vadd.f32 %v7959_v45, %v7922_v30  ;;  %v4720_v52 = vpop.permute.xlu0 %4719 }
 0x226   : > { %v2025_v34 = vsel %vm1848_vm2, %v4707_v39, %v4701_v37  ;;  %v2024_v36 = vsel %vm1848_vm2, %v4706_v1, %v4696_v3  ;;  %v819_v38 = vadd.f32 %v7960_v58, %v7920_v47  ;;  %v4712_v15 = vunpack.i.h.bf16 %v4710_v4  ;;  %v7962_v3 = vld [vmem:[#allocation88_spill] sm:$0xff] }
 0x227   : > { %v2512_v33 = vrot.slane %v2510_v17, 1  ;;  %v2107_v43 = vmax.f32 %v2025_v34, %v1282_v19  ;;  %v1286_v12 = vmax.f32 %v815_v11, 0.0  ;;  %3487 = vmatprep.mubr.bf16.mxu0 %v7073_v60  ;;  %v2105_v18 = vmax.f32 %v2024_v36, %v1278_v8  ;;  %v7967_v11 = vld [vmem:[#allocation99_spill] sm:$0xff]  ;;  %v4725_v34 = vpop.permute.xlu1 %4724 }
 0x228   : > { %v1287_v35 = vmax.f32 %v817_v41, 0.0  ;;  %v1290_v9 = vmax.f32 %v819_v38, 0.0  ;;  %v4711_v29 = vunpack.i.l.bf16 %v4710_v4  ;;  %v821_v21 = vadd.f32 %v7961_v0, %v7922_v30  ;;  %v7968_v38 = vld [vmem:[#allocation46_spill] sm:$0xff] }
 0x229   : > { %v2513_v16 = vsel %vm2273_vm3, %v2508_v2, %v2512_v33  ;;  %v7963_v19 = vmax.f32 %v7962_v3, 0.0  ;;  %v7965_v56 = vmax.f32 %v7964_v46, 0.0  ;;  %v2530_v62 = vshrl.u32 %v7043_v54, 16 }
 0x22a   : > { %3037 = vmatmul.mubr.bf16.gmra.mrb[152].mxu1 %v2513_v16  ;;  %v2534_v22 = vshll.u32 %v7073_v60, 16  ;;  %v4717_v10 = vunpack.i.h.bf16 %v4715_v53  ;;  %v1885_v8 = vsel %vm1848_vm2, %v4711_v29, %v4712_v15  ;;  %v1291_v13 = vmax.f32 %v821_v21, 0.0  ;;  %v7969_v16 = vld [vmem:[#allocation9_spill] sm:$0xff] }
 0x22b   : > { %v2195_v37 = vmax.f32 %v2101_v26, %v7963_v19  ;;  %v2197_v25 = vmax.f32 %v2103_v40, %v7965_v56  ;;  %v4716_v17 = vunpack.i.l.bf16 %v4715_v53  ;;  %v2522_v61 = vshrl.u32 %v2255_v28, 16  ;;  %v7966_v40 = vld [vmem:[#allocation98_spill] sm:$0xff] }
 0x22c   : > { %v7092_v39 = vmax.f32 %v1885_v8, %v1287_v35  ;;  %v2532_v2 = vor.u32 %v2530_v62, %v2520_v5  ;;  %v2536_v1 = vrot.slane %v2534_v22, 1  ;;  %v2200_v54 = vmax.f32 %v7064_v57, %v7966_v40  ;;  %v7970_v62 = vld [vmem:[#allocation10_spill] sm:$0xff] }
 0x22d   : > { %v2257_v55 = vpack.c.bf16 %v2197_v25, %v2195_v37  ;;  %v1886_v26 = vsel %vm1848_vm2, %v4716_v17, %v4717_v10  ;;  %v2524_v51 = vor.u32 %v2522_v61, %v2512_v33  ;;  %v2202_v4 = vmax.f32 %v2108_v32, %v7967_v11  ;;  %v4730_v37 = vpop.permute.xlu0 %4729  ;;  %v7971_v10 = vld [vmem:[#allocation96_spill] sm:$0xff] }
 0x22e   : > { %v2537_v45 = vsel %vm2273_vm3, %v2532_v2, %v2536_v1  ;;  %v2112_v41 = vmax.f32 %v1886_v26, %v1291_v13  ;;  %v4722_v36 = vunpack.i.h.bf16 %v4720_v52  ;;  %v4721_v5 = vunpack.i.l.bf16 %v4720_v52 }
 0x22f   : > { %3488 = vmatmul.mubr.bf16.gmra.mrb[160].mxu0 %v2257_v55  ;;  %v2526_v28 = vshll.u32 %v2257_v55, 16  ;;  %3046 = vmatprep.mubr.bf16.mxu1 %v2537_v45  ;;  %v7099_v58 = vpack.c.bf16 %v2202_v4, %v2200_v54  ;;  %v825_v53 = vadd.f32 %v7968_v38, %v7920_v47  ;;  %v827_v33 = vadd.f32 %v6512_v59, %v7922_v30 }
 0x230   : > { %v2027_v32 = vsel %vm1848_vm2, %v4722_v36, %v4716_v17  ;;  %v829_v35 = vadd.f32 %v7969_v16, %v7920_v47  ;;  %v4727_v15 = vunpack.i.h.bf16 %v4725_v34  ;;  %v2026_v0 = vsel %vm1848_vm2, %v4721_v5, %v4711_v29  ;;  %v7973_v17 = vld [vmem:[#allocation97_spill] sm:$0xff]  ;;  %v7976_v5 = vld [vmem:[#allocation3_spill] sm:$0xff] }
 0x231   : > { %v2528_v57 = vrot.slane %v2526_v28, 1  ;;  %3497 = vmatprep.mubr.bf16.mxu0 %v7099_v58  ;;  %v2111_v21 = vmax.f32 %v2027_v32, %v1290_v9  ;;  %v1294_v3 = vmax.f32 %v825_v53, 0.0  ;;  %v1295_v19 = vmax.f32 %v827_v33, 0.0  ;;  %v7975_v28 = vld [vmem:[#allocation102_spill] sm:$0xff] }
 0x232   : > { %v2109_v56 = vmax.f32 %v2026_v0, %v1286_v12  ;;  %v1298_v25 = vmax.f32 %v829_v35, 0.0  ;;  %v4726_v59 = vunpack.i.l.bf16 %v4725_v34  ;;  %v831_v22 = vadd.f32 %v7970_v62, %v7922_v30  ;;  %v7977_v35 = vld [vmem:[#allocation47_spill] sm:$0xff] }
 0x233   : > { %v2529_v46 = vsel %vm2273_vm3, %v2524_v51, %v2528_v57  ;;  %v7972_v8 = vmax.f32 %v7971_v10, 0.0  ;;  %v7974_v61 = vmax.f32 %v7973_v17, 0.0  ;;  %v2546_v9 = vshrl.u32 %v7073_v60, 16  ;;  %v4735_v51 = vpop.permute.xlu1 %4734 }
 0x234   : > { %3047 = vmatmul.mubr.bf16.gmra.mrb[156].mxu1 %v2529_v46  ;;  %v1887_v29 = vsel %vm1848_vm2, %v4726_v59, %v4727_v15  ;;  %v2550_v2 = vshll.u32 %v7099_v58, 16  ;;  %v4732_v26 = vunpack.i.h.bf16 %v4730_v37  ;;  %v4731_v12 = vunpack.i.l.bf16 %v4730_v37  ;;  %v4740_v15 = vpop.permute.xlu0 %4739 }
 0x235   : > { %v2199_v13 = vmax.f32 %v2105_v18, %v7972_v8  ;;  %v2201_v52 = vmax.f32 %v2107_v43, %v7974_v61  ;;  %v7120_v40 = vmax.f32 %v1887_v29, %v1295_v19  ;;  %v1299_v54 = vmax.f32 %v831_v22, 0.0  ;;  %v7978_v19 = vld [vmem:[#allocation13_spill] sm:$0xff] }
 0x236   : > { %v2548_v4 = vor.u32 %v2546_v9, %v2536_v1  ;;  %v2552_v34 = vrot.slane %v2550_v2, 1  ;;  %v1888_v18 = vsel %vm1848_vm2, %v4731_v12, %v4732_v26  ;;  %v2538_v45 = vshrl.u32 %v2257_v55, 16  ;;  %v7979_v9 = vld [vmem:[#allocation14_spill] sm:$0xff]  ;;  %v7982_v26 = vld [vmem:[#allocation101_spill] sm:$0xff] }
 0x237   : > { %v2259_v11 = vpack.c.bf16 %v2201_v52, %v2199_v13  ;;  %v2204_v43 = vmax.f32 %v7092_v39, %v7975_v28  ;;  %v2116_v60 = vmax.f32 %v1888_v18, %v1299_v54  ;;  %v2206_v38 = vmax.f32 %v2112_v41, %v7976_v5  ;;  %v4745_v22 = vpop.permute.xlu1 %4744 }
 0x238   : > { %v4737_v53 = vunpack.i.h.bf16 %v4735_v51  ;;  %v2553_v33 = vsel %vm2273_vm3, %v2548_v4, %v2552_v34  ;;  %v2540_v32 = vor.u32 %v2538_v45, %v2528_v57  ;;  %v4736_v16 = vunpack.i.l.bf16 %v4735_v51 }
 0x239   : > { %3498 = vmatmul.mubr.bf16.gmra.mrb[164].mxu0 %v2259_v11  ;;  %v2542_v36 = vshll.u32 %v2259_v11, 16  ;;  %v835_v1 = vadd.f32 %v7977_v35, %v7920_v47  ;;  %3056 = vmatprep.mubr.bf16.mxu1 %v2553_v33  ;;  %v7129_v55 = vpack.c.bf16 %v2206_v38, %v2204_v43  ;;  %v837_v37 = vadd.f32 %v7978_v19, %v7922_v30  ;;  %v4750_v43 = vpop.permute.xlu0 %4749 }
 0x23a   : > { %v2029_v39 = vsel %vm1848_vm2, %v4737_v53, %v4731_v12  ;;  %v2028_v41 = vsel %vm1848_vm2, %v4736_v16, %v4726_v59  ;;  %v839_v57 = vadd.f32 %v6617_v31, %v7920_v47  ;;  %v4742_v17 = vunpack.i.h.bf16 %v4740_v15  ;;  %v7980_v59 = vld [vmem:[#allocation100_spill] sm:$0xff] }
 0x23b   : > { %v2544_v0 = vrot.slane %v2542_v36, 1  ;;  %v2115_v46 = vmax.f32 %v2029_v39, %v1298_v25  ;;  %v1302_v62 = vmax.f32 %v835_v1, 0.0  ;;  %3507 = vmatprep.mubr.bf16.mxu0 %v7129_v55  ;;  %v2113_v8 = vmax.f32 %v2028_v41, %v1294_v3  ;;  %v4755_v35 = vpop.permute.xlu1 %4754 }
 0x23c   : > { %v1303_v13 = vmax.f32 %v837_v37, 0.0  ;;  %v1306_v61 = vmax.f32 %v839_v57, 0.0  ;;  %v4741_v52 = vunpack.i.l.bf16 %v4740_v15  ;;  %v841_v29 = vadd.f32 %v7979_v9, %v7922_v30 }
 0x23d   : > { %v2545_v10 = vsel %vm2273_vm3, %v2540_v32, %v2544_v0  ;;  %v7981_v25 = vmax.f32 %v7980_v59, 0.0  ;;  %v7983_v12 = vmax.f32 %v7982_v26, 0.0  ;;  %v2562_v51 = vshrl.u32 %v7099_v58, 16  ;;  %v7985_v32 = vld [vmem:[#allocation5_spill] sm:$0xff]  ;;  %v4760_v9 = vpop.permute.xlu0 %4759 }
 0x23e   : > { %3057 = vmatmul.mubr.bf16.gmra.mrb[160].mxu1 %v2545_v10  ;;  %v2566_v54 = vshll.u32 %v7129_v55, 16  ;;  %v4747_v4 = vunpack.i.h.bf16 %v4745_v22  ;;  %v1889_v3 = vsel %vm1848_vm2, %v4741_v52, %v4742_v17  ;;  %v1307_v18 = vmax.f32 %v841_v29, 0.0 }
 0x23f   : > { %v2203_v2 = vmax.f32 %v2109_v56, %v7981_v25  ;;  %v2205_v31 = vmax.f32 %v2111_v21, %v7983_v12  ;;  %v4746_v45 = vunpack.i.l.bf16 %v4745_v22  ;;  %v2554_v28 = vshrl.u32 %v2259_v11, 16  ;;  %v7984_v21 = vld [vmem:[#allocation41_spill] sm:$0xff]  ;;  %v7988_v12 = vld [vmem:[#allocation104_spill] sm:$0xff] }
 0x240   : > { %v7148_v36 = vmax.f32 %v1889_v3, %v1303_v13  ;;  %v2564_v38 = vor.u32 %v2562_v51, %v2552_v34  ;;  %v2568_v53 = vrot.slane %v2566_v54, 1  ;;  %v2208_v58 = vmax.f32 %v7120_v40, %v7984_v21  ;;  %v4765_v3 = vpop.permute.xlu1 %4764 }
 0x241   : > { %v2261_v5 = vpack.c.bf16 %v2205_v31, %v2203_v2  ;;  %v1890_v56 = vsel %vm1848_vm2, %v4746_v45, %v4747_v4  ;;  %v2556_v33 = vor.u32 %v2554_v28, %v2544_v0  ;;  %v2210_v16 = vmax.f32 %v2116_v60, %v7985_v32  ;;  %v7986_v2 = vld [vmem:[#allocation8_spill] sm:$0xff]  ;;  %v4770_v32 = vpop.permute.xlu0 %4769 }
 0x242   : > { %v2569_v1 = vsel %vm2273_vm3, %v2564_v38, %v2568_v53  ;;  %v2120_v15 = vmax.f32 %v1890_v56, %v1307_v18  ;;  %v4752_v39 = vunpack.i.h.bf16 %v4750_v43  ;;  %v4751_v34 = vunpack.i.l.bf16 %v4750_v43  ;;  %v7990_v56 = vld [vmem:[#allocation44_spill] sm:$0xff] }
 0x243   : > { %3508 = vmatmul.mubr.bf16.gmra.mrb[168].mxu0 %v2261_v5  ;;  %v2558_v11 = vshll.u32 %v2261_v5, 16  ;;  %3066 = vmatprep.mubr.bf16.mxu1 %v2569_v1  ;;  %v7155_v19 = vpack.c.bf16 %v2210_v16, %v2208_v58  ;;  %v845_v37 = vadd.f32 %v6677_v44, %v7920_v47  ;;  %v847_v0 = vadd.f32 %v6688_v24, %v7922_v30 }
 0x244   : > { %v2031_v60 = vsel %vm1848_vm2, %v4752_v39, %v4746_v45  ;;  %v849_v41 = vadd.f32 %v6700_v20, %v7920_v47  ;;  %v4757_v57 = vunpack.i.h.bf16 %v4755_v35  ;;  %v2030_v22 = vsel %vm1848_vm2, %v4751_v34, %v4741_v52 }
 0x245   : > { %v2560_v40 = vrot.slane %v2558_v11, 1  ;;  %3517 = vmatprep.mubr.bf16.mxu0 %v7155_v19  ;;  %v2119_v10 = vmax.f32 %v2031_v60, %v1306_v61  ;;  %v1310_v13 = vmax.f32 %v845_v37, 0.0  ;;  %v1311_v17 = vmax.f32 %v847_v0, 0.0  ;;  %v4775_v0 = vpop.permute.xlu1 %4774 }
 0x246   : > { %v2117_v29 = vmax.f32 %v2030_v22, %v1302_v62  ;;  %v1314_v59 = vmax.f32 %v849_v41, 0.0  ;;  %v4756_v24 = vunpack.i.l.bf16 %v4755_v35  ;;  %v851_v25 = vadd.f32 %v6707_v23, %v7922_v30 }
 0x247   : > { %v2561_v44 = vsel %vm2273_vm3, %v2556_v33, %v2560_v40  ;;  %v7987_v20 = vmax.f32 %v7986_v2, 0.0  ;;  %v7989_v31 = vmax.f32 %v7988_v12, 0.0  ;;  %v2578_v61 = vshrl.u32 %v7129_v55, 16 }
 0x248   : > { %3067 = vmatmul.mubr.bf16.gmra.mrb[164].mxu1 %v2561_v44  ;;  %v1891_v52 = vsel %vm1848_vm2, %v4756_v24, %v4757_v57  ;;  %v2582_v54 = vshll.u32 %v7155_v19, 16  ;;  %v4762_v4 = vunpack.i.h.bf16 %v4760_v9  ;;  %v4761_v62 = vunpack.i.l.bf16 %v4760_v9 }
 0x249   : > { %v2207_v26 = vmax.f32 %v2113_v8, %v7987_v20  ;;  %v2209_v51 = vmax.f32 %v2115_v46, %v7989_v31  ;;  %v7176_v18 = vmax.f32 %v1891_v52, %v1311_v17  ;;  %v1315_v45 = vmax.f32 %v851_v25, 0.0  ;;  %v7991_v17 = vld [vmem:[#allocation12_spill] sm:$0xff] }
 0x24a   : > { %v2580_v23 = vor.u32 %v2578_v61, %v2568_v53  ;;  %v2584_v43 = vrot.slane %v2582_v54, 1  ;;  %v1892_v8 = vsel %vm1848_vm2, %v4761_v62, %v4762_v4  ;;  %v2570_v38 = vshrl.u32 %v2261_v5, 16 }
 0x24b   : > { %v2263_v28 = vpack.c.bf16 %v2209_v51, %v2207_v26  ;;  %v2212_v46 = vmax.f32 %v7148_v36, %v7990_v56  ;;  %v2124_v55 = vmax.f32 %v1892_v8, %v1315_v45  ;;  %v2214_v21 = vmax.f32 %v2120_v15, %v6508_v6 }
 0x24c   : > { %v4767_v58 = vunpack.i.h.bf16 %v4765_v3  ;;  %v2585_v16 = vsel %vm2273_vm3, %v2580_v23, %v2584_v43  ;;  %v2572_v35 = vor.u32 %v2570_v38, %v2560_v40  ;;  %v4766_v1 = vunpack.i.l.bf16 %v4765_v3  ;;  %v4785_v3 = vpop.permute.xlu1 %4784 }
 0x24d   : > { %3518 = vmatmul.mubr.bf16.gmra.mrb[172].mxu0 %v2263_v28  ;;  %v2574_v33 = vshll.u32 %v2263_v28, 16  ;;  %v855_v53 = vadd.f32 %v6753_v14, %v7920_v47  ;;  %3076 = vmatprep.mubr.bf16.mxu1 %v2585_v16  ;;  %v7185_v5 = vpack.c.bf16 %v2214_v21, %v2212_v46  ;;  %v857_v39 = vadd.f32 %v6762_v49, %v7922_v30 }
 0x24e   : > { %v2033_v36 = vsel %vm1848_vm2, %v4767_v58, %v4761_v62  ;;  %v2032_v6 = vsel %vm1848_vm2, %v4766_v1, %v4756_v24  ;;  %v859_v37 = vadd.f32 %v6769_v27, %v7920_v47  ;;  %v4772_v41 = vunpack.i.h.bf16 %v4770_v32  ;;  %v7995_v62 = vld [vmem:[#allocation16_spill] sm:$0xff] }
 0x24f   : > { %v2576_v11 = vrot.slane %v2574_v33, 1  ;;  %v2123_v15 = vmax.f32 %v2033_v36, %v1314_v59  ;;  %v1318_v34 = vmax.f32 %v855_v53, 0.0  ;;  %3527 = vmatprep.mubr.bf16.mxu0 %v7185_v5  ;;  %v2121_v14 = vmax.f32 %v2032_v6, %v1310_v13  ;;  %v7993_v59 = vld [vmem:[#allocation108_spill] sm:$0xff]  ;;  %v4780_v13 = vpop.permute.xlu0 %4779  ;;  %v7998_v36 = vld [vmem:[#allocation15_spill] sm:$0xff] }
 0x250   : > { %v1319_v60 = vmax.f32 %v857_v39, 0.0  ;;  %v1322_v57 = vmax.f32 %v859_v37, 0.0  ;;  %v4771_v22 = vunpack.i.l.bf16 %v4770_v32  ;;  %v861_v49 = vadd.f32 %v6779_v7, %v7922_v30 }
 0x251   : > { %v2577_v40 = vsel %vm2273_vm3, %v2572_v35, %v2576_v11  ;;  %v7992_v9 = vmax.f32 %v7991_v17, 0.0  ;;  %v7994_v24 = vmax.f32 %v7993_v59, 0.0  ;;  %v2594_v25 = vshrl.u32 %v7155_v19, 16  ;;  %v8003_v59 = vld [vmem:[#allocation20_spill] sm:$0xff] }
 0x252   : > { %3077 = vmatmul.mubr.bf16.gmra.mrb[168].mxu1 %v2577_v40  ;;  %v2598_v2 = vshll.u32 %v7185_v5, 16  ;;  %v4777_v20 = vunpack.i.h.bf16 %v4775_v0  ;;  %v1893_v26 = vsel %vm1848_vm2, %v4771_v22, %v4772_v41  ;;  %v1323_v12 = vmax.f32 %v861_v49, 0.0  ;;  %v8001_v49 = vld [vmem:[#allocation19_spill] sm:$0xff] }
 0x253   : > { %v2211_v44 = vmax.f32 %v2117_v29, %v7992_v9  ;;  %v2213_v27 = vmax.f32 %v2119_v10, %v7994_v24  ;;  %v4776_v31 = vunpack.i.l.bf16 %v4775_v0  ;;  %v2586_v51 = vshrl.u32 %v2263_v28, 16  ;;  %v1564_v21 = vpop.permute.xlu0 %1563 }
 0x254   : > { %v2126_v61 = vmax.f32 %v1893_v26, %v1319_v60  ;;  %v2596_v7 = vor.u32 %v2594_v25, %v2584_v43  ;;  %v2600_v54 = vrot.slane %v2598_v2, 1  ;;  %v2216_v10 = vmax.f32 %v7176_v18, %v7995_v62 }
 0x255   : > { %v2265_v52 = vpack.c.bf16 %v2213_v27, %v2211_v44  ;;  %v1894_v29 = vsel %vm1848_vm2, %v4776_v31, %v4777_v20  ;;  %v2588_v4 = vor.u32 %v2586_v51, %v2576_v11  ;;  %v2218_v19 = vmax.f32 %v2124_v55, %v6615_v48  ;;  %v8005_v20 = vld [vmem:[#allocation17_spill] sm:$0xff] }
 0x256   : > { %v2601_v45 = vsel %vm2273_vm3, %v2596_v7, %v2600_v54  ;;  %v2128_v23 = vmax.f32 %v1894_v29, %v1323_v12  ;;  %v4782_v38 = vunpack.i.h.bf16 %v4780_v13  ;;  %v4781_v56 = vunpack.i.l.bf16 %v4780_v13  ;;  %v8006_v12 = vld [vmem:[#allocation52_spill] sm:$0xff] }
 0x257   : > { %3528 = vmatmul.mubr.bf16.gmra.mrb[176].mxu0 %v2265_v52  ;;  %v2590_v8 = vshll.u32 %v2265_v52, 16  ;;  %3086 = vmatprep.mubr.bf16.mxu1 %v2601_v45  ;;  %v2268_v28 = vpack.c.bf16 %v2218_v19, %v2216_v10  ;;  %v865_v43 = vadd.f32 %v6820_v63, %v7920_v47  ;;  %v867_v46 = vadd.f32 %v6829_v42, %v7922_v30  ;;  %v7996_v47 = vld [vmem:[#allocation49_spill] sm:$0xff] }
 0x258   : > { %v2035_v18 = vsel %vm1848_vm2, %v4782_v38, %v4776_v31  ;;  %v4787_v48 = vunpack.i.h.bf16 %v4785_v3  ;;  %v4786_v55 = vunpack.i.l.bf16 %v4785_v3  ;;  %v2034_v58 = vsel %vm1848_vm2, %v4781_v56, %v4771_v22 }
 0x259   : > { %v2592_v33 = vrot.slane %v2590_v8, 1  ;;  %3537 = vmatprep.mubr.bf16.mxu0 %v2268_v28  ;;  %v2127_v32 = vmax.f32 %v2035_v18, %v1322_v57  ;;  %v1326_v16 = vmax.f32 %v865_v43, 0.0  ;;  %v1327_v35 = vmax.f32 %v867_v46, 0.0 }
 0x25a   : > { %v2125_v53 = vmax.f32 %v2034_v58, %v1318_v34  ;;  %v1895_v63 = vsel %vm1848_vm2, %v4786_v55, %v4787_v48  ;;  %v7997_v11 = vmax.f32 %v7996_v47, 0.0  ;;  %v7999_v39 = vmax.f32 %v7998_v36, 0.0  ;;  %v8000_v34 = vld [vmem:[#allocation54_spill] sm:$0xff] }
 0x25b   : > { %v2593_v1 = vsel %vm2273_vm3, %v2588_v4, %v2592_v33  ;;  %v2130_v30 = vmax.f32 %v1895_v63, %v1327_v35  ;;  %v2036_v37 = vsel %vm1848_vm2, %v1564_v21, %v4786_v55  ;;  %v2610_v40 = vshrl.u32 %v7185_v5, 16 }
 0x25c   : > { %v2215_v42 = vmax.f32 %v2121_v14, %v7997_v11  ;;  %3087 = vmatmul.mubr.bf16.gmra.mrb[172].mxu1 %v2593_v1  ;;  %v2217_v6 = vmax.f32 %v2123_v15, %v7999_v39  ;;  %v2129_v0 = vmax.f32 %v2036_v37, %v1326_v16  ;;  %v2614_v60 = vshll.u32 %v2268_v28, 16  ;;  %v300_v39 = vld [vmem:[%s7450_s4] sm:$0x3] }
 0x25d   : > { %v2220_v57 = vmax.f32 %v2126_v61, %v6684_v50  ;;  %v2222_v22 = vmax.f32 %v2128_v23, %v8000_v34  ;;  %v8002_v17 = vmax.f32 %v8001_v49, 0.0  ;;  %v2612_v14 = vor.u32 %v2610_v40, %v2600_v54 }
 0x25e   : > { %v2267_v41 = vpack.c.bf16 %v2217_v6, %v2215_v42  ;;  %v2616_v44 = vrot.slane %v2614_v60, 1  ;;  %v8004_v24 = vmax.f32 %v8003_v59, 0.0  ;;  %v2602_v15 = vshrl.u32 %v2265_v52, 16 }
 0x25f   : > { %v2219_v9 = vmax.f32 %v2125_v53, %v8002_v17  ;;  %v2270_v2 = vpack.c.bf16 %v2222_v22, %v2220_v57  ;;  %v2224_v5 = vmax.f32 %v2130_v30, %v8005_v20  ;;  %v2626_v50 = vshrl.u32 %v2268_v28, 16 }
 0x260   : > { %v2221_v27 = vmax.f32 %v2127_v32, %v8004_v24  ;;  %3538 = vmatmul.mubr.bf16.gmra.mrb[180].mxu0 %v2267_v41  ;;  %v2606_v25 = vshll.u32 %v2267_v41, 16  ;;  %v2617_v13 = vsel %vm2273_vm3, %v2612_v14, %v2616_v44  ;;  %v8007_v31 = vmax.f32 %v8006_v12, 0.0  ;;  %v3329_v32 = vpop.f32.mrb[96].mxu0 }
 0x261   : > { %3096 = vmatprep.mubr.bf16.mxu1 %v2617_v13  ;;  %v2604_v61 = vor.u32 %v2602_v15, %v2592_v33  ;;  %3547 = vmatprep.mubr.bf16.mxu0 %v2270_v2  ;;  %v2630_v54 = vshll.u32 %v2270_v2, 16  ;;  %v2272_v29 = vpack.c.bf16 %v2224_v5, %v2224_v5  ;;  %v2628_v4 = vor.u32 %v2626_v50, %v2616_v44  ;;  %v3331_v16 = vpop.f32.mrb[97].mxu0 }
 0x262   : > { %v2269_v26 = vpack.c.bf16 %v2221_v27, %v2219_v9  ;;  %v2223_v51 = vmax.f32 %v2129_v0, %v8007_v31  ;;  %v2608_v7 = vrot.slane %v2606_v25, 1  ;;  %v2618_v62 = vshrl.u32 %v2267_v41, 16  ;;  %v3333_v35 = vpop.f32.mrb[98].mxu0  ;;  %v8008_v0 = vld [vmem:[#allocation2_spill] sm:$0xff] }
 0x263   : > { %v2632_v3 = vrot.slane %v2630_v54, 1  ;;  %v2642_v45 = vshrl.u32 %v2270_v2, 16  ;;  %v2646_v23 = vshll.u32 %v2272_v29, 16  ;;  %v3335_v1 = vpop.f32.mrb[99].mxu0  ;;  %v2653_v53 = vshrl.u32 %v2272_v29, 16 }
 0x264   : > { %v2622_v52 = vshll.u32 %v2269_v26, 16  ;;  %v2271_v10 = vpack.c.bf16 %v2223_v51, %v2223_v51  ;;  %v2609_v19 = vsel %vm2273_vm3, %v2604_v61, %v2608_v7  ;;  %v2620_v8 = vor.u32 %v2618_v62, %v2608_v7  ;;  %v3339_v47 = vpop.f32.mrb[100].mxu0  ;;  %v2898_v37 = vpop.f32.mrb[96].mxu1 }
 0x265   : > { %3097 = vmatmul.mubr.bf16.gmra.mrb[176].mxu1 %v2609_v19  ;;  %v2634_v28 = vshrl.u32 %v2269_v26, 16  ;;  %v2633_v43 = vsel %vm2273_vm3, %v2628_v4, %v2632_v3  ;;  %v2644_v46 = vor.u32 %v2642_v45, %v2632_v3  ;;  %v2648_v33 = vrot.slane %v2646_v23, 1  ;;  %v3341_v11 = vpop.f32.mrb[101].mxu0  ;;  %v2900_v22 = vpop.f32.mrb[97].mxu1 }
 0x266   : > { %v2624_v38 = vrot.slane %v2622_v52, 1  ;;  %v2638_v56 = vshll.u32 %v2271_v10, 16  ;;  %3106 = vmatprep.mubr.bf16.mxu1 %v2633_v43  ;;  %v3343_v42 = vpop.f32.mrb[102].mxu0  ;;  %v2650_v36 = vshrl.u32 %v2271_v10, 16  ;;  %v8009_v40 = vsub.s32 1, %v8008_v0  ;;  %v2902_v17 = vpop.f32.mrb[98].mxu1 }
 0x267   : > { %v2649_v21 = vsel %vm2273_vm3, %v2644_v46, %v2648_v33  ;;  %v2655_v63 = vor.u32 %v2653_v53, %v2648_v33  ;;  %v3345_v30 = vpop.f32.mrb[103].mxu0  ;;  %v3330_v41 = vadd.f32 %v3329_v32, %v2898_v37  ;;  %v8010_v57 = vsub.s32 0, %v8008_v0  ;;  %v2904_v14 = vpop.f32.mrb[99].mxu1 }
 0x268   : > { %v2625_v18 = vsel %vm2273_vm3, %v2620_v8, %v2624_v38  ;;  %v2636_v48 = vor.u32 %v2634_v28, %v2624_v38  ;;  %v2640_v55 = vrot.slane %v2638_v56, 1  ;;  %3548 = vmatmul.mubr.bf16.gmra.mrb[184].mxu0 %v2269_v26  ;;  %v7243_v60 = vrot.slane %v300_v39, %v8009_v40 }
 0x269   : > { %3557 = vmatprep.mubr.bf16.mxu0 %v2272_v29  ;;  %v7247_v34 = vrot.slane %v300_v39, %v8010_v57  ;;  %v3332_v49 = vadd.f32 %v3331_v16, %v2900_v22  ;;  %v3334_v9 = vadd.f32 %v3333_v35, %v2902_v17  ;;  %v3336_v59 = vadd.f32 %v3335_v1, %v2904_v14 }
 0x26a   : > { %v2641_v58 = vsel %vm2273_vm3, %v2636_v48, %v2640_v55  ;;  %v2652_v6 = vor.u32 %v2650_v36, %v2640_v55 }
 0x26b   : > { %v3578_v44 = vadd.f32 %v7243_v60, %v3332_v49  ;;  %v3349_v24 = vpop.f32.mrb[104].mxu0  ;;  %v3577_v27 = vadd.f32 %v7247_v34, %v3330_v41  ;;  %v3580_v2 = vadd.f32 %v7243_v60, %v3336_v59  ;;  %v3579_v5 = vadd.f32 %v7247_v34, %v3334_v9 }
 0x26c   : > { %v3351_v15 = vpop.f32.mrb[105].mxu0 }
 0x26d   : > { %3107 = vmatmul.mubr.bf16.gmra.mrb[180].mxu1 %v2625_v18  ;;  %v3672_v25 = vmax.f32 %v3578_v44, 0.0  ;;  %v3353_v20 = vpop.f32.mrb[106].mxu0  ;;  %v3674_v50 = vmax.f32 %v3580_v2, 0.0  ;;  %v3671_v12 = vmax.f32 %v3577_v27, 0.0  ;;  %v3673_v54 = vmax.f32 %v3579_v5, 0.0 }
 0x26e   : > { %3116 = vmatprep.mubr.bf16.mxu1 %v2649_v21  ;;  %v3355_v13 = vpop.f32.mrb[107].mxu0 }
 0x26f   : > { %v3812_v26 = vrot.slane %v3672_v25, 7  ;;  %v3813_v51 = vrot.slane %v3674_v50, 7 }
 0x270   : > { %3558 = vmatmul.mubr.bf16.gmra.mrb[188].mxu0 %v2271_v10  ;;  %v2908_v61 = vpop.f32.mrb[100].mxu1 }
 0x271   : > { %v3952_v31 = vsel %vm1377_vm1, 0.0, %v3812_v26  ;;  %v3340_v29 = vadd.f32 %v3339_v47, %v2908_v61  ;;  %v2910_v4 = vpop.f32.mrb[101].mxu1  ;;  %v3814_v62 = vsel %vm1377_vm1, %v3812_v26, %v3813_v51 }
 0x272   : > { %v3953_v7 = vmax.f32 %v3952_v31, %v3671_v12  ;;  %v3342_v52 = vadd.f32 %v3341_v11, %v2910_v4  ;;  %v2912_v10 = vpop.f32.mrb[102].mxu1  ;;  %v3954_v3 = vmax.f32 %v3814_v62, %v3673_v54 }
 0x273   : > { %v3344_v45 = vadd.f32 %v3343_v42, %v2912_v10  ;;  %v2914_v23 = vpop.f32.mrb[103].mxu1  ;;  %v3581_v56 = vadd.f32 %v7247_v34, %v3340_v29 }
 0x274   : > { %v4000_v19 = vmax.f32 %v3953_v7, %v3672_v25  ;;  %v3582_v8 = vadd.f32 %v7243_v60, %v3342_v52  ;;  %v3346_v38 = vadd.f32 %v3345_v30, %v2914_v23  ;;  %v4001_v28 = vmax.f32 %v3954_v3, %v3674_v50 }
 0x275   : > { %3117 = vmatmul.mubr.bf16.gmra.mrb[184].mxu1 %v2641_v58  ;;  %v3583_v48 = vadd.f32 %v7247_v34, %v3344_v45  ;;  %v3675_v16 = vmax.f32 %v3581_v56, 0.0 }
 0x276   : > { %3126 = vmatprep.mubr.bf16.mxu1 %v2655_v63  ;;  %4047 = vst [vmem:[%s7258_s17] sm:$0xff] %v4000_v19  ;;  %v3676_v46 = vmax.f32 %v3582_v8, 0.0  ;;  %v3584_v33 = vadd.f32 %v7243_v60, %v3346_v38  ;;  %4048 = vst [vmem:[%s7258_s17 + $0x8] sm:$0xff] %v4001_v28 }
 0x277   : > { %v3677_v63 = vmax.f32 %v3583_v48, 0.0 }
 0x278   : > { %v3359_v43 = vpop.f32.mrb[108].mxu0  ;;  %v3815_v21 = vrot.slane %v3676_v46, 7  ;;  %v3678_v58 = vmax.f32 %v3584_v33, 0.0 }
 0x279   : > { %v3361_v18 = vpop.f32.mrb[109].mxu0 }
 0x27a   : > { %v3363_v55 = vpop.f32.mrb[110].mxu0  ;;  %v3816_v35 = vsel %vm1377_vm1, %v3813_v51, %v3815_v21  ;;  %v3817_v1 = vrot.slane %v3678_v58, 7 }
 0x27b   : > { %v3365_v32 = vpop.f32.mrb[111].mxu0  ;;  %v3955_v53 = vmax.f32 %v3816_v35, %v3675_v16 }
 0x27c   : > { %v3818_v11 = vsel %vm1377_vm1, %v3815_v21, %v3817_v1 }
 0x27d   : > { %3127 = vmatmul.mubr.bf16.gmra.mrb[188].mxu1 %v2652_v6  ;;  %v2918_v47 = vpop.f32.mrb[104].mxu1  ;;  %v4002_v36 = vmax.f32 %v3955_v53, %v3676_v46  ;;  %v3956_v39 = vmax.f32 %v3818_v11, %v3677_v63 }
 0x27e   : > { %v3350_v42 = vadd.f32 %v3349_v24, %v2918_v47  ;;  %v2920_v30 = vpop.f32.mrb[105].mxu1 }
 0x27f   : > { %v3352_v6 = vadd.f32 %v3351_v15, %v2920_v30  ;;  %v2922_v37 = vpop.f32.mrb[106].mxu1  ;;  %4049 = vst [vmem:[%s7258_s17 + $0x10] sm:$0xff] %v4002_v36  ;;  %v4003_v41 = vmax.f32 %v3956_v39, %v3678_v58 }
 0x280   : > { %v3354_v0 = vadd.f32 %v3353_v20, %v2922_v37  ;;  %v2924_v40 = vpop.f32.mrb[107].mxu1  ;;  %v3585_v49 = vadd.f32 %v7247_v34, %v3350_v42 }
 0x281   : > { %v3586_v57 = vadd.f32 %v7243_v60, %v3352_v6  ;;  %v3356_v22 = vadd.f32 %v3355_v13, %v2924_v40  ;;  %4050 = vst [vmem:[%s7258_s17 + $0x18] sm:$0xff] %v4003_v41 }
 0x282   : > { %v3587_v59 = vadd.f32 %v7247_v34, %v3354_v0  ;;  %v3679_v2 = vmax.f32 %v3585_v49, 0.0 }
 0x283   : > { %v3680_v9 = vmax.f32 %v3586_v57, 0.0  ;;  %v3588_v14 = vadd.f32 %v7243_v60, %v3356_v22 }
 0x284   : > { %v3681_v26 = vmax.f32 %v3587_v59, 0.0 }
 0x285   : > { %v3369_v17 = vpop.f32.mrb[112].mxu0  ;;  %v3819_v27 = vrot.slane %v3680_v9, 7  ;;  %v3682_v15 = vmax.f32 %v3588_v14, 0.0 }
 0x286   : > { %v3371_v44 = vpop.f32.mrb[113].mxu0 }
 0x287   : > { %v3373_v24 = vpop.f32.mrb[114].mxu0  ;;  %v3820_v20 = vsel %vm1377_vm1, %v3817_v1, %v3819_v27  ;;  %v3821_v5 = vrot.slane %v3682_v15, 7 }
 0x288   : > { %v3375_v25 = vpop.f32.mrb[115].mxu0  ;;  %v3957_v13 = vmax.f32 %v3820_v20, %v3679_v2 }
 0x289   : > { %v3822_v12 = vsel %vm1377_vm1, %v3819_v27, %v3821_v5 }
 0x28a   : > { %v2928_v50 = vpop.f32.mrb[108].mxu1  ;;  %v4004_v61 = vmax.f32 %v3957_v13, %v3680_v9  ;;  %v3958_v7 = vmax.f32 %v3822_v12, %v3681_v26 }
 0x28b   : > { %v3360_v31 = vadd.f32 %v3359_v43, %v2928_v50  ;;  %v2930_v51 = vpop.f32.mrb[109].mxu1 }
 0x28c   : > { %v3362_v54 = vadd.f32 %v3361_v18, %v2930_v51  ;;  %v2932_v29 = vpop.f32.mrb[110].mxu1  ;;  %4051 = vst [vmem:[%s7258_s17 + $0x20] sm:$0xff] %v4004_v61  ;;  %v4005_v52 = vmax.f32 %v3958_v7, %v3682_v15 }
 0x28d   : > { %v3364_v4 = vadd.f32 %v3363_v55, %v2932_v29  ;;  %v2934_v62 = vpop.f32.mrb[111].mxu1  ;;  %v3589_v3 = vadd.f32 %v7247_v34, %v3360_v31 }
 0x28e   : > { %v3590_v10 = vadd.f32 %v7243_v60, %v3362_v54  ;;  %v3366_v19 = vadd.f32 %v3365_v32, %v2934_v62  ;;  %4052 = vst [vmem:[%s7258_s17 + $0x28] sm:$0xff] %v4005_v52 }
 0x28f   : > { %v3591_v28 = vadd.f32 %v7247_v34, %v3364_v4  ;;  %v3683_v18 = vmax.f32 %v3589_v3, 0.0 }
 0x290   : > { %v3684_v23 = vmax.f32 %v3590_v10, 0.0  ;;  %v3592_v8 = vadd.f32 %v7243_v60, %v3366_v19 }
 0x291   : > { %v3685_v58 = vmax.f32 %v3591_v28, 0.0 }
 0x292   : > { %v3379_v45 = vpop.f32.mrb[116].mxu0  ;;  %v3823_v43 = vrot.slane %v3684_v23, 7  ;;  %v3686_v46 = vmax.f32 %v3592_v8, 0.0 }
 0x293   : > { %v3381_v38 = vpop.f32.mrb[117].mxu0 }
 0x294   : > { %v3383_v56 = vpop.f32.mrb[118].mxu0  ;;  %v3824_v48 = vsel %vm1377_vm1, %v3821_v5, %v3823_v43  ;;  %v3825_v55 = vrot.slane %v3686_v46, 7 }
 0x295   : > { %v3385_v33 = vpop.f32.mrb[119].mxu0  ;;  %v3959_v21 = vmax.f32 %v3824_v48, %v3683_v18 }
 0x296   : > { %v3826_v32 = vsel %vm1377_vm1, %v3823_v43, %v3825_v55 }
 0x297   : > { %v4006_v35 = vmax.f32 %v3959_v21, %v3684_v23  ;;  %v3960_v1 = vmax.f32 %v3826_v32, %v3685_v58 }
 0x298   : > { %v2938_v16 = vpop.f32.mrb[112].mxu1 }
 0x299   : > { %v3370_v53 = vadd.f32 %v3369_v17, %v2938_v16  ;;  %v2940_v63 = vpop.f32.mrb[113].mxu1  ;;  %4053 = vst [vmem:[%s7258_s17 + $0x30] sm:$0xff] %v4006_v35  ;;  %v4007_v42 = vmax.f32 %v3960_v1, %v3686_v46 }
 0x29a   : > { %v3372_v47 = vadd.f32 %v3371_v44, %v2940_v63  ;;  %v2942_v11 = vpop.f32.mrb[114].mxu1 }
 0x29b   : > { %v3374_v30 = vadd.f32 %v3373_v24, %v2942_v11  ;;  %v2944_v36 = vpop.f32.mrb[115].mxu1  ;;  %4054 = vst [vmem:[%s7258_s17 + $0x38] sm:$0xff] %v4007_v42  ;;  %v3593_v0 = vadd.f32 %v7247_v34, %v3370_v53 }
 0x29c   : > { %v3594_v39 = vadd.f32 %v7243_v60, %v3372_v47  ;;  %v3376_v6 = vadd.f32 %v3375_v25, %v2944_v36 }
 0x29d   : > { %v3595_v49 = vadd.f32 %v7247_v34, %v3374_v30  ;;  %v3687_v44 = vmax.f32 %v3593_v0, 0.0 }
 0x29e   : > { %v3688_v41 = vmax.f32 %v3594_v39, 0.0  ;;  %v3596_v57 = vadd.f32 %v7243_v60, %v3376_v6 }
 0x29f   : > { %v3389_v37 = vpop.f32.mrb[120].mxu0  ;;  %v3689_v20 = vmax.f32 %v3595_v49, 0.0 }
 0x2a0   : > { %v3391_v40 = vpop.f32.mrb[121].mxu0  ;;  %v3827_v9 = vrot.slane %v3688_v41, 7  ;;  %v3690_v14 = vmax.f32 %v3596_v57, 0.0 }
 0x2a1   : > { %v3393_v22 = vpop.f32.mrb[122].mxu0 }
 0x2a2   : > { %v3395_v17 = vpop.f32.mrb[123].mxu0  ;;  %v3828_v24 = vsel %vm1377_vm1, %v3825_v55, %v3827_v9  ;;  %v3829_v27 = vrot.slane %v3690_v14, 7 }
 0x2a3   : > { %v3961_v2 = vmax.f32 %v3828_v24, %v3687_v44 }
 0x2a4   : > { %v2948_v59 = vpop.f32.mrb[116].mxu1  ;;  %v3830_v26 = vsel %vm1377_vm1, %v3827_v9, %v3829_v27 }
 0x2a5   : > { %v3380_v15 = vadd.f32 %v3379_v45, %v2948_v59  ;;  %v2950_v25 = vpop.f32.mrb[117].mxu1  ;;  %v4008_v31 = vmax.f32 %v3961_v2, %v3688_v41  ;;  %v3962_v51 = vmax.f32 %v3830_v26, %v3689_v20 }
 0x2a6   : > { %v3382_v5 = vadd.f32 %v3381_v38, %v2950_v25  ;;  %v2952_v13 = vpop.f32.mrb[118].mxu1 }
 0x2a7   : > { %v3384_v50 = vadd.f32 %v3383_v56, %v2952_v13  ;;  %v2954_v12 = vpop.f32.mrb[119].mxu1  ;;  %v3597_v29 = vadd.f32 %v7247_v34, %v3380_v15  ;;  %4055 = vst [vmem:[%s7258_s17 + $0x40] sm:$0xff] %v4008_v31  ;;  %v4009_v62 = vmax.f32 %v3962_v51, %v3690_v14 }
 0x2a8   : > { %v3598_v61 = vadd.f32 %v7243_v60, %v3382_v5  ;;  %v3386_v7 = vadd.f32 %v3385_v33, %v2954_v12 }
 0x2a9   : > { %v3599_v3 = vadd.f32 %v7247_v34, %v3384_v50  ;;  %4056 = vst [vmem:[%s7258_s17 + $0x48] sm:$0xff] %v4009_v62  ;;  %v3691_v38 = vmax.f32 %v3597_v29, 0.0 }
 0x2aa   : > { %v3692_v52 = vmax.f32 %v3598_v61, 0.0  ;;  %v3600_v10 = vadd.f32 %v7243_v60, %v3386_v7 }
 0x2ab   : > { %v3399_v54 = vpop.f32.mrb[124].mxu0  ;;  %v3693_v48 = vmax.f32 %v3599_v3, 0.0 }
 0x2ac   : > { %v3401_v4 = vpop.f32.mrb[125].mxu0  ;;  %v3831_v23 = vrot.slane %v3692_v52, 7  ;;  %v3694_v8 = vmax.f32 %v3600_v10, 0.0 }
 0x2ad   : > { %v3403_v19 = vpop.f32.mrb[126].mxu0 }
 0x2ae   : > { %v3405_v45 = vpop.f32.mrb[127].mxu0  ;;  %v3832_v56 = vsel %vm1377_vm1, %v3829_v27, %v3831_v23  ;;  %v3833_v43 = vrot.slane %v3694_v8, 7 }
 0x2af   : > { %v3963_v18 = vmax.f32 %v3832_v56, %v3691_v38 }
 0x2b0   : > { %v2958_v28 = vpop.f32.mrb[120].mxu1  ;;  %v3834_v58 = vsel %vm1377_vm1, %v3831_v23, %v3833_v43 }
 0x2b1   : > { %v3390_v46 = vadd.f32 %v3389_v37, %v2958_v28  ;;  %v2960_v33 = vpop.f32.mrb[121].mxu1  ;;  %v4010_v1 = vmax.f32 %v3963_v18, %v3692_v52  ;;  %v3964_v53 = vmax.f32 %v3834_v58, %v3693_v48 }
 0x2b2   : > { %v3392_v55 = vadd.f32 %v3391_v40, %v2960_v33  ;;  %v2962_v21 = vpop.f32.mrb[122].mxu1 }
 0x2b3   : > { %v3394_v32 = vadd.f32 %v3393_v22, %v2962_v21  ;;  %v2964_v16 = vpop.f32.mrb[123].mxu1  ;;  %v3409_v35 = vpop.f32.mrb[128].mxu0  ;;  %v3601_v42 = vadd.f32 %v7247_v34, %v3390_v46  ;;  %4057 = vst [vmem:[%s7258_s17 + $0x50] sm:$0xff] %v4010_v1  ;;  %v4011_v36 = vmax.f32 %v3964_v53, %v3694_v8 }
 0x2b4   : > { %v3602_v63 = vadd.f32 %v7243_v60, %v3392_v55  ;;  %v3396_v47 = vadd.f32 %v3395_v17, %v2964_v16  ;;  %v3411_v11 = vpop.f32.mrb[129].mxu0 }
 0x2b5   : > { %v3413_v30 = vpop.f32.mrb[130].mxu0  ;;  %v3603_v0 = vadd.f32 %v7247_v34, %v3394_v32  ;;  %4058 = vst [vmem:[%s7258_s17 + $0x58] sm:$0xff] %v4011_v36  ;;  %v3695_v22 = vmax.f32 %v3601_v42, 0.0 }
 0x2b6   : > { %v3696_v39 = vmax.f32 %v3602_v63, 0.0  ;;  %v3604_v6 = vadd.f32 %v7243_v60, %v3396_v47  ;;  %v3415_v37 = vpop.f32.mrb[131].mxu0 }
 0x2b7   : > { %v3697_v27 = vmax.f32 %v3603_v0, 0.0 }
 0x2b8   : > { %v3835_v40 = vrot.slane %v3696_v39, 7  ;;  %v3698_v41 = vmax.f32 %v3604_v6, 0.0  ;;  %v2968_v57 = vpop.f32.mrb[124].mxu1 }
 0x2b9   : > { %v3400_v49 = vadd.f32 %v3399_v54, %v2968_v57  ;;  %v2970_v9 = vpop.f32.mrb[125].mxu1 }
 0x2ba   : > { %v3836_v17 = vsel %vm1377_vm1, %v3833_v43, %v3835_v40  ;;  %v3837_v14 = vrot.slane %v3698_v41, 7  ;;  %v3402_v44 = vadd.f32 %v3401_v4, %v2970_v9  ;;  %v2972_v59 = vpop.f32.mrb[126].mxu1 }
 0x2bb   : > { %v3965_v24 = vmax.f32 %v3836_v17, %v3695_v22  ;;  %v3404_v15 = vadd.f32 %v3403_v19, %v2972_v59  ;;  %v2974_v25 = vpop.f32.mrb[127].mxu1  ;;  %v3605_v31 = vadd.f32 %v7247_v34, %v3400_v49 }
 0x2bc   : > { %v3838_v20 = vsel %vm1377_vm1, %v3835_v40, %v3837_v14  ;;  %v3606_v5 = vadd.f32 %v7243_v60, %v3402_v44  ;;  %v3406_v13 = vadd.f32 %v3405_v45, %v2974_v25 }
 0x2bd   : > { %v3419_v2 = vpop.f32.mrb[132].mxu0  ;;  %v4012_v50 = vmax.f32 %v3965_v24, %v3696_v39  ;;  %v3966_v12 = vmax.f32 %v3838_v20, %v3697_v27  ;;  %v3607_v4 = vadd.f32 %v7247_v34, %v3404_v15  ;;  %v3699_v19 = vmax.f32 %v3605_v31, 0.0 }
 0x2be   : > { %v3421_v26 = vpop.f32.mrb[133].mxu0  ;;  %v3700_v61 = vmax.f32 %v3606_v5, 0.0  ;;  %v3608_v7 = vadd.f32 %v7243_v60, %v3406_v13 }
 0x2bf   : > { %v3423_v51 = vpop.f32.mrb[134].mxu0  ;;  %4059 = vst [vmem:[%s7258_s17 + $0x60] sm:$0xff] %v4012_v50  ;;  %v4013_v29 = vmax.f32 %v3966_v12, %v3698_v41  ;;  %v3701_v43 = vmax.f32 %v3607_v4, 0.0 }
 0x2c0   : > { %v3425_v54 = vpop.f32.mrb[135].mxu0  ;;  %v3839_v62 = vrot.slane %v3700_v61, 7  ;;  %v3702_v52 = vmax.f32 %v3608_v7, 0.0 }
 0x2c1   : > { %4060 = vst [vmem:[%s7258_s17 + $0x68] sm:$0xff] %v4013_v29 }
 0x2c2   : > { %v2978_v10 = vpop.f32.mrb[128].mxu1  ;;  %v3840_v23 = vsel %vm1377_vm1, %v3837_v14, %v3839_v62  ;;  %v3841_v8 = vrot.slane %v3702_v52, 7 }
 0x2c3   : > { %v3410_v3 = vadd.f32 %v3409_v35, %v2978_v10  ;;  %v2980_v45 = vpop.f32.mrb[129].mxu1  ;;  %v3967_v56 = vmax.f32 %v3840_v23, %v3699_v19 }
 0x2c4   : > { %v3412_v38 = vadd.f32 %v3411_v11, %v2980_v45  ;;  %v2982_v28 = vpop.f32.mrb[130].mxu1  ;;  %v3842_v48 = vsel %vm1377_vm1, %v3839_v62, %v3841_v8 }
 0x2c5   : > { %v3414_v46 = vadd.f32 %v3413_v30, %v2982_v28  ;;  %v2984_v33 = vpop.f32.mrb[131].mxu1  ;;  %v3429_v18 = vpop.f32.mrb[136].mxu0  ;;  %v4014_v32 = vmax.f32 %v3967_v56, %v3700_v61  ;;  %v3968_v16 = vmax.f32 %v3842_v48, %v3701_v43  ;;  %v3609_v35 = vadd.f32 %v7247_v34, %v3410_v3 }
 0x2c6   : > { %v3610_v55 = vadd.f32 %v7243_v60, %v3412_v38  ;;  %v3416_v21 = vadd.f32 %v3415_v37, %v2984_v33  ;;  %v3431_v58 = vpop.f32.mrb[137].mxu0 }
 0x2c7   : > { %v3433_v1 = vpop.f32.mrb[138].mxu0  ;;  %4061 = vst [vmem:[%s7258_s17 + $0x70] sm:$0xff] %v4014_v32  ;;  %v4015_v11 = vmax.f32 %v3968_v16, %v3702_v52  ;;  %v3611_v42 = vadd.f32 %v7247_v34, %v3414_v46  ;;  %v3703_v6 = vmax.f32 %v3609_v35, 0.0 }
 0x2c8   : > { %v3704_v53 = vmax.f32 %v3610_v55, 0.0  ;;  %v3612_v63 = vadd.f32 %v7243_v60, %v3416_v21  ;;  %v3435_v47 = vpop.f32.mrb[139].mxu0 }
 0x2c9   : > { %4062 = vst [vmem:[%s7258_s17 + $0x78] sm:$0xff] %v4015_v11  ;;  %v3705_v9 = vmax.f32 %v3611_v42, 0.0 }
 0x2ca   : > { %v3843_v30 = vrot.slane %v3704_v53, 7  ;;  %v3706_v36 = vmax.f32 %v3612_v63, 0.0  ;;  %v2988_v39 = vpop.f32.mrb[132].mxu1 }
 0x2cb   : > { %v3420_v37 = vadd.f32 %v3419_v2, %v2988_v39  ;;  %v2990_v0 = vpop.f32.mrb[133].mxu1 }
 0x2cc   : > { %v3844_v40 = vsel %vm1377_vm1, %v3841_v8, %v3843_v30  ;;  %v3845_v41 = vrot.slane %v3706_v36, 7  ;;  %v3422_v57 = vadd.f32 %v3421_v26, %v2990_v0  ;;  %v2992_v22 = vpop.f32.mrb[134].mxu1 }
 0x2cd   : > { %v3969_v49 = vmax.f32 %v3844_v40, %v3703_v6  ;;  %v3424_v17 = vadd.f32 %v3423_v51, %v2992_v22  ;;  %v2994_v14 = vpop.f32.mrb[135].mxu1  ;;  %v3613_v20 = vadd.f32 %v7247_v34, %v3420_v37 }
 0x2ce   : > { %v3846_v59 = vsel %vm1377_vm1, %v3843_v30, %v3845_v41  ;;  %v3614_v24 = vadd.f32 %v7243_v60, %v3422_v57  ;;  %v3426_v27 = vadd.f32 %v3425_v54, %v2994_v14 }
 0x2cf   : > { %v3439_v44 = vpop.f32.mrb[140].mxu0  ;;  %v4016_v25 = vmax.f32 %v3969_v49, %v3704_v53  ;;  %v3970_v2 = vmax.f32 %v3846_v59, %v3705_v9  ;;  %v3615_v31 = vadd.f32 %v7247_v34, %v3424_v17  ;;  %v3707_v29 = vmax.f32 %v3613_v20, 0.0 }
 0x2d0   : > { %v3441_v15 = vpop.f32.mrb[141].mxu0  ;;  %v3708_v13 = vmax.f32 %v3614_v24, 0.0  ;;  %v3616_v26 = vadd.f32 %v7243_v60, %v3426_v27 }
 0x2d1   : > { %v3443_v5 = vpop.f32.mrb[142].mxu0  ;;  %4063 = vst [vmem:[%s7258_s17 + $0x80] sm:$0xff] %v4016_v25  ;;  %v4017_v12 = vmax.f32 %v3970_v2, %v3706_v36  ;;  %v3709_v45 = vmax.f32 %v3615_v31, 0.0 }
 0x2d2   : > { %v3445_v50 = vpop.f32.mrb[143].mxu0  ;;  %v3847_v51 = vrot.slane %v3708_v13, 7  ;;  %v3710_v61 = vmax.f32 %v3616_v26, 0.0 }
 0x2d3   : > { %4064 = vst [vmem:[%s7258_s17 + $0x88] sm:$0xff] %v4017_v12 }
 0x2d4   : > { %v2998_v7 = vpop.f32.mrb[136].mxu1  ;;  %v3848_v62 = vsel %vm1377_vm1, %v3845_v41, %v3847_v51  ;;  %v3849_v52 = vrot.slane %v3710_v61, 7 }
 0x2d5   : > { %v3430_v54 = vadd.f32 %v3429_v18, %v2998_v7  ;;  %v3000_v4 = vpop.f32.mrb[137].mxu1  ;;  %v3971_v3 = vmax.f32 %v3848_v62, %v3707_v29 }
 0x2d6   : > { %v3432_v10 = vadd.f32 %v3431_v58, %v3000_v4  ;;  %v3002_v19 = vpop.f32.mrb[138].mxu1  ;;  %v3850_v28 = vsel %vm1377_vm1, %v3847_v51, %v3849_v52 }
 0x2d7   : > { %v3434_v23 = vadd.f32 %v3433_v1, %v3002_v19  ;;  %v3004_v8 = vpop.f32.mrb[139].mxu1  ;;  %v4018_v33 = vmax.f32 %v3971_v3, %v3708_v13  ;;  %v3972_v18 = vmax.f32 %v3850_v28, %v3709_v45  ;;  %v3617_v48 = vadd.f32 %v7247_v34, %v3430_v54 }
 0x2d8   : > { %v3618_v56 = vadd.f32 %v7243_v60, %v3432_v10  ;;  %v3436_v43 = vadd.f32 %v3435_v47, %v3004_v8 }
 0x2d9   : > { %4065 = vst [vmem:[%s7258_s17 + $0x90] sm:$0xff] %v4018_v33  ;;  %v4019_v16 = vmax.f32 %v3972_v18, %v3710_v61  ;;  %v3619_v35 = vadd.f32 %v7247_v34, %v3434_v23  ;;  %v3711_v11 = vmax.f32 %v3617_v48, 0.0 }
 0x2da   : > { %v3449_v38 = vpop.f32.mrb[144].mxu0  ;;  %v3712_v21 = vmax.f32 %v3618_v56, 0.0  ;;  %v3620_v58 = vadd.f32 %v7243_v60, %v3436_v43 }
 0x2db   : > { %v3451_v46 = vpop.f32.mrb[145].mxu0  ;;  %4066 = vst [vmem:[%s7258_s17 + $0x98] sm:$0xff] %v4019_v16  ;;  %v3713_v0 = vmax.f32 %v3619_v35, 0.0 }
 0x2dc   : > { %v3453_v55 = vpop.f32.mrb[146].mxu0  ;;  %v3851_v1 = vrot.slane %v3712_v21, 7  ;;  %v3714_v53 = vmax.f32 %v3620_v58, 0.0 }
 0x2dd   : > { %v3455_v32 = vpop.f32.mrb[147].mxu0 }
 0x2de   : > { %v3852_v30 = vsel %vm1377_vm1, %v3849_v52, %v3851_v1  ;;  %v3853_v36 = vrot.slane %v3714_v53, 7 }
 0x2df   : > { %v3008_v63 = vpop.f32.mrb[140].mxu1  ;;  %v3973_v37 = vmax.f32 %v3852_v30, %v3711_v11 }
 0x2e0   : > { %v3440_v47 = vadd.f32 %v3439_v44, %v3008_v63  ;;  %v3010_v42 = vpop.f32.mrb[141].mxu1  ;;  %v3854_v57 = vsel %vm1377_vm1, %v3851_v1, %v3853_v36 }
 0x2e1   : > { %v3442_v39 = vadd.f32 %v3441_v15, %v3010_v42  ;;  %v3012_v6 = vpop.f32.mrb[142].mxu1  ;;  %v4020_v17 = vmax.f32 %v3973_v37, %v3712_v21  ;;  %v3974_v14 = vmax.f32 %v3854_v57, %v3713_v0 }
 0x2e2   : > { %v3444_v40 = vadd.f32 %v3443_v5, %v3012_v6  ;;  %v3014_v41 = vpop.f32.mrb[143].mxu1  ;;  %v3621_v44 = vadd.f32 %v7247_v34, %v3440_v47 }
 0x2e3   : > { %v3622_v22 = vadd.f32 %v7243_v60, %v3442_v39  ;;  %v3446_v49 = vadd.f32 %v3445_v50, %v3014_v41  ;;  %4067 = vst [vmem:[%s7258_s17 + $0xa0] sm:$0xff] %v4020_v17  ;;  %v4021_v25 = vmax.f32 %v3974_v14, %v3714_v53 }
 0x2e4   : > { %v3459_v9 = vpop.f32.mrb[148].mxu0  ;;  %v3623_v2 = vadd.f32 %v7247_v34, %v3444_v40  ;;  %v3715_v26 = vmax.f32 %v3621_v44, 0.0 }
 0x2e5   : > { %v3461_v59 = vpop.f32.mrb[149].mxu0  ;;  %v3716_v24 = vmax.f32 %v3622_v22, 0.0  ;;  %v3624_v27 = vadd.f32 %v7243_v60, %v3446_v49  ;;  %4068 = vst [vmem:[%s7258_s17 + $0xa8] sm:$0xff] %v4021_v25 }
 0x2e6   : > { %v3463_v15 = vpop.f32.mrb[150].mxu0  ;;  %v3717_v29 = vmax.f32 %v3623_v2, 0.0 }
 0x2e7   : > { %v3465_v20 = vpop.f32.mrb[151].mxu0  ;;  %v3855_v5 = vrot.slane %v3716_v24, 7  ;;  %v3718_v13 = vmax.f32 %v3624_v27, 0.0 }
 0x2e9   : > { %v3018_v50 = vpop.f32.mrb[144].mxu1  ;;  %v3856_v12 = vsel %vm1377_vm1, %v3853_v36, %v3855_v5  ;;  %v3857_v31 = vrot.slane %v3718_v13, 7 }
 0x2ea   : > { %v3450_v51 = vadd.f32 %v3449_v38, %v3018_v50  ;;  %v3020_v61 = vpop.f32.mrb[145].mxu1  ;;  %v3975_v7 = vmax.f32 %v3856_v12, %v3715_v26 }
 0x2eb   : > { %v3452_v54 = vadd.f32 %v3451_v46, %v3020_v61  ;;  %v3022_v4 = vpop.f32.mrb[146].mxu1  ;;  %v3858_v62 = vsel %vm1377_vm1, %v3855_v5, %v3857_v31 }
 0x2ec   : > { %v3454_v52 = vadd.f32 %v3453_v55, %v3022_v4  ;;  %v3024_v10 = vpop.f32.mrb[147].mxu1  ;;  %v4022_v19 = vmax.f32 %v3975_v7, %v3716_v24  ;;  %v3976_v3 = vmax.f32 %v3858_v62, %v3717_v29  ;;  %v3625_v8 = vadd.f32 %v7247_v34, %v3450_v51 }
 0x2ed   : > { %v3626_v45 = vadd.f32 %v7243_v60, %v3452_v54  ;;  %v3456_v23 = vadd.f32 %v3455_v32, %v3024_v10 }
 0x2ee   : > { %v3469_v28 = vpop.f32.mrb[152].mxu0  ;;  %4069 = vst [vmem:[%s7258_s17 + $0xb0] sm:$0xff] %v4022_v19  ;;  %v4023_v38 = vmax.f32 %v3976_v3, %v3718_v13  ;;  %v3627_v33 = vadd.f32 %v7247_v34, %v3454_v52  ;;  %v3719_v58 = vmax.f32 %v3625_v8, 0.0 }
 0x2ef   : > { %v3720_v56 = vmax.f32 %v3626_v45, 0.0  ;;  %v3628_v43 = vadd.f32 %v7243_v60, %v3456_v23  ;;  %v3471_v46 = vpop.f32.mrb[153].mxu0 }
 0x2f0   : > { %v3473_v18 = vpop.f32.mrb[154].mxu0  ;;  %4070 = vst [vmem:[%s7258_s17 + $0xb8] sm:$0xff] %v4023_v38  ;;  %v3721_v53 = vmax.f32 %v3627_v33, 0.0 }
 0x2f1   : > { %v3859_v48 = vrot.slane %v3720_v56, 7  ;;  %v3722_v55 = vmax.f32 %v3628_v43, 0.0  ;;  %v3475_v21 = vpop.f32.mrb[155].mxu0 }
 0x2f3   : > { %v3860_v16 = vsel %vm1377_vm1, %v3857_v31, %v3859_v48  ;;  %v3861_v32 = vrot.slane %v3722_v55, 7  ;;  %v3028_v35 = vpop.f32.mrb[148].mxu1 }
 0x2f4   : > { %v3977_v1 = vmax.f32 %v3860_v16, %v3719_v58  ;;  %v3460_v63 = vadd.f32 %v3459_v9, %v3028_v35  ;;  %v3030_v11 = vpop.f32.mrb[149].mxu1 }
 0x2f5   : > { %v3862_v47 = vsel %vm1377_vm1, %v3859_v48, %v3861_v32  ;;  %v3462_v42 = vadd.f32 %v3461_v59, %v3030_v11  ;;  %v3032_v30 = vpop.f32.mrb[150].mxu1 }
 0x2f6   : > { %v4024_v36 = vmax.f32 %v3977_v1, %v3720_v56  ;;  %v3978_v39 = vmax.f32 %v3862_v47, %v3721_v53  ;;  %v3464_v6 = vadd.f32 %v3463_v15, %v3032_v30  ;;  %v3034_v37 = vpop.f32.mrb[151].mxu1  ;;  %v3629_v22 = vadd.f32 %v7247_v34, %v3460_v63 }
 0x2f7   : > { %v3630_v0 = vadd.f32 %v7243_v60, %v3462_v42  ;;  %v3466_v40 = vadd.f32 %v3465_v20, %v3034_v37 }
 0x2f8   : > { %v3479_v41 = vpop.f32.mrb[156].mxu0  ;;  %4071 = vst [vmem:[%s7258_s17 + $0xc0] sm:$0xff] %v4024_v36  ;;  %v4025_v57 = vmax.f32 %v3978_v39, %v3722_v55  ;;  %v3631_v44 = vadd.f32 %v7247_v34, %v3464_v6  ;;  %v3723_v15 = vmax.f32 %v3629_v22, 0.0 }
 0x2f9   : > { %v3481_v49 = vpop.f32.mrb[157].mxu0  ;;  %v3724_v9 = vmax.f32 %v3630_v0, 0.0  ;;  %v3632_v17 = vadd.f32 %v7243_v60, %v3466_v40 }
 0x2fa   : > { %v3483_v14 = vpop.f32.mrb[158].mxu0  ;;  %4072 = vst [vmem:[%s7258_s17 + $0xc8] sm:$0xff] %v4025_v57  ;;  %v3725_v50 = vmax.f32 %v3631_v44, 0.0 }
 0x2fb   : > { %v3485_v59 = vpop.f32.mrb[159].mxu0  ;;  %v3863_v24 = vrot.slane %v3724_v9, 7  ;;  %v3726_v27 = vmax.f32 %v3632_v17, 0.0 }
 0x2fd   : > { %v3038_v25 = vpop.f32.mrb[152].mxu1  ;;  %v3864_v2 = vsel %vm1377_vm1, %v3861_v32, %v3863_v24  ;;  %v3865_v20 = vrot.slane %v3726_v27, 7 }
 0x2fe   : > { %v3470_v5 = vadd.f32 %v3469_v28, %v3038_v25  ;;  %v3040_v13 = vpop.f32.mrb[153].mxu1  ;;  %v3979_v26 = vmax.f32 %v3864_v2, %v3723_v15 }
 0x2ff   : > { %v3472_v12 = vadd.f32 %v3471_v46, %v3040_v13  ;;  %v3042_v31 = vpop.f32.mrb[154].mxu1  ;;  %v3866_v51 = vsel %vm1377_vm1, %v3863_v24, %v3865_v20 }
 0x300   : > { %v3474_v61 = vadd.f32 %v3473_v18, %v3042_v31  ;;  %v3044_v7 = vpop.f32.mrb[155].mxu1  ;;  %v4026_v29 = vmax.f32 %v3979_v26, %v3724_v9  ;;  %v3980_v54 = vmax.f32 %v3866_v51, %v3725_v50  ;;  %v3633_v52 = vadd.f32 %v7247_v34, %v3470_v5 }
 0x301   : > { %v3634_v4 = vadd.f32 %v7243_v60, %v3472_v12  ;;  %v3476_v62 = vadd.f32 %v3475_v21, %v3044_v7 }
 0x302   : > { %v3489_v10 = vpop.f32.mrb[160].mxu0  ;;  %4073 = vst [vmem:[%s7258_s17 + $0xd0] sm:$0xff] %v4026_v29  ;;  %v4027_v19 = vmax.f32 %v3980_v54, %v3726_v27  ;;  %v3635_v8 = vadd.f32 %v7247_v34, %v3474_v61  ;;  %v3727_v46 = vmax.f32 %v3633_v52, 0.0 }
 0x303   : > { %v3728_v3 = vmax.f32 %v3634_v4, 0.0  ;;  %v3636_v45 = vadd.f32 %v7243_v60, %v3476_v62  ;;  %v3491_v23 = vpop.f32.mrb[161].mxu0 }
 0x304   : > { %v3493_v28 = vpop.f32.mrb[162].mxu0  ;;  %4074 = vst [vmem:[%s7258_s17 + $0xd8] sm:$0xff] %v4027_v19  ;;  %v3729_v21 = vmax.f32 %v3635_v8, 0.0 }
 0x305   : > { %v3867_v38 = vrot.slane %v3728_v3, 7  ;;  %v3730_v56 = vmax.f32 %v3636_v45, 0.0  ;;  %v3495_v43 = vpop.f32.mrb[163].mxu0 }
 0x307   : > { %v3868_v33 = vsel %vm1377_vm1, %v3865_v20, %v3867_v38  ;;  %v3869_v18 = vrot.slane %v3730_v56, 7  ;;  %v3048_v48 = vpop.f32.mrb[156].mxu1 }
 0x308   : > { %v3981_v55 = vmax.f32 %v3868_v33, %v3727_v46  ;;  %v3480_v58 = vadd.f32 %v3479_v41, %v3048_v48  ;;  %v3050_v16 = vpop.f32.mrb[157].mxu1 }
 0x309   : > { %v3870_v32 = vsel %vm1377_vm1, %v3867_v38, %v3869_v18  ;;  %v3482_v35 = vadd.f32 %v3481_v49, %v3050_v16  ;;  %v3052_v1 = vpop.f32.mrb[158].mxu1 }
 0x30a   : > { %v4028_v53 = vmax.f32 %v3981_v55, %v3728_v3  ;;  %v3982_v63 = vmax.f32 %v3870_v32, %v3729_v21  ;;  %v3484_v11 = vadd.f32 %v3483_v14, %v3052_v1  ;;  %v3054_v47 = vpop.f32.mrb[159].mxu1  ;;  %v3637_v6 = vadd.f32 %v7247_v34, %v3480_v58 }
 0x30b   : > { %v3638_v42 = vadd.f32 %v7243_v60, %v3482_v35  ;;  %v3486_v30 = vadd.f32 %v3485_v59, %v3054_v47 }
 0x30c   : > { %v3499_v36 = vpop.f32.mrb[164].mxu0  ;;  %4075 = vst [vmem:[%s7258_s17 + $0xe0] sm:$0xff] %v4028_v53  ;;  %v4029_v39 = vmax.f32 %v3982_v63, %v3730_v56  ;;  %v3639_v57 = vadd.f32 %v7247_v34, %v3484_v11  ;;  %v3731_v17 = vmax.f32 %v3637_v6, 0.0 }
 0x30d   : > { %v3501_v37 = vpop.f32.mrb[165].mxu0  ;;  %v3732_v0 = vmax.f32 %v3638_v42, 0.0  ;;  %v3640_v40 = vadd.f32 %v7243_v60, %v3486_v30 }
 0x30e   : > { %v3503_v41 = vpop.f32.mrb[166].mxu0  ;;  %4076 = vst [vmem:[%s7258_s17 + $0xe8] sm:$0xff] %v4029_v39  ;;  %v3733_v25 = vmax.f32 %v3639_v57, 0.0 }
 0x30f   : > { %v3505_v22 = vpop.f32.mrb[167].mxu0  ;;  %v3871_v49 = vrot.slane %v3732_v0, 7  ;;  %v3734_v9 = vmax.f32 %v3640_v40, 0.0 }
 0x311   : > { %v3058_v14 = vpop.f32.mrb[160].mxu1  ;;  %v3872_v44 = vsel %vm1377_vm1, %v3869_v18, %v3871_v49  ;;  %v3873_v59 = vrot.slane %v3734_v9, 7 }
 0x312   : > { %v3490_v24 = vadd.f32 %v3489_v10, %v3058_v14  ;;  %v3060_v27 = vpop.f32.mrb[161].mxu1  ;;  %v3983_v15 = vmax.f32 %v3872_v44, %v3731_v17 }
 0x313   : > { %v3492_v2 = vadd.f32 %v3491_v23, %v3060_v27  ;;  %v3062_v20 = vpop.f32.mrb[162].mxu1  ;;  %v3874_v5 = vsel %vm1377_vm1, %v3871_v49, %v3873_v59 }
 0x314   : > { %v3494_v13 = vadd.f32 %v3493_v28, %v3062_v20  ;;  %v3064_v26 = vpop.f32.mrb[163].mxu1  ;;  %v4030_v50 = vmax.f32 %v3983_v15, %v3732_v0  ;;  %v3984_v12 = vmax.f32 %v3874_v5, %v3733_v25  ;;  %v3641_v61 = vadd.f32 %v7247_v34, %v3490_v24 }
 0x315   : > { %v3642_v31 = vadd.f32 %v7243_v60, %v3492_v2  ;;  %v3496_v51 = vadd.f32 %v3495_v43, %v3064_v26 }
 0x316   : > { %v3509_v7 = vpop.f32.mrb[168].mxu0  ;;  %4077 = vst [vmem:[%s7258_s17 + $0xf0] sm:$0xff] %v4030_v50  ;;  %v4031_v29 = vmax.f32 %v3984_v12, %v3734_v9  ;;  %v3643_v52 = vadd.f32 %v7247_v34, %v3494_v13  ;;  %v3735_v23 = vmax.f32 %v3641_v61, 0.0 }
 0x317   : > { %v3736_v54 = vmax.f32 %v3642_v31, 0.0  ;;  %v3644_v4 = vadd.f32 %v7243_v60, %v3496_v51  ;;  %v3511_v62 = vpop.f32.mrb[169].mxu0 }
 0x318   : > { %v3513_v10 = vpop.f32.mrb[170].mxu0  ;;  %4078 = vst [vmem:[%s7258_s17 + $0xf8] sm:$0xff] %v4031_v29  ;;  %v3737_v43 = vmax.f32 %v3643_v52, 0.0 }
 0x319   : > { %v3875_v19 = vrot.slane %v3736_v54, 7  ;;  %v3738_v3 = vmax.f32 %v3644_v4, 0.0  ;;  %v3515_v45 = vpop.f32.mrb[171].mxu0 }
 0x31b   : > { %v3876_v8 = vsel %vm1377_vm1, %v3873_v59, %v3875_v19  ;;  %v3877_v28 = vrot.slane %v3738_v3, 7  ;;  %v3068_v38 = vpop.f32.mrb[164].mxu1 }
 0x31c   : > { %v3985_v56 = vmax.f32 %v3876_v8, %v3735_v23  ;;  %v3500_v46 = vadd.f32 %v3499_v36, %v3068_v38  ;;  %v3070_v33 = vpop.f32.mrb[165].mxu1 }
 0x31d   : > { %v3878_v18 = vsel %vm1377_vm1, %v3875_v19, %v3877_v28  ;;  %v3502_v48 = vadd.f32 %v3501_v37, %v3070_v33  ;;  %v3072_v55 = vpop.f32.mrb[166].mxu1 }
 0x31e   : > { %v4032_v21 = vmax.f32 %v3985_v56, %v3736_v54  ;;  %v3986_v58 = vmax.f32 %v3878_v18, %v3737_v43  ;;  %v3504_v16 = vadd.f32 %v3503_v41, %v3072_v55  ;;  %v3074_v32 = vpop.f32.mrb[167].mxu1  ;;  %v3645_v11 = vadd.f32 %v7247_v34, %v3500_v46 }
 0x31f   : > { %v3646_v35 = vadd.f32 %v7243_v60, %v3502_v48  ;;  %v3506_v1 = vadd.f32 %v3505_v22, %v3074_v32 }
 0x320   : > { %v3519_v53 = vpop.f32.mrb[172].mxu0  ;;  %4079 = vst [vmem:[%s7258_s17 + $0x100] sm:$0xff] %v4032_v21  ;;  %v4033_v63 = vmax.f32 %v3986_v58, %v3738_v3  ;;  %v3647_v39 = vadd.f32 %v7247_v34, %v3504_v16  ;;  %v3739_v40 = vmax.f32 %v3645_v11, 0.0 }
 0x321   : > { %v3521_v47 = vpop.f32.mrb[173].mxu0  ;;  %v3740_v42 = vmax.f32 %v3646_v35, 0.0  ;;  %v3648_v30 = vadd.f32 %v7243_v60, %v3506_v1 }
 0x322   : > { %v3523_v36 = vpop.f32.mrb[174].mxu0  ;;  %4080 = vst [vmem:[%s7258_s17 + $0x108] sm:$0xff] %v4033_v63  ;;  %v3741_v14 = vmax.f32 %v3647_v39, 0.0 }
 0x323   : > { %v3525_v6 = vpop.f32.mrb[175].mxu0  ;;  %v3879_v37 = vrot.slane %v3740_v42, 7  ;;  %v3742_v0 = vmax.f32 %v3648_v30, 0.0 }
 0x325   : > { %v3078_v41 = vpop.f32.mrb[168].mxu1  ;;  %v3880_v57 = vsel %vm1377_vm1, %v3877_v28, %v3879_v37  ;;  %v3881_v22 = vrot.slane %v3742_v0, 7 }
 0x326   : > { %v3510_v49 = vadd.f32 %v3509_v7, %v3078_v41  ;;  %v3080_v9 = vpop.f32.mrb[169].mxu1  ;;  %v3987_v17 = vmax.f32 %v3880_v57, %v3739_v40 }
 0x327   : > { %v3512_v44 = vadd.f32 %v3511_v62, %v3080_v9  ;;  %v3082_v59 = vpop.f32.mrb[170].mxu1  ;;  %v3882_v24 = vsel %vm1377_vm1, %v3879_v37, %v3881_v22 }
 0x328   : > { %v3514_v27 = vadd.f32 %v3513_v10, %v3082_v59  ;;  %v3084_v15 = vpop.f32.mrb[171].mxu1  ;;  %v4034_v25 = vmax.f32 %v3987_v17, %v3740_v42  ;;  %v3988_v2 = vmax.f32 %v3882_v24, %v3741_v14  ;;  %v3649_v13 = vadd.f32 %v7247_v34, %v3510_v49 }
 0x329   : > { %v3650_v20 = vadd.f32 %v7243_v60, %v3512_v44  ;;  %v3516_v5 = vadd.f32 %v3515_v45, %v3084_v15 }
 0x32a   : > { %v3529_v26 = vpop.f32.mrb[176].mxu0  ;;  %4081 = vst [vmem:[%s7258_s17 + $0x110] sm:$0xff] %v4034_v25  ;;  %v4035_v50 = vmax.f32 %v3988_v2, %v3742_v0  ;;  %v3651_v61 = vadd.f32 %v7247_v34, %v3514_v27  ;;  %v3743_v62 = vmax.f32 %v3649_v13, 0.0 }
 0x32b   : > { %v3744_v12 = vmax.f32 %v3650_v20, 0.0  ;;  %v3652_v31 = vadd.f32 %v7243_v60, %v3516_v5  ;;  %v3531_v51 = vpop.f32.mrb[177].mxu0 }
 0x32c   : > { %v3533_v7 = vpop.f32.mrb[178].mxu0  ;;  %4082 = vst [vmem:[%s7258_s17 + $0x118] sm:$0xff] %v4035_v50  ;;  %v3745_v45 = vmax.f32 %v3651_v61, 0.0 }
 0x32d   : > { %v3883_v29 = vrot.slane %v3744_v12, 7  ;;  %v3746_v54 = vmax.f32 %v3652_v31, 0.0  ;;  %v3535_v4 = vpop.f32.mrb[179].mxu0 }
 0x32f   : > { %v3884_v52 = vsel %vm1377_vm1, %v3881_v22, %v3883_v29  ;;  %v3885_v10 = vrot.slane %v3746_v54, 7  ;;  %v3088_v19 = vpop.f32.mrb[172].mxu1 }
 0x330   : > { %v3989_v3 = vmax.f32 %v3884_v52, %v3743_v62  ;;  %v3520_v23 = vadd.f32 %v3519_v53, %v3088_v19  ;;  %v3090_v8 = vpop.f32.mrb[173].mxu1 }
 0x331   : > { %v3886_v28 = vsel %vm1377_vm1, %v3883_v29, %v3885_v10  ;;  %v3522_v38 = vadd.f32 %v3521_v47, %v3090_v8  ;;  %v3092_v56 = vpop.f32.mrb[174].mxu1 }
 0x332   : > { %v4036_v43 = vmax.f32 %v3989_v3, %v3744_v12  ;;  %v3990_v46 = vmax.f32 %v3886_v28, %v3745_v45  ;;  %v3524_v33 = vadd.f32 %v3523_v36, %v3092_v56  ;;  %v3094_v18 = vpop.f32.mrb[175].mxu1  ;;  %v3653_v16 = vadd.f32 %v7247_v34, %v3520_v23 }
 0x333   : > { %v3654_v48 = vadd.f32 %v7243_v60, %v3522_v38  ;;  %v3526_v55 = vadd.f32 %v3525_v6, %v3094_v18  ;;  %v3539_v21 = vpop.f32.mrb[180].mxu0 }
 0x334   : > { %4083 = vst [vmem:[%s7258_s17 + $0x120] sm:$0xff] %v4036_v43  ;;  %v4037_v58 = vmax.f32 %v3990_v46, %v3746_v54  ;;  %v3541_v32 = vpop.f32.mrb[181].mxu0  ;;  %v3655_v63 = vadd.f32 %v7247_v34, %v3524_v33  ;;  %v3747_v30 = vmax.f32 %v3653_v16, 0.0 }
 0x335   : > { %v3748_v35 = vmax.f32 %v3654_v48, 0.0  ;;  %v3656_v1 = vadd.f32 %v7243_v60, %v3526_v55  ;;  %v3543_v53 = vpop.f32.mrb[182].mxu0 }
 0x336   : > { %4084 = vst [vmem:[%s7258_s17 + $0x128] sm:$0xff] %v4037_v58  ;;  %v3545_v11 = vpop.f32.mrb[183].mxu0  ;;  %v3749_v41 = vmax.f32 %v3655_v63, 0.0 }
 0x337   : > { %v3887_v47 = vrot.slane %v3748_v35, 7  ;;  %v3750_v42 = vmax.f32 %v3656_v1, 0.0 }
 0x338   : > { %v3098_v36 = vpop.f32.mrb[176].mxu1 }
 0x339   : > { %v3888_v39 = vsel %vm1377_vm1, %v3885_v10, %v3887_v47  ;;  %v3889_v6 = vrot.slane %v3750_v42, 7  ;;  %v3530_v37 = vadd.f32 %v3529_v26, %v3098_v36  ;;  %v3100_v0 = vpop.f32.mrb[177].mxu1 }
 0x33a   : > { %v3991_v40 = vmax.f32 %v3888_v39, %v3747_v30  ;;  %v3532_v57 = vadd.f32 %v3531_v51, %v3100_v0  ;;  %v3102_v22 = vpop.f32.mrb[178].mxu1 }
 0x33b   : > { %v3890_v49 = vsel %vm1377_vm1, %v3887_v47, %v3889_v6  ;;  %v3534_v9 = vadd.f32 %v3533_v7, %v3102_v22  ;;  %v3104_v17 = vpop.f32.mrb[179].mxu1  ;;  %v3549_v14 = vpop.f32.mrb[184].mxu0  ;;  %v3657_v25 = vadd.f32 %v7247_v34, %v3530_v37 }
 0x33c   : > { %v4038_v44 = vmax.f32 %v3991_v40, %v3748_v35  ;;  %v3992_v59 = vmax.f32 %v3890_v49, %v3749_v41  ;;  %v3658_v24 = vadd.f32 %v7243_v60, %v3532_v57  ;;  %v3536_v27 = vadd.f32 %v3535_v4, %v3104_v17  ;;  %v3551_v15 = vpop.f32.mrb[185].mxu0 }
 0x33d   : > { %v3553_v2 = vpop.f32.mrb[186].mxu0  ;;  %v3659_v50 = vadd.f32 %v7247_v34, %v3534_v9  ;;  %v3751_v61 = vmax.f32 %v3657_v25, 0.0 }
 0x33e   : > { %4085 = vst [vmem:[%s7258_s17 + $0x130] sm:$0xff] %v4038_v44  ;;  %v4039_v20 = vmax.f32 %v3992_v59, %v3750_v42  ;;  %v3752_v5 = vmax.f32 %v3658_v24, 0.0  ;;  %v3660_v13 = vadd.f32 %v7243_v60, %v3536_v27  ;;  %v3555_v26 = vpop.f32.mrb[187].mxu0 }
 0x33f   : > { %v3753_v19 = vmax.f32 %v3659_v50, 0.0 }
 0x340   : > { %4086 = vst [vmem:[%s7258_s17 + $0x138] sm:$0xff] %v4039_v20  ;;  %v3891_v12 = vrot.slane %v3752_v5, 7  ;;  %v3754_v31 = vmax.f32 %v3660_v13, 0.0  ;;  %v3108_v51 = vpop.f32.mrb[180].mxu1 }
 0x341   : > { %v3540_v7 = vadd.f32 %v3539_v21, %v3108_v51  ;;  %v3110_v29 = vpop.f32.mrb[181].mxu1 }
 0x342   : > { %v3892_v54 = vsel %vm1377_vm1, %v3889_v6, %v3891_v12  ;;  %v3893_v4 = vrot.slane %v3754_v31, 7  ;;  %v3542_v62 = vadd.f32 %v3541_v32, %v3110_v29  ;;  %v3112_v52 = vpop.f32.mrb[182].mxu1 }
 0x343   : > { %v3993_v10 = vmax.f32 %v3892_v54, %v3751_v61  ;;  %v3544_v3 = vadd.f32 %v3543_v53, %v3112_v52  ;;  %v3114_v45 = vpop.f32.mrb[183].mxu1  ;;  %v3559_v23 = vpop.f32.mrb[188].mxu0  ;;  %v3661_v33 = vadd.f32 %v7247_v34, %v3540_v7 }
 0x344   : > { %v3894_v8 = vsel %vm1377_vm1, %v3891_v12, %v3893_v4  ;;  %v3662_v28 = vadd.f32 %v7243_v60, %v3542_v62  ;;  %v3546_v38 = vadd.f32 %v3545_v11, %v3114_v45  ;;  %v3561_v56 = vpop.f32.mrb[189].mxu0 }
 0x345   : > { %v4040_v43 = vmax.f32 %v3993_v10, %v3752_v5  ;;  %v3994_v46 = vmax.f32 %v3894_v8, %v3753_v19  ;;  %v3563_v18 = vpop.f32.mrb[190].mxu0  ;;  %v3663_v16 = vadd.f32 %v7247_v34, %v3544_v3  ;;  %v3755_v53 = vmax.f32 %v3661_v33, 0.0 }
 0x346   : > { %v3756_v48 = vmax.f32 %v3662_v28, 0.0  ;;  %v3664_v55 = vadd.f32 %v7243_v60, %v3546_v38  ;;  %v3564_v21 = vpop.f32.mrb[191].mxu0 }
 0x347   : > { %4087 = vst [vmem:[%s7258_s17 + $0x140] sm:$0xff] %v4040_v43  ;;  %v4041_v58 = vmax.f32 %v3994_v46, %v3754_v31  ;;  %v3757_v6 = vmax.f32 %v3663_v16, 0.0 }
 0x348   : > { %v3895_v32 = vrot.slane %v3756_v48, 7  ;;  %v3758_v35 = vmax.f32 %v3664_v55, 0.0  ;;  %v3118_v1 = vpop.f32.mrb[184].mxu1 }
 0x349   : > { %4088 = vst [vmem:[%s7258_s17 + $0x148] sm:$0xff] %v4041_v58  ;;  %v3550_v63 = vadd.f32 %v3549_v14, %v3118_v1  ;;  %v3120_v11 = vpop.f32.mrb[185].mxu1 }
 0x34a   : > { %v3896_v47 = vsel %vm1377_vm1, %v3893_v4, %v3895_v32  ;;  %v3897_v42 = vrot.slane %v3758_v35, 7  ;;  %v3552_v30 = vadd.f32 %v3551_v15, %v3120_v11  ;;  %v3122_v36 = vpop.f32.mrb[186].mxu1 }
 0x34b   : > { %v3995_v39 = vmax.f32 %v3896_v47, %v3755_v53  ;;  %v3554_v37 = vadd.f32 %v3553_v2, %v3122_v36  ;;  %v3124_v0 = vpop.f32.mrb[187].mxu1  ;;  %v3665_v9 = vadd.f32 %v7247_v34, %v3550_v63 }
 0x34c   : > { %v3898_v40 = vsel %vm1377_vm1, %v3895_v32, %v3897_v42  ;;  %v3666_v41 = vadd.f32 %v7243_v60, %v3552_v30  ;;  %v3556_v57 = vadd.f32 %v3555_v26, %v3124_v0 }
 0x34d   : > { %v4042_v22 = vmax.f32 %v3995_v39, %v3756_v48  ;;  %v3996_v49 = vmax.f32 %v3898_v40, %v3757_v6  ;;  %v3667_v59 = vadd.f32 %v7247_v34, %v3554_v37  ;;  %v3759_v25 = vmax.f32 %v3665_v9, 0.0 }
 0x34e   : > { %v3760_v17 = vmax.f32 %v3666_v41, 0.0  ;;  %v3668_v14 = vadd.f32 %v7243_v60, %v3556_v57 }
 0x34f   : > { %4089 = vst [vmem:[%s7258_s17 + $0x150] sm:$0xff] %v4042_v22  ;;  %v4043_v44 = vmax.f32 %v3996_v49, %v3758_v35  ;;  %v3761_v31 = vmax.f32 %v3667_v59, 0.0 }
 0x350   : > { %v3899_v24 = vrot.slane %v3760_v17, 7  ;;  %v3762_v27 = vmax.f32 %v3668_v14, 0.0  ;;  %v3128_v15 = vpop.f32.mrb[188].mxu1 }
 0x351   : > { %4090 = vst [vmem:[%s7258_s17 + $0x158] sm:$0xff] %v4043_v44  ;;  %v3560_v2 = vadd.f32 %v3559_v23, %v3128_v15  ;;  %v3130_v20 = vpop.f32.mrb[189].mxu1 }
 0x352   : > { %v3900_v5 = vsel %vm1377_vm1, %v3897_v42, %v3899_v24  ;;  %v3901_v13 = vrot.slane %v3762_v27, 7  ;;  %v3562_v26 = vadd.f32 %v3561_v56, %v3130_v20  ;;  %v3132_v50 = vpop.f32.mrb[190].mxu1 }
 0x353   : > { %v3997_v12 = vmax.f32 %v3900_v5, %v3759_v25  ;;  %v3133_v51 = vpop.f32.mrb[191].mxu1  ;;  %v3669_v4 = vadd.f32 %v7247_v34, %v3560_v2 }
 0x354   : > { %v3902_v61 = vsel %vm1377_vm1, %v3899_v24, %v3901_v13  ;;  %v3670_v7 = vadd.f32 %v7243_v60, %v3562_v26 }
 0x355   : > { %v4044_v29 = vmax.f32 %v3997_v12, %v3760_v17  ;;  %v3998_v54 = vmax.f32 %v3902_v61, %v3761_v31  ;;  %v3763_v19 = vmax.f32 %v3669_v4, 0.0 }
 0x356   : > { %v3764_v62 = vmax.f32 %v3670_v7, 0.0 }
 0x357   : > { %4091 = vst [vmem:[%s7258_s17 + $0x160] sm:$0xff] %v4044_v29  ;;  %v4045_v52 = vmax.f32 %v3998_v54, %v3762_v27 }
 0x358   : > { %v3903_v10 = vrot.slane %v3764_v62, 7 }
 0x359   : > { %4092 = vst [vmem:[%s7258_s17 + $0x168] sm:$0xff] %v4045_v52 }
 0x35a   : > { %v3904_v3 = vsel %vm1377_vm1, %v3901_v13, %v3903_v10 }
 0x35b   : > { %v3999_v45 = vmax.f32 %v3904_v3, %v3763_v19 }
 0x35d   : > { %v4046_v23 = vmax.f32 %v3999_v45, %v3764_v62 }
 0x35f   : > { %4093 = vst [vmem:[%s7258_s17 + $0x170] sm:$0x3f] %v4046_v23 }
 0x360 PF: > { %s15_s18 = sadd.s32 1, %s4926_s18  }
 0x361   : > { %p12_p4 = scmp.ge.s32.totalorder %s15_s18, 4  }
 0x363   :  { %14 = sbr.rel (!%p12_p4) target bundleno = 1 (0x1), region = 71 }

</bundles_post_ra>
